<compile_context>
chip_gen: v7x
topology: tpu7x:2x2x1
jax: 0.10.0
libtpu: 0.0.40
codegen_flags: <defaults>
</compile_context>

<pallas_src>
import functools
import math

import jax
import jax.numpy as jnp
from jax import lax
from jax.experimental import pallas as pl
from jax.experimental.pallas import tpu as pltpu


# ----------------------------------------------------------------------------
# Helpers
# ----------------------------------------------------------------------------

_VMEM_LIMIT = 32 * 1024 * 1024


def _round_up(x, m):
    return ((x + m - 1) // m) * m


def _pick_batch_block(batch):
    # Fold as much of the batch as possible into the matmul M dimension, but
    # keep a parallel grid axis when the batch is large.
    if batch <= 8:
        return batch
    for cand in (8, 4, 2, 1):
        if batch % cand == 0:
            return cand
    return 1


def _layernorm(x, gamma, beta, eps):
    mu = jnp.mean(x, axis=-1, keepdims=True)
    var = jnp.mean(jnp.square(x - mu), axis=-1, keepdims=True)
    return (x - mu) * lax.rsqrt(var + eps) * gamma + beta


def _mha(x2d, wqkv, bqkv, wo, bo, key_valid, *, num_heads, head_dim, D, TB, S):
    # x2d: (TB*S, D) pre-normed activations.
    qkv = jnp.dot(x2d.astype(jnp.bfloat16), wqkv,
                  preferred_element_type=jnp.float32) + bqkv
    qkv = qkv.reshape(TB, S, 3 * D)                 # S multiple of 8: aligned
    scale = 1.0 / math.sqrt(head_dim)

    head_outs = []
    for h in range(num_heads):
        s0 = h * head_dim
        q = qkv[:, :, s0:s0 + head_dim]
        k = qkv[:, :, D + s0:D + s0 + head_dim]
        v = qkv[:, :, 2 * D + s0:2 * D + s0 + head_dim]

        s = jnp.einsum('bqd,bkd->bqk', q.astype(jnp.bfloat16),
                       k.astype(jnp.bfloat16),
                       preferred_element_type=jnp.float32) * scale
        s = jnp.where(key_valid, s, jnp.float32(-1e30))
        s = s - jnp.max(s, axis=-1, keepdims=True)
        e = jnp.exp(s)
        p = e * pl.reciprocal(jnp.sum(e, axis=-1, keepdims=True), approx=True)
        head_outs.append(
            jnp.einsum('bqk,bkd->bqd', p.astype(jnp.bfloat16),
                       v.astype(jnp.bfloat16),
                       preferred_element_type=jnp.float32))

    attn = jnp.concatenate(head_outs, axis=-1).reshape(TB * S, D)
    return jnp.dot(attn.astype(jnp.bfloat16), wo,
                   preferred_element_type=jnp.float32) + bo


# ----------------------------------------------------------------------------
# Fused ViT kernel: patch-embed -> encoder layers -> head, all in VMEM
# ----------------------------------------------------------------------------

def _vit_kernel(patches_ref, conv_w_ref, conv_b_ref, cls_ref, pos_ref,
                ln1g_ref, ln1b_ref, wqkv_ref, bqkv_ref, wo_ref, bo_ref,
                ln2g_ref, ln2b_ref, w1_ref, b1_ref, w2_ref, b2_ref,
                headg_ref, headb_ref, headw_ref, headbias_ref,
                out_ref, *, num_layers, num_heads, head_dim, num_patches,
                seq_pad, eps):
    S = seq_pad
    N = num_patches
    TB = patches_ref.shape[0] // S
    D = conv_w_ref.shape[1]

    # --- patch embedding (Conv2d as matmul) + class token + position emb ---
    emb = jnp.dot(patches_ref[...].astype(jnp.bfloat16), conv_w_ref[...],
                  preferred_element_type=jnp.float32) + conv_b_ref[...]
    emb = emb.reshape(TB, S, D)                      # padded patch rows -> bias only
    row = lax.broadcasted_iota(jnp.int32, (1, S, 1), 1)
    # internal token order: rows [0, N) = patches, row N = class token, rest pad
    x = jnp.where(row == N, cls_ref[...].reshape(1, 1, D), emb) + pos_ref[...]
    x = x.reshape(TB * S, D)                         # f32 residual stream

    # padded key positions (> N) must not contribute to any softmax
    key_valid = lax.broadcasted_iota(jnp.int32, (1, 1, S), 2) <= N

    # --- transformer encoder layers (norm_first) ---
    for l in range(num_layers):
        xn = _layernorm(x, ln1g_ref[l], ln1b_ref[l], eps)
        attn = _mha(xn, wqkv_ref[l], bqkv_ref[l], wo_ref[l], bo_ref[l],
                    key_valid, num_heads=num_heads, head_dim=head_dim,
                    D=D, TB=TB, S=S)
        x = x + attn                                  # dropout1 = identity

        x2n = _layernorm(x, ln2g_ref[l], ln2b_ref[l], eps)
        h1 = jnp.dot(x2n.astype(jnp.bfloat16), w1_ref[l],
                     preferred_element_type=jnp.float32) + b1_ref[l]
        # exact (erf) GELU, matching PyTorch F.gelu default
        h1 = 0.5 * h1 * (1.0 + lax.erf(h1 * (1.0 / math.sqrt(2.0))))
        h2 = jnp.dot(h1.astype(jnp.bfloat16), w2_ref[l],
                     preferred_element_type=jnp.float32) + b2_ref[l]
        x = x + h2                                    # dropout2 = identity

    # --- classification head on the class token (internal row N) ---
    x3 = x.reshape(TB, S, D)
    # masked sum picks exactly row N per batch element (cheap sublane reduce)
    cls_tok = jnp.sum(jnp.where(row == N, x3, jnp.float32(0.0)), axis=1)  # (TB, D)
    hn = _layernorm(cls_tok, headg_ref[...], headb_ref[...], eps)
    out_ref[...] = jnp.dot(hn.astype(jnp.bfloat16), headw_ref[...],
                           preferred_element_type=jnp.float32) + headbias_ref[...]


# ----------------------------------------------------------------------------
# Glue: patch extraction, parameter init, full forward
# ----------------------------------------------------------------------------

def extract_patches(x, patch_size):
    # NCHW -> (B, num_patches, C*p*p), features ordered (c, kh, kw), patches in
    # row-major (patch_row, patch_col) order: matches Conv2d + flatten + permute.
    B, C, H, W = x.shape
    p = patch_size
    Hp, Wp = H // p, W // p
    x = x.reshape(B, C, Hp, p, Wp, p)
    x = x.transpose(0, 2, 4, 1, 3, 5)                # (B, Hp, Wp, C, p, p)
    return x.reshape(B, Hp * Wp, C * p * p)


def init_params(key, *, in_channels, patch_size, embedding_dim, mlp_size,
                num_layers, num_patches, num_classes):
    D, M = embedding_dim, mlp_size
    keys = jax.random.split(key, 8 + num_layers)
    bf16 = jnp.bfloat16

    def n(k, shape, scale=0.02, dtype=jnp.float32):
        return (scale * jax.random.normal(k, shape)).astype(dtype)

    params = {}
    # Conv2d(in_ch, D, kernel=patch, stride=patch): weight (D, C, p, p), bias (D,)
    conv_w = n(keys[0], (D, in_channels, patch_size, patch_size))
    params["conv_w2d"] = conv_w.reshape(D, -1).T.astype(bf16)        # (C*p*p, D)
    params["conv_b"] = n(keys[1], (1, D))
    params["class_token"] = n(keys[2], (1, 1, D), scale=1.0)         # torch.randn
    params["pos_emb"] = n(keys[3], (1, num_patches + 1, D), scale=1.0)
    params["head_g"] = jnp.ones((1, D), jnp.float32)
    params["head_b"] = jnp.zeros((1, D), jnp.float32)

    c_pad = _round_up(num_classes, 128)               # lane-dense head output
    head_w = n(keys[4], (D, num_classes))
    params["head_w"] = (jnp.zeros((D, c_pad), jnp.float32)
                        .at[:, :num_classes].set(head_w).astype(bf16))
    head_bias = n(keys[5], (1, num_classes))
    params["head_bias"] = (jnp.zeros((1, c_pad), jnp.float32)
                           .at[:, :num_classes].set(head_bias))

    layers = []
    for i in range(num_layers):
        lk = jax.random.split(keys[8 + i], 6)
        layers.append(dict(
            ln1_g=jnp.ones((1, D), jnp.float32), ln1_b=jnp.zeros((1, D), jnp.float32),
            # wqkv = in_proj_weight.T : columns [0:D)=Q, [D:2D)=K, [2D:3D)=V
            wqkv=n(lk[0], (D, 3 * D), dtype=bf16), bqkv=n(lk[1], (1, 3 * D)),
            # wo = out_proj.weight.T
            wo=n(lk[2], (D, D), dtype=bf16), bo=n(lk[3], (1, D)),
            ln2_g=jnp.ones((1, D), jnp.float32), ln2_b=jnp.zeros((1, D), jnp.float32),
            w1=n(lk[4], (D, M), dtype=bf16), b1=jnp.zeros((1, M), jnp.float32),
            w2=n(lk[5], (M, D), dtype=bf16), b2=jnp.zeros((1, D), jnp.float32)))
    # Stack per-layer params along a leading layer axis so the whole encoder
    # runs inside one pallas_call (indexed with static layer indices).
    for name in layers[0]:
        params[name] = jnp.stack([lyr[name] for lyr in layers])
    return params


def vit_forward(x, params, *, patch_size, num_heads, num_classes):
    B = x.shape[0]
    F, D = params["conv_w2d"].shape
    L = params["wqkv"].shape[0]
    M = params["w1"].shape[2]
    C_pad = params["head_w"].shape[1]

    patches = extract_patches(x.astype(jnp.float32), patch_size)     # (B, N, F)
    N = patches.shape[1]
    S_real = N + 1
    S = _round_up(S_real, 8)

    # Internal token order: [patch_0..patch_{N-1}, cls, pad...]; attention is
    # permutation invariant so outputs match PyTorch's [cls, patches] order.
    patches_pad = jnp.pad(patches, ((0, 0), (0, S - N), (0, 0))).reshape(B * S, F)
    pos = params["pos_emb"][0]                                        # (S_real, D)
    pos_internal = jnp.concatenate(
        [pos[1:], pos[:1], jnp.zeros((S - S_real, D), jnp.float32)], axis=0)
    cls = params["class_token"][0]                                    # (1, D)

    tb = _pick_batch_block(B)
    head_dim = D // num_heads
    kern = functools.partial(
        _vit_kernel, num_layers=L, num_heads=num_heads, head_dim=head_dim,
        num_patches=N, seq_pad=S, eps=1e-5)

    def rep(shape):
        # grid-invariant block: DMA'd once, not re-staged across batch tiles
        return pl.BlockSpec(shape, lambda *_: (0,) * len(shape))

    out = pl.pallas_call(
        kern,
        out_shape=jax.ShapeDtypeStruct((B, C_pad), jnp.float32),
        grid=(B // tb,),
        in_specs=[
            pl.BlockSpec((tb * S, F), lambda b: (b, 0)),     # patches (batch-tiled)
            rep((F, D)), rep((1, D)),                        # conv weight / bias
            rep((1, D)), rep((S, D)),                        # class token / pos
            rep((L, 1, D)), rep((L, 1, D)),                  # ln1 gamma / beta
            rep((L, D, 3 * D)), rep((L, 1, 3 * D)),          # qkv proj
            rep((L, D, D)), rep((L, 1, D)),                  # out proj
            rep((L, 1, D)), rep((L, 1, D)),                  # ln2 gamma / beta
            rep((L, D, M)), rep((L, 1, M)),                  # mlp fc1
            rep((L, M, D)), rep((L, 1, D)),                  # mlp fc2
            rep((1, D)), rep((1, D)),                        # head LN gamma / beta
            rep((D, C_pad)), rep((1, C_pad)),                # head linear
        ],
        out_specs=pl.BlockSpec((tb, C_pad), lambda b: (b, 0)),
        compiler_params=pltpu.CompilerParams(
            dimension_semantics=("parallel",),
            vmem_limit_bytes=_VMEM_LIMIT),
    )(patches_pad, params["conv_w2d"], params["conv_b"], cls, pos_internal,
      params["ln1_g"], params["ln1_b"], params["wqkv"], params["bqkv"],
      params["wo"], params["bo"], params["ln2_g"], params["ln2_b"],
      params["w1"], params["b1"], params["w2"], params["b2"],
      params["head_g"], params["head_b"], params["head_w"], params["head_bias"])
    return out[:, :num_classes]


# ----------------------------------------------------------------------------
# Demo
# ----------------------------------------------------------------------------

if __name__ == "__main__":
    # Small-config ViT consistent with the module's constructor:
    # img_size=16, in_channels=4, patch_size=4, embedding_dim=32, mlp_size=64,
    # heads=4, num_encoder_layers=2, num_classes=3 -> num_patches=16, S=17.
    B, C, IMG, P = 2, 4, 16, 4
    D, MLP, HEADS, LAYERS, CLASSES = 32, 64, 4, 2, 3
    NUM_PATCHES = (IMG // P) * (IMG // P)

    root = jax.random.PRNGKey(0)
    kx, kp = jax.random.split(root)
    x = jax.random.normal(kx, (B, C, IMG, IMG), dtype=jnp.float32)   # NCHW

    params = init_params(kp, in_channels=C, patch_size=P, embedding_dim=D,
                         mlp_size=MLP, num_layers=LAYERS,
                         num_patches=NUM_PATCHES, num_classes=CLASSES)

    fwd = jax.jit(functools.partial(vit_forward, patch_size=P,
                                    num_heads=HEADS, num_classes=CLASSES))
    logits = jax.block_until_ready(fwd(x, params))

    assert logits.shape == (B, CLASSES), logits.shape
    assert jnp.all(jnp.isfinite(logits))
    print("KERNEL_OK")
</pallas_src>

<mosaic_0001>
module attributes {stable_mosaic.version = 11 : i64} {
  func.func @_vit_kernel(%arg0: i32, %arg1: memref<48x64xf32, #tpu.memory_space<vmem>>, %arg2: memref<64x32xbf16, #tpu.memory_space<vmem>>, %arg3: memref<1x32xf32, #tpu.memory_space<vmem>>, %arg4: memref<1x32xf32, #tpu.memory_space<vmem>>, %arg5: memref<24x32xf32, #tpu.memory_space<vmem>>, %arg6: memref<2x1x32xf32, #tpu.memory_space<vmem>>, %arg7: memref<2x1x32xf32, #tpu.memory_space<vmem>>, %arg8: memref<2x32x96xbf16, #tpu.memory_space<vmem>>, %arg9: memref<2x1x96xf32, #tpu.memory_space<vmem>>, %arg10: memref<2x32x32xbf16, #tpu.memory_space<vmem>>, %arg11: memref<2x1x32xf32, #tpu.memory_space<vmem>>, %arg12: memref<2x1x32xf32, #tpu.memory_space<vmem>>, %arg13: memref<2x1x32xf32, #tpu.memory_space<vmem>>, %arg14: memref<2x32x64xbf16, #tpu.memory_space<vmem>>, %arg15: memref<2x1x64xf32, #tpu.memory_space<vmem>>, %arg16: memref<2x64x32xbf16, #tpu.memory_space<vmem>>, %arg17: memref<2x1x32xf32, #tpu.memory_space<vmem>>, %arg18: memref<1x32xf32, #tpu.memory_space<vmem>>, %arg19: memref<1x32xf32, #tpu.memory_space<vmem>>, %arg20: memref<32x128xbf16, #tpu.memory_space<vmem>>, %arg21: memref<1x128xf32, #tpu.memory_space<vmem>>, %arg22: memref<2x128xf32, #tpu.memory_space<vmem>>) attributes {dimension_semantics = [#tpu.dimension_semantics<parallel>], iteration_bounds = array<i64: 1>, scalar_prefetch = 0 : i64, scratch_operands = 0 : i64, tpu.core_type = #tpu.core_type<tc>, window_params = [{transform_indices = @transform_0, window_bounds = array<i64: 48, 64>}, {pipeline_mode = #tpu.pipeline_mode<synchronous>, transform_indices = @transform_1, window_bounds = array<i64: 64, 32>}, {pipeline_mode = #tpu.pipeline_mode<synchronous>, transform_indices = @transform_2, window_bounds = array<i64: 1, 32>}, {pipeline_mode = #tpu.pipeline_mode<synchronous>, transform_indices = @transform_3, window_bounds = array<i64: 1, 32>}, {pipeline_mode = #tpu.pipeline_mode<synchronous>, transform_indices = @transform_4, window_bounds = array<i64: 24, 32>}, {pipeline_mode = #tpu.pipeline_mode<synchronous>, transform_indices = @transform_5, window_bounds = array<i64: 2, 1, 32>}, {pipeline_mode = #tpu.pipeline_mode<synchronous>, transform_indices = @transform_6, window_bounds = array<i64: 2, 1, 32>}, {pipeline_mode = #tpu.pipeline_mode<synchronous>, transform_indices = @transform_7, window_bounds = array<i64: 2, 32, 96>}, {pipeline_mode = #tpu.pipeline_mode<synchronous>, transform_indices = @transform_8, window_bounds = array<i64: 2, 1, 96>}, {pipeline_mode = #tpu.pipeline_mode<synchronous>, transform_indices = @transform_9, window_bounds = array<i64: 2, 32, 32>}, {pipeline_mode = #tpu.pipeline_mode<synchronous>, transform_indices = @transform_10, window_bounds = array<i64: 2, 1, 32>}, {pipeline_mode = #tpu.pipeline_mode<synchronous>, transform_indices = @transform_11, window_bounds = array<i64: 2, 1, 32>}, {pipeline_mode = #tpu.pipeline_mode<synchronous>, transform_indices = @transform_12, window_bounds = array<i64: 2, 1, 32>}, {pipeline_mode = #tpu.pipeline_mode<synchronous>, transform_indices = @transform_13, window_bounds = array<i64: 2, 32, 64>}, {pipeline_mode = #tpu.pipeline_mode<synchronous>, transform_indices = @transform_14, window_bounds = array<i64: 2, 1, 64>}, {pipeline_mode = #tpu.pipeline_mode<synchronous>, transform_indices = @transform_15, window_bounds = array<i64: 2, 64, 32>}, {pipeline_mode = #tpu.pipeline_mode<synchronous>, transform_indices = @transform_16, window_bounds = array<i64: 2, 1, 32>}, {pipeline_mode = #tpu.pipeline_mode<synchronous>, transform_indices = @transform_17, window_bounds = array<i64: 1, 32>}, {pipeline_mode = #tpu.pipeline_mode<synchronous>, transform_indices = @transform_18, window_bounds = array<i64: 1, 32>}, {pipeline_mode = #tpu.pipeline_mode<synchronous>, transform_indices = @transform_19, window_bounds = array<i64: 32, 128>}, {pipeline_mode = #tpu.pipeline_mode<synchronous>, transform_indices = @transform_20, window_bounds = array<i64: 1, 128>}, {transform_indices = @transform_21, window_bounds = array<i64: 2, 128>}]} {
    %c0 = arith.constant 0 : index
    %c0_0 = arith.constant 0 : index
    %0 = vector.load %arg1[%c0, %c0_0] : memref<48x64xf32, #tpu.memory_space<vmem>>, vector<48x64xf32>
    %1 = arith.truncf %0 : vector<48x64xf32> to vector<48x64xbf16>
    %c0_1 = arith.constant 0 : index
    %c0_2 = arith.constant 0 : index
    %2 = vector.load %arg2[%c0_1, %c0_2] : memref<64x32xbf16, #tpu.memory_space<vmem>>, vector<64x32xbf16>
    %cst = arith.constant dense<0.000000e+00> : vector<48x32xf32>
    %3 = tpu.matmul %1, %2, %cst {dimension_numbers = #tpu.dot_dimension_numbers<[1], [0], [0], [1], [0, 0, 1, 1], [], []>} : vector<48x64xbf16>, vector<64x32xbf16>, vector<48x32xf32> -> vector<48x32xf32>
    %c0_3 = arith.constant 0 : index
    %c0_4 = arith.constant 0 : index
    %4 = vector.load %arg3[%c0_3, %c0_4] : memref<1x32xf32, #tpu.memory_space<vmem>>, vector<1x32xf32>
    %5 = vector.broadcast %4 : vector<1x32xf32> to vector<48x32xf32>
    %6 = arith.addf %3, %5 : vector<48x32xf32>
    %7 = vector.shape_cast %6 : vector<48x32xf32> to vector<2x24x32xf32>
    %8 = tpu.iota {dimensions = array<i32: 1>} : vector<1x24x1xi32>
    %c16_i32 = arith.constant 16 : i32
    %9 = vector.broadcast %c16_i32 : i32 to vector<1x24x1xi32>
    %10 = arith.cmpi eq, %8, %9 : vector<1x24x1xi32>
    %c0_5 = arith.constant 0 : index
    %c0_6 = arith.constant 0 : index
    %11 = vector.load %arg4[%c0_5, %c0_6] : memref<1x32xf32, #tpu.memory_space<vmem>>, vector<1x32xf32>
    %12 = vector.shape_cast %11 : vector<1x32xf32> to vector<1x1x32xf32>
    %13 = vector.shape_cast %10 : vector<1x24x1xi1> to vector<1x24x1xi1>
    %14 = vector.broadcast %13 : vector<1x24x1xi1> to vector<2x24x32xi1>
    %15 = vector.shape_cast %12 : vector<1x1x32xf32> to vector<1x1x32xf32>
    %16 = vector.broadcast %15 : vector<1x1x32xf32> to vector<2x24x32xf32>
    %17 = arith.select %14, %16, %7 : vector<2x24x32xi1>, vector<2x24x32xf32>
    %c0_7 = arith.constant 0 : index
    %c0_8 = arith.constant 0 : index
    %18 = vector.load %arg5[%c0_7, %c0_8] : memref<24x32xf32, #tpu.memory_space<vmem>>, vector<24x32xf32>
    %19 = vector.shape_cast %18 : vector<24x32xf32> to vector<1x24x32xf32>
    %20 = vector.broadcast %19 : vector<1x24x32xf32> to vector<2x24x32xf32>
    %21 = arith.addf %17, %20 : vector<2x24x32xf32>
    %22 = vector.shape_cast %21 : vector<2x24x32xf32> to vector<48x32xf32>
    %23 = tpu.iota {dimensions = array<i32: 2>} : vector<1x1x24xi32>
    %c16_i32_9 = arith.constant 16 : i32
    %24 = vector.broadcast %c16_i32_9 : i32 to vector<1x1x24xi32>
    %25 = arith.cmpi sle, %23, %24 : vector<1x1x24xi32>
    %c0_10 = arith.constant 0 : index
    %c0_11 = arith.constant 0 : index
    %c0_12 = arith.constant 0 : index
    %26 = vector.load %arg6[%c0_10, %c0_11, %c0_12] : memref<2x1x32xf32, #tpu.memory_space<vmem>>, vector<1x1x32xf32>
    %27 = vector.shape_cast %26 : vector<1x1x32xf32> to vector<1x32xf32>
    %c0_13 = arith.constant 0 : index
    %c0_14 = arith.constant 0 : index
    %c0_15 = arith.constant 0 : index
    %28 = vector.load %arg7[%c0_13, %c0_14, %c0_15] : memref<2x1x32xf32, #tpu.memory_space<vmem>>, vector<1x1x32xf32>
    %29 = vector.shape_cast %28 : vector<1x1x32xf32> to vector<1x32xf32>
    %cst_16 = arith.constant dense<0.000000e+00> : vector<48xf32>
    %30 = vector.multi_reduction <add>, %22, %cst_16 [1] : vector<48x32xf32> to vector<48xf32>
    %31 = vector.shape_cast %30 : vector<48xf32> to vector<48x1xf32>
    %cst_17 = arith.constant 3.200000e+01 : f32
    %32 = vector.broadcast %cst_17 : f32 to vector<48x1xf32>
    %33 = arith.divf %31, %32 : vector<48x1xf32>
    %34 = vector.broadcast %33 : vector<48x1xf32> to vector<48x32xf32>
    %35 = arith.subf %22, %34 : vector<48x32xf32>
    %36 = arith.mulf %35, %35 : vector<48x32xf32>
    %cst_18 = arith.constant dense<0.000000e+00> : vector<48xf32>
    %37 = vector.multi_reduction <add>, %36, %cst_18 [1] : vector<48x32xf32> to vector<48xf32>
    %38 = vector.shape_cast %37 : vector<48xf32> to vector<48x1xf32>
    %cst_19 = arith.constant 3.200000e+01 : f32
    %39 = vector.broadcast %cst_19 : f32 to vector<48x1xf32>
    %40 = arith.divf %38, %39 : vector<48x1xf32>
    %41 = vector.broadcast %33 : vector<48x1xf32> to vector<48x32xf32>
    %42 = arith.subf %22, %41 : vector<48x32xf32>
    %cst_20 = arith.constant 9.99999974E-6 : f32
    %43 = vector.broadcast %cst_20 : f32 to vector<48x1xf32>
    %44 = arith.addf %40, %43 : vector<48x1xf32>
    %45 = math.rsqrt %44 : vector<48x1xf32>
    %46 = vector.broadcast %45 : vector<48x1xf32> to vector<48x32xf32>
    %47 = arith.mulf %42, %46 : vector<48x32xf32>
    %48 = vector.broadcast %27 : vector<1x32xf32> to vector<48x32xf32>
    %49 = arith.mulf %47, %48 : vector<48x32xf32>
    %50 = vector.broadcast %29 : vector<1x32xf32> to vector<48x32xf32>
    %51 = arith.addf %49, %50 : vector<48x32xf32>
    %c0_21 = arith.constant 0 : index
    %c0_22 = arith.constant 0 : index
    %c0_23 = arith.constant 0 : index
    %52 = vector.load %arg8[%c0_21, %c0_22, %c0_23] : memref<2x32x96xbf16, #tpu.memory_space<vmem>>, vector<1x32x96xbf16>
    %53 = vector.shape_cast %52 : vector<1x32x96xbf16> to vector<32x96xbf16>
    %c0_24 = arith.constant 0 : index
    %c0_25 = arith.constant 0 : index
    %c0_26 = arith.constant 0 : index
    %54 = vector.load %arg9[%c0_24, %c0_25, %c0_26] : memref<2x1x96xf32, #tpu.memory_space<vmem>>, vector<1x1x96xf32>
    %55 = vector.shape_cast %54 : vector<1x1x96xf32> to vector<1x96xf32>
    %c0_27 = arith.constant 0 : index
    %c0_28 = arith.constant 0 : index
    %c0_29 = arith.constant 0 : index
    %56 = vector.load %arg10[%c0_27, %c0_28, %c0_29] : memref<2x32x32xbf16, #tpu.memory_space<vmem>>, vector<1x32x32xbf16>
    %57 = vector.shape_cast %56 : vector<1x32x32xbf16> to vector<32x32xbf16>
    %c0_30 = arith.constant 0 : index
    %c0_31 = arith.constant 0 : index
    %c0_32 = arith.constant 0 : index
    %58 = vector.load %arg11[%c0_30, %c0_31, %c0_32] : memref<2x1x32xf32, #tpu.memory_space<vmem>>, vector<1x1x32xf32>
    %59 = vector.shape_cast %58 : vector<1x1x32xf32> to vector<1x32xf32>
    %60 = arith.truncf %51 : vector<48x32xf32> to vector<48x32xbf16>
    %cst_33 = arith.constant dense<0.000000e+00> : vector<48x96xf32>
    %61 = tpu.matmul %60, %53, %cst_33 {dimension_numbers = #tpu.dot_dimension_numbers<[1], [0], [0], [1], [0, 0, 1, 1], [], []>} : vector<48x32xbf16>, vector<32x96xbf16>, vector<48x96xf32> -> vector<48x96xf32>
    %62 = vector.broadcast %55 : vector<1x96xf32> to vector<48x96xf32>
    %63 = arith.addf %61, %62 : vector<48x96xf32>
    %64 = vector.shape_cast %63 : vector<48x96xf32> to vector<2x24x96xf32>
    %65 = vector.extract_strided_slice %64 {offsets = [0, 0, 0], sizes = [2, 24, 8], strides = [1, 1, 1]} : vector<2x24x96xf32> to vector<2x24x8xf32>
    %66 = vector.extract_strided_slice %64 {offsets = [0, 0, 32], sizes = [2, 24, 8], strides = [1, 1, 1]} : vector<2x24x96xf32> to vector<2x24x8xf32>
    %67 = vector.extract_strided_slice %64 {offsets = [0, 0, 64], sizes = [2, 24, 8], strides = [1, 1, 1]} : vector<2x24x96xf32> to vector<2x24x8xf32>
    %68 = arith.truncf %65 : vector<2x24x8xf32> to vector<2x24x8xbf16>
    %69 = arith.truncf %66 : vector<2x24x8xf32> to vector<2x24x8xbf16>
    "tpu.trace_start"() <{level = 10 : i32, message = "bqd,bkd->bqk"}> : () -> ()
    %cst_34 = arith.constant dense<0.000000e+00> : vector<2x24x24xf32>
    %70 = tpu.matmul %68, %69, %cst_34 {dimension_numbers = #tpu.dot_dimension_numbers<[2], [2], [1], [1], [0, 0, 0, 1, 1, 1], [0], [0]>} : vector<2x24x8xbf16>, vector<2x24x8xbf16>, vector<2x24x24xf32> -> vector<2x24x24xf32>
    "tpu.trace_stop"() : () -> ()
    %cst_35 = arith.constant 0.353553385 : f32
    %71 = vector.broadcast %cst_35 : f32 to vector<2x24x24xf32>
    %72 = arith.mulf %70, %71 : vector<2x24x24xf32>
    %cst_36 = arith.constant -1.000000e+30 : f32
    %73 = vector.shape_cast %25 : vector<1x1x24xi1> to vector<1x1x24xi1>
    %74 = vector.broadcast %73 : vector<1x1x24xi1> to vector<2x24x24xi1>
    %75 = vector.broadcast %cst_36 : f32 to vector<2x24x24xf32>
    %76 = arith.select %74, %72, %75 : vector<2x24x24xi1>, vector<2x24x24xf32>
    %cst_37 = arith.constant dense<0xFF800000> : vector<2x24xf32>
    %77 = vector.multi_reduction <maximumf>, %76, %cst_37 [2] : vector<2x24x24xf32> to vector<2x24xf32>
    %78 = vector.shape_cast %77 : vector<2x24xf32> to vector<2x24x1xf32>
    %79 = vector.broadcast %78 : vector<2x24x1xf32> to vector<2x24x24xf32>
    %80 = arith.subf %76, %79 : vector<2x24x24xf32>
    %81 = math.exp %80 : vector<2x24x24xf32>
    %cst_38 = arith.constant dense<0.000000e+00> : vector<2x24xf32>
    %82 = vector.multi_reduction <add>, %81, %cst_38 [2] : vector<2x24x24xf32> to vector<2x24xf32>
    %83 = vector.shape_cast %82 : vector<2x24xf32> to vector<2x24x1xf32>
    %84 = tpu.reciprocal %83 {approx = true} : vector<2x24x1xf32> -> vector<2x24x1xf32>
    %85 = vector.broadcast %84 : vector<2x24x1xf32> to vector<2x24x24xf32>
    %86 = arith.mulf %81, %85 : vector<2x24x24xf32>
    %87 = arith.truncf %86 : vector<2x24x24xf32> to vector<2x24x24xbf16>
    %88 = arith.truncf %67 : vector<2x24x8xf32> to vector<2x24x8xbf16>
    "tpu.trace_start"() <{level = 10 : i32, message = "bqk,bkd->bqd"}> : () -> ()
    %cst_39 = arith.constant dense<0.000000e+00> : vector<2x24x8xf32>
    %89 = tpu.matmul %87, %88, %cst_39 {dimension_numbers = #tpu.dot_dimension_numbers<[2], [1], [1], [2], [0, 0, 0, 1, 1, 2], [0], [0]>} : vector<2x24x24xbf16>, vector<2x24x8xbf16>, vector<2x24x8xf32> -> vector<2x24x8xf32>
    "tpu.trace_stop"() : () -> ()
    %90 = vector.extract_strided_slice %64 {offsets = [0, 0, 8], sizes = [2, 24, 8], strides = [1, 1, 1]} : vector<2x24x96xf32> to vector<2x24x8xf32>
    %91 = vector.extract_strided_slice %64 {offsets = [0, 0, 40], sizes = [2, 24, 8], strides = [1, 1, 1]} : vector<2x24x96xf32> to vector<2x24x8xf32>
    %92 = vector.extract_strided_slice %64 {offsets = [0, 0, 72], sizes = [2, 24, 8], strides = [1, 1, 1]} : vector<2x24x96xf32> to vector<2x24x8xf32>
    %93 = arith.truncf %90 : vector<2x24x8xf32> to vector<2x24x8xbf16>
    %94 = arith.truncf %91 : vector<2x24x8xf32> to vector<2x24x8xbf16>
    "tpu.trace_start"() <{level = 10 : i32, message = "bqd,bkd->bqk"}> : () -> ()
    %cst_40 = arith.constant dense<0.000000e+00> : vector<2x24x24xf32>
    %95 = tpu.matmul %93, %94, %cst_40 {dimension_numbers = #tpu.dot_dimension_numbers<[2], [2], [1], [1], [0, 0, 0, 1, 1, 1], [0], [0]>} : vector<2x24x8xbf16>, vector<2x24x8xbf16>, vector<2x24x24xf32> -> vector<2x24x24xf32>
    "tpu.trace_stop"() : () -> ()
    %cst_41 = arith.constant 0.353553385 : f32
    %96 = vector.broadcast %cst_41 : f32 to vector<2x24x24xf32>
    %97 = arith.mulf %95, %96 : vector<2x24x24xf32>
    %cst_42 = arith.constant -1.000000e+30 : f32
    %98 = vector.shape_cast %25 : vector<1x1x24xi1> to vector<1x1x24xi1>
    %99 = vector.broadcast %98 : vector<1x1x24xi1> to vector<2x24x24xi1>
    %100 = vector.broadcast %cst_42 : f32 to vector<2x24x24xf32>
    %101 = arith.select %99, %97, %100 : vector<2x24x24xi1>, vector<2x24x24xf32>
    %cst_43 = arith.constant dense<0xFF800000> : vector<2x24xf32>
    %102 = vector.multi_reduction <maximumf>, %101, %cst_43 [2] : vector<2x24x24xf32> to vector<2x24xf32>
    %103 = vector.shape_cast %102 : vector<2x24xf32> to vector<2x24x1xf32>
    %104 = vector.broadcast %103 : vector<2x24x1xf32> to vector<2x24x24xf32>
    %105 = arith.subf %101, %104 : vector<2x24x24xf32>
    %106 = math.exp %105 : vector<2x24x24xf32>
    %cst_44 = arith.constant dense<0.000000e+00> : vector<2x24xf32>
    %107 = vector.multi_reduction <add>, %106, %cst_44 [2] : vector<2x24x24xf32> to vector<2x24xf32>
    %108 = vector.shape_cast %107 : vector<2x24xf32> to vector<2x24x1xf32>
    %109 = tpu.reciprocal %108 {approx = true} : vector<2x24x1xf32> -> vector<2x24x1xf32>
    %110 = vector.broadcast %109 : vector<2x24x1xf32> to vector<2x24x24xf32>
    %111 = arith.mulf %106, %110 : vector<2x24x24xf32>
    %112 = arith.truncf %111 : vector<2x24x24xf32> to vector<2x24x24xbf16>
    %113 = arith.truncf %92 : vector<2x24x8xf32> to vector<2x24x8xbf16>
    "tpu.trace_start"() <{level = 10 : i32, message = "bqk,bkd->bqd"}> : () -> ()
    %cst_45 = arith.constant dense<0.000000e+00> : vector<2x24x8xf32>
    %114 = tpu.matmul %112, %113, %cst_45 {dimension_numbers = #tpu.dot_dimension_numbers<[2], [1], [1], [2], [0, 0, 0, 1, 1, 2], [0], [0]>} : vector<2x24x24xbf16>, vector<2x24x8xbf16>, vector<2x24x8xf32> -> vector<2x24x8xf32>
    "tpu.trace_stop"() : () -> ()
    %115 = vector.extract_strided_slice %64 {offsets = [0, 0, 16], sizes = [2, 24, 8], strides = [1, 1, 1]} : vector<2x24x96xf32> to vector<2x24x8xf32>
    %116 = vector.extract_strided_slice %64 {offsets = [0, 0, 48], sizes = [2, 24, 8], strides = [1, 1, 1]} : vector<2x24x96xf32> to vector<2x24x8xf32>
    %117 = vector.extract_strided_slice %64 {offsets = [0, 0, 80], sizes = [2, 24, 8], strides = [1, 1, 1]} : vector<2x24x96xf32> to vector<2x24x8xf32>
    %118 = arith.truncf %115 : vector<2x24x8xf32> to vector<2x24x8xbf16>
    %119 = arith.truncf %116 : vector<2x24x8xf32> to vector<2x24x8xbf16>
    "tpu.trace_start"() <{level = 10 : i32, message = "bqd,bkd->bqk"}> : () -> ()
    %cst_46 = arith.constant dense<0.000000e+00> : vector<2x24x24xf32>
    %120 = tpu.matmul %118, %119, %cst_46 {dimension_numbers = #tpu.dot_dimension_numbers<[2], [2], [1], [1], [0, 0, 0, 1, 1, 1], [0], [0]>} : vector<2x24x8xbf16>, vector<2x24x8xbf16>, vector<2x24x24xf32> -> vector<2x24x24xf32>
    "tpu.trace_stop"() : () -> ()
    %cst_47 = arith.constant 0.353553385 : f32
    %121 = vector.broadcast %cst_47 : f32 to vector<2x24x24xf32>
    %122 = arith.mulf %120, %121 : vector<2x24x24xf32>
    %cst_48 = arith.constant -1.000000e+30 : f32
    %123 = vector.shape_cast %25 : vector<1x1x24xi1> to vector<1x1x24xi1>
    %124 = vector.broadcast %123 : vector<1x1x24xi1> to vector<2x24x24xi1>
    %125 = vector.broadcast %cst_48 : f32 to vector<2x24x24xf32>
    %126 = arith.select %124, %122, %125 : vector<2x24x24xi1>, vector<2x24x24xf32>
    %cst_49 = arith.constant dense<0xFF800000> : vector<2x24xf32>
    %127 = vector.multi_reduction <maximumf>, %126, %cst_49 [2] : vector<2x24x24xf32> to vector<2x24xf32>
    %128 = vector.shape_cast %127 : vector<2x24xf32> to vector<2x24x1xf32>
    %129 = vector.broadcast %128 : vector<2x24x1xf32> to vector<2x24x24xf32>
    %130 = arith.subf %126, %129 : vector<2x24x24xf32>
    %131 = math.exp %130 : vector<2x24x24xf32>
    %cst_50 = arith.constant dense<0.000000e+00> : vector<2x24xf32>
    %132 = vector.multi_reduction <add>, %131, %cst_50 [2] : vector<2x24x24xf32> to vector<2x24xf32>
    %133 = vector.shape_cast %132 : vector<2x24xf32> to vector<2x24x1xf32>
    %134 = tpu.reciprocal %133 {approx = true} : vector<2x24x1xf32> -> vector<2x24x1xf32>
    %135 = vector.broadcast %134 : vector<2x24x1xf32> to vector<2x24x24xf32>
    %136 = arith.mulf %131, %135 : vector<2x24x24xf32>
    %137 = arith.truncf %136 : vector<2x24x24xf32> to vector<2x24x24xbf16>
    %138 = arith.truncf %117 : vector<2x24x8xf32> to vector<2x24x8xbf16>
    "tpu.trace_start"() <{level = 10 : i32, message = "bqk,bkd->bqd"}> : () -> ()
    %cst_51 = arith.constant dense<0.000000e+00> : vector<2x24x8xf32>
    %139 = tpu.matmul %137, %138, %cst_51 {dimension_numbers = #tpu.dot_dimension_numbers<[2], [1], [1], [2], [0, 0, 0, 1, 1, 2], [0], [0]>} : vector<2x24x24xbf16>, vector<2x24x8xbf16>, vector<2x24x8xf32> -> vector<2x24x8xf32>
    "tpu.trace_stop"() : () -> ()
    %140 = vector.extract_strided_slice %64 {offsets = [0, 0, 24], sizes = [2, 24, 8], strides = [1, 1, 1]} : vector<2x24x96xf32> to vector<2x24x8xf32>
    %141 = vector.extract_strided_slice %64 {offsets = [0, 0, 56], sizes = [2, 24, 8], strides = [1, 1, 1]} : vector<2x24x96xf32> to vector<2x24x8xf32>
    %142 = vector.extract_strided_slice %64 {offsets = [0, 0, 88], sizes = [2, 24, 8], strides = [1, 1, 1]} : vector<2x24x96xf32> to vector<2x24x8xf32>
    %143 = arith.truncf %140 : vector<2x24x8xf32> to vector<2x24x8xbf16>
    %144 = arith.truncf %141 : vector<2x24x8xf32> to vector<2x24x8xbf16>
    "tpu.trace_start"() <{level = 10 : i32, message = "bqd,bkd->bqk"}> : () -> ()
    %cst_52 = arith.constant dense<0.000000e+00> : vector<2x24x24xf32>
    %145 = tpu.matmul %143, %144, %cst_52 {dimension_numbers = #tpu.dot_dimension_numbers<[2], [2], [1], [1], [0, 0, 0, 1, 1, 1], [0], [0]>} : vector<2x24x8xbf16>, vector<2x24x8xbf16>, vector<2x24x24xf32> -> vector<2x24x24xf32>
    "tpu.trace_stop"() : () -> ()
    %cst_53 = arith.constant 0.353553385 : f32
    %146 = vector.broadcast %cst_53 : f32 to vector<2x24x24xf32>
    %147 = arith.mulf %145, %146 : vector<2x24x24xf32>
    %cst_54 = arith.constant -1.000000e+30 : f32
    %148 = vector.shape_cast %25 : vector<1x1x24xi1> to vector<1x1x24xi1>
    %149 = vector.broadcast %148 : vector<1x1x24xi1> to vector<2x24x24xi1>
    %150 = vector.broadcast %cst_54 : f32 to vector<2x24x24xf32>
    %151 = arith.select %149, %147, %150 : vector<2x24x24xi1>, vector<2x24x24xf32>
    %cst_55 = arith.constant dense<0xFF800000> : vector<2x24xf32>
    %152 = vector.multi_reduction <maximumf>, %151, %cst_55 [2] : vector<2x24x24xf32> to vector<2x24xf32>
    %153 = vector.shape_cast %152 : vector<2x24xf32> to vector<2x24x1xf32>
    %154 = vector.broadcast %153 : vector<2x24x1xf32> to vector<2x24x24xf32>
    %155 = arith.subf %151, %154 : vector<2x24x24xf32>
    %156 = math.exp %155 : vector<2x24x24xf32>
    %cst_56 = arith.constant dense<0.000000e+00> : vector<2x24xf32>
    %157 = vector.multi_reduction <add>, %156, %cst_56 [2] : vector<2x24x24xf32> to vector<2x24xf32>
    %158 = vector.shape_cast %157 : vector<2x24xf32> to vector<2x24x1xf32>
    %159 = tpu.reciprocal %158 {approx = true} : vector<2x24x1xf32> -> vector<2x24x1xf32>
    %160 = vector.broadcast %159 : vector<2x24x1xf32> to vector<2x24x24xf32>
    %161 = arith.mulf %156, %160 : vector<2x24x24xf32>
    %162 = arith.truncf %161 : vector<2x24x24xf32> to vector<2x24x24xbf16>
    %163 = arith.truncf %142 : vector<2x24x8xf32> to vector<2x24x8xbf16>
    "tpu.trace_start"() <{level = 10 : i32, message = "bqk,bkd->bqd"}> : () -> ()
    %cst_57 = arith.constant dense<0.000000e+00> : vector<2x24x8xf32>
    %164 = tpu.matmul %162, %163, %cst_57 {dimension_numbers = #tpu.dot_dimension_numbers<[2], [1], [1], [2], [0, 0, 0, 1, 1, 2], [0], [0]>} : vector<2x24x24xbf16>, vector<2x24x8xbf16>, vector<2x24x8xf32> -> vector<2x24x8xf32>
    "tpu.trace_stop"() : () -> ()
    %165 = tpu.concatenate %89, %114, %139, %164 in 2 : vector<2x24x8xf32>, vector<2x24x8xf32>, vector<2x24x8xf32>, vector<2x24x8xf32> -> vector<2x24x32xf32>
    %166 = vector.shape_cast %165 : vector<2x24x32xf32> to vector<48x32xf32>
    %167 = arith.truncf %166 : vector<48x32xf32> to vector<48x32xbf16>
    %cst_58 = arith.constant dense<0.000000e+00> : vector<48x32xf32>
    %168 = tpu.matmul %167, %57, %cst_58 {dimension_numbers = #tpu.dot_dimension_numbers<[1], [0], [0], [1], [0, 0, 1, 1], [], []>} : vector<48x32xbf16>, vector<32x32xbf16>, vector<48x32xf32> -> vector<48x32xf32>
    %169 = vector.broadcast %59 : vector<1x32xf32> to vector<48x32xf32>
    %170 = arith.addf %168, %169 : vector<48x32xf32>
    %171 = arith.addf %22, %170 : vector<48x32xf32>
    %c0_59 = arith.constant 0 : index
    %c0_60 = arith.constant 0 : index
    %c0_61 = arith.constant 0 : index
    %172 = vector.load %arg12[%c0_59, %c0_60, %c0_61] : memref<2x1x32xf32, #tpu.memory_space<vmem>>, vector<1x1x32xf32>
    %173 = vector.shape_cast %172 : vector<1x1x32xf32> to vector<1x32xf32>
    %c0_62 = arith.constant 0 : index
    %c0_63 = arith.constant 0 : index
    %c0_64 = arith.constant 0 : index
    %174 = vector.load %arg13[%c0_62, %c0_63, %c0_64] : memref<2x1x32xf32, #tpu.memory_space<vmem>>, vector<1x1x32xf32>
    %175 = vector.shape_cast %174 : vector<1x1x32xf32> to vector<1x32xf32>
    %cst_65 = arith.constant dense<0.000000e+00> : vector<48xf32>
    %176 = vector.multi_reduction <add>, %171, %cst_65 [1] : vector<48x32xf32> to vector<48xf32>
    %177 = vector.shape_cast %176 : vector<48xf32> to vector<48x1xf32>
    %cst_66 = arith.constant 3.200000e+01 : f32
    %178 = vector.broadcast %cst_66 : f32 to vector<48x1xf32>
    %179 = arith.divf %177, %178 : vector<48x1xf32>
    %180 = vector.broadcast %179 : vector<48x1xf32> to vector<48x32xf32>
    %181 = arith.subf %171, %180 : vector<48x32xf32>
    %182 = arith.mulf %181, %181 : vector<48x32xf32>
    %cst_67 = arith.constant dense<0.000000e+00> : vector<48xf32>
    %183 = vector.multi_reduction <add>, %182, %cst_67 [1] : vector<48x32xf32> to vector<48xf32>
    %184 = vector.shape_cast %183 : vector<48xf32> to vector<48x1xf32>
    %cst_68 = arith.constant 3.200000e+01 : f32
    %185 = vector.broadcast %cst_68 : f32 to vector<48x1xf32>
    %186 = arith.divf %184, %185 : vector<48x1xf32>
    %187 = vector.broadcast %179 : vector<48x1xf32> to vector<48x32xf32>
    %188 = arith.subf %171, %187 : vector<48x32xf32>
    %cst_69 = arith.constant 9.99999974E-6 : f32
    %189 = vector.broadcast %cst_69 : f32 to vector<48x1xf32>
    %190 = arith.addf %186, %189 : vector<48x1xf32>
    %191 = math.rsqrt %190 : vector<48x1xf32>
    %192 = vector.broadcast %191 : vector<48x1xf32> to vector<48x32xf32>
    %193 = arith.mulf %188, %192 : vector<48x32xf32>
    %194 = vector.broadcast %173 : vector<1x32xf32> to vector<48x32xf32>
    %195 = arith.mulf %193, %194 : vector<48x32xf32>
    %196 = vector.broadcast %175 : vector<1x32xf32> to vector<48x32xf32>
    %197 = arith.addf %195, %196 : vector<48x32xf32>
    %198 = arith.truncf %197 : vector<48x32xf32> to vector<48x32xbf16>
    %c0_70 = arith.constant 0 : index
    %c0_71 = arith.constant 0 : index
    %c0_72 = arith.constant 0 : index
    %199 = vector.load %arg14[%c0_70, %c0_71, %c0_72] : memref<2x32x64xbf16, #tpu.memory_space<vmem>>, vector<1x32x64xbf16>
    %200 = vector.shape_cast %199 : vector<1x32x64xbf16> to vector<32x64xbf16>
    %cst_73 = arith.constant dense<0.000000e+00> : vector<48x64xf32>
    %201 = tpu.matmul %198, %200, %cst_73 {dimension_numbers = #tpu.dot_dimension_numbers<[1], [0], [0], [1], [0, 0, 1, 1], [], []>} : vector<48x32xbf16>, vector<32x64xbf16>, vector<48x64xf32> -> vector<48x64xf32>
    %c0_74 = arith.constant 0 : index
    %c0_75 = arith.constant 0 : index
    %c0_76 = arith.constant 0 : index
    %202 = vector.load %arg15[%c0_74, %c0_75, %c0_76] : memref<2x1x64xf32, #tpu.memory_space<vmem>>, vector<1x1x64xf32>
    %203 = vector.shape_cast %202 : vector<1x1x64xf32> to vector<1x64xf32>
    %204 = vector.broadcast %203 : vector<1x64xf32> to vector<48x64xf32>
    %205 = arith.addf %201, %204 : vector<48x64xf32>
    %cst_77 = arith.constant 5.000000e-01 : f32
    %206 = vector.broadcast %cst_77 : f32 to vector<48x64xf32>
    %207 = arith.mulf %206, %205 : vector<48x64xf32>
    %cst_78 = arith.constant 0.707106769 : f32
    %208 = vector.broadcast %cst_78 : f32 to vector<48x64xf32>
    %209 = arith.mulf %205, %208 : vector<48x64xf32>
    %210 = math.erf %209 : vector<48x64xf32>
    %cst_79 = arith.constant 1.000000e+00 : f32
    %211 = vector.broadcast %cst_79 : f32 to vector<48x64xf32>
    %212 = arith.addf %211, %210 : vector<48x64xf32>
    %213 = arith.mulf %207, %212 : vector<48x64xf32>
    %214 = arith.truncf %213 : vector<48x64xf32> to vector<48x64xbf16>
    %c0_80 = arith.constant 0 : index
    %c0_81 = arith.constant 0 : index
    %c0_82 = arith.constant 0 : index
    %215 = vector.load %arg16[%c0_80, %c0_81, %c0_82] : memref<2x64x32xbf16, #tpu.memory_space<vmem>>, vector<1x64x32xbf16>
    %216 = vector.shape_cast %215 : vector<1x64x32xbf16> to vector<64x32xbf16>
    %cst_83 = arith.constant dense<0.000000e+00> : vector<48x32xf32>
    %217 = tpu.matmul %214, %216, %cst_83 {dimension_numbers = #tpu.dot_dimension_numbers<[1], [0], [0], [1], [0, 0, 1, 1], [], []>} : vector<48x64xbf16>, vector<64x32xbf16>, vector<48x32xf32> -> vector<48x32xf32>
    %c0_84 = arith.constant 0 : index
    %c0_85 = arith.constant 0 : index
    %c0_86 = arith.constant 0 : index
    %218 = vector.load %arg17[%c0_84, %c0_85, %c0_86] : memref<2x1x32xf32, #tpu.memory_space<vmem>>, vector<1x1x32xf32>
    %219 = vector.shape_cast %218 : vector<1x1x32xf32> to vector<1x32xf32>
    %220 = vector.broadcast %219 : vector<1x32xf32> to vector<48x32xf32>
    %221 = arith.addf %217, %220 : vector<48x32xf32>
    %222 = arith.addf %171, %221 : vector<48x32xf32>
    %c1 = arith.constant 1 : index
    %c0_87 = arith.constant 0 : index
    %c0_88 = arith.constant 0 : index
    %223 = vector.load %arg6[%c1, %c0_87, %c0_88] : memref<2x1x32xf32, #tpu.memory_space<vmem>>, vector<1x1x32xf32>
    %224 = vector.shape_cast %223 : vector<1x1x32xf32> to vector<1x32xf32>
    %c1_89 = arith.constant 1 : index
    %c0_90 = arith.constant 0 : index
    %c0_91 = arith.constant 0 : index
    %225 = vector.load %arg7[%c1_89, %c0_90, %c0_91] : memref<2x1x32xf32, #tpu.memory_space<vmem>>, vector<1x1x32xf32>
    %226 = vector.shape_cast %225 : vector<1x1x32xf32> to vector<1x32xf32>
    %cst_92 = arith.constant dense<0.000000e+00> : vector<48xf32>
    %227 = vector.multi_reduction <add>, %222, %cst_92 [1] : vector<48x32xf32> to vector<48xf32>
    %228 = vector.shape_cast %227 : vector<48xf32> to vector<48x1xf32>
    %cst_93 = arith.constant 3.200000e+01 : f32
    %229 = vector.broadcast %cst_93 : f32 to vector<48x1xf32>
    %230 = arith.divf %228, %229 : vector<48x1xf32>
    %231 = vector.broadcast %230 : vector<48x1xf32> to vector<48x32xf32>
    %232 = arith.subf %222, %231 : vector<48x32xf32>
    %233 = arith.mulf %232, %232 : vector<48x32xf32>
    %cst_94 = arith.constant dense<0.000000e+00> : vector<48xf32>
    %234 = vector.multi_reduction <add>, %233, %cst_94 [1] : vector<48x32xf32> to vector<48xf32>
    %235 = vector.shape_cast %234 : vector<48xf32> to vector<48x1xf32>
    %cst_95 = arith.constant 3.200000e+01 : f32
    %236 = vector.broadcast %cst_95 : f32 to vector<48x1xf32>
    %237 = arith.divf %235, %236 : vector<48x1xf32>
    %238 = vector.broadcast %230 : vector<48x1xf32> to vector<48x32xf32>
    %239 = arith.subf %222, %238 : vector<48x32xf32>
    %cst_96 = arith.constant 9.99999974E-6 : f32
    %240 = vector.broadcast %cst_96 : f32 to vector<48x1xf32>
    %241 = arith.addf %237, %240 : vector<48x1xf32>
    %242 = math.rsqrt %241 : vector<48x1xf32>
    %243 = vector.broadcast %242 : vector<48x1xf32> to vector<48x32xf32>
    %244 = arith.mulf %239, %243 : vector<48x32xf32>
    %245 = vector.broadcast %224 : vector<1x32xf32> to vector<48x32xf32>
    %246 = arith.mulf %244, %245 : vector<48x32xf32>
    %247 = vector.broadcast %226 : vector<1x32xf32> to vector<48x32xf32>
    %248 = arith.addf %246, %247 : vector<48x32xf32>
    %c1_97 = arith.constant 1 : index
    %c0_98 = arith.constant 0 : index
    %c0_99 = arith.constant 0 : index
    %249 = vector.load %arg8[%c1_97, %c0_98, %c0_99] : memref<2x32x96xbf16, #tpu.memory_space<vmem>>, vector<1x32x96xbf16>
    %250 = vector.shape_cast %249 : vector<1x32x96xbf16> to vector<32x96xbf16>
    %c1_100 = arith.constant 1 : index
    %c0_101 = arith.constant 0 : index
    %c0_102 = arith.constant 0 : index
    %251 = vector.load %arg9[%c1_100, %c0_101, %c0_102] : memref<2x1x96xf32, #tpu.memory_space<vmem>>, vector<1x1x96xf32>
    %252 = vector.shape_cast %251 : vector<1x1x96xf32> to vector<1x96xf32>
    %c1_103 = arith.constant 1 : index
    %c0_104 = arith.constant 0 : index
    %c0_105 = arith.constant 0 : index
    %253 = vector.load %arg10[%c1_103, %c0_104, %c0_105] : memref<2x32x32xbf16, #tpu.memory_space<vmem>>, vector<1x32x32xbf16>
    %254 = vector.shape_cast %253 : vector<1x32x32xbf16> to vector<32x32xbf16>
    %c1_106 = arith.constant 1 : index
    %c0_107 = arith.constant 0 : index
    %c0_108 = arith.constant 0 : index
    %255 = vector.load %arg11[%c1_106, %c0_107, %c0_108] : memref<2x1x32xf32, #tpu.memory_space<vmem>>, vector<1x1x32xf32>
    %256 = vector.shape_cast %255 : vector<1x1x32xf32> to vector<1x32xf32>
    %257 = arith.truncf %248 : vector<48x32xf32> to vector<48x32xbf16>
    %cst_109 = arith.constant dense<0.000000e+00> : vector<48x96xf32>
    %258 = tpu.matmul %257, %250, %cst_109 {dimension_numbers = #tpu.dot_dimension_numbers<[1], [0], [0], [1], [0, 0, 1, 1], [], []>} : vector<48x32xbf16>, vector<32x96xbf16>, vector<48x96xf32> -> vector<48x96xf32>
    %259 = vector.broadcast %252 : vector<1x96xf32> to vector<48x96xf32>
    %260 = arith.addf %258, %259 : vector<48x96xf32>
    %261 = vector.shape_cast %260 : vector<48x96xf32> to vector<2x24x96xf32>
    %262 = vector.extract_strided_slice %261 {offsets = [0, 0, 0], sizes = [2, 24, 8], strides = [1, 1, 1]} : vector<2x24x96xf32> to vector<2x24x8xf32>
    %263 = vector.extract_strided_slice %261 {offsets = [0, 0, 32], sizes = [2, 24, 8], strides = [1, 1, 1]} : vector<2x24x96xf32> to vector<2x24x8xf32>
    %264 = vector.extract_strided_slice %261 {offsets = [0, 0, 64], sizes = [2, 24, 8], strides = [1, 1, 1]} : vector<2x24x96xf32> to vector<2x24x8xf32>
    %265 = arith.truncf %262 : vector<2x24x8xf32> to vector<2x24x8xbf16>
    %266 = arith.truncf %263 : vector<2x24x8xf32> to vector<2x24x8xbf16>
    "tpu.trace_start"() <{level = 10 : i32, message = "bqd,bkd->bqk"}> : () -> ()
    %cst_110 = arith.constant dense<0.000000e+00> : vector<2x24x24xf32>
    %267 = tpu.matmul %265, %266, %cst_110 {dimension_numbers = #tpu.dot_dimension_numbers<[2], [2], [1], [1], [0, 0, 0, 1, 1, 1], [0], [0]>} : vector<2x24x8xbf16>, vector<2x24x8xbf16>, vector<2x24x24xf32> -> vector<2x24x24xf32>
    "tpu.trace_stop"() : () -> ()
    %cst_111 = arith.constant 0.353553385 : f32
    %268 = vector.broadcast %cst_111 : f32 to vector<2x24x24xf32>
    %269 = arith.mulf %267, %268 : vector<2x24x24xf32>
    %cst_112 = arith.constant -1.000000e+30 : f32
    %270 = vector.shape_cast %25 : vector<1x1x24xi1> to vector<1x1x24xi1>
    %271 = vector.broadcast %270 : vector<1x1x24xi1> to vector<2x24x24xi1>
    %272 = vector.broadcast %cst_112 : f32 to vector<2x24x24xf32>
    %273 = arith.select %271, %269, %272 : vector<2x24x24xi1>, vector<2x24x24xf32>
    %cst_113 = arith.constant dense<0xFF800000> : vector<2x24xf32>
    %274 = vector.multi_reduction <maximumf>, %273, %cst_113 [2] : vector<2x24x24xf32> to vector<2x24xf32>
    %275 = vector.shape_cast %274 : vector<2x24xf32> to vector<2x24x1xf32>
    %276 = vector.broadcast %275 : vector<2x24x1xf32> to vector<2x24x24xf32>
    %277 = arith.subf %273, %276 : vector<2x24x24xf32>
    %278 = math.exp %277 : vector<2x24x24xf32>
    %cst_114 = arith.constant dense<0.000000e+00> : vector<2x24xf32>
    %279 = vector.multi_reduction <add>, %278, %cst_114 [2] : vector<2x24x24xf32> to vector<2x24xf32>
    %280 = vector.shape_cast %279 : vector<2x24xf32> to vector<2x24x1xf32>
    %281 = tpu.reciprocal %280 {approx = true} : vector<2x24x1xf32> -> vector<2x24x1xf32>
    %282 = vector.broadcast %281 : vector<2x24x1xf32> to vector<2x24x24xf32>
    %283 = arith.mulf %278, %282 : vector<2x24x24xf32>
    %284 = arith.truncf %283 : vector<2x24x24xf32> to vector<2x24x24xbf16>
    %285 = arith.truncf %264 : vector<2x24x8xf32> to vector<2x24x8xbf16>
    "tpu.trace_start"() <{level = 10 : i32, message = "bqk,bkd->bqd"}> : () -> ()
    %cst_115 = arith.constant dense<0.000000e+00> : vector<2x24x8xf32>
    %286 = tpu.matmul %284, %285, %cst_115 {dimension_numbers = #tpu.dot_dimension_numbers<[2], [1], [1], [2], [0, 0, 0, 1, 1, 2], [0], [0]>} : vector<2x24x24xbf16>, vector<2x24x8xbf16>, vector<2x24x8xf32> -> vector<2x24x8xf32>
    "tpu.trace_stop"() : () -> ()
    %287 = vector.extract_strided_slice %261 {offsets = [0, 0, 8], sizes = [2, 24, 8], strides = [1, 1, 1]} : vector<2x24x96xf32> to vector<2x24x8xf32>
    %288 = vector.extract_strided_slice %261 {offsets = [0, 0, 40], sizes = [2, 24, 8], strides = [1, 1, 1]} : vector<2x24x96xf32> to vector<2x24x8xf32>
    %289 = vector.extract_strided_slice %261 {offsets = [0, 0, 72], sizes = [2, 24, 8], strides = [1, 1, 1]} : vector<2x24x96xf32> to vector<2x24x8xf32>
    %290 = arith.truncf %287 : vector<2x24x8xf32> to vector<2x24x8xbf16>
    %291 = arith.truncf %288 : vector<2x24x8xf32> to vector<2x24x8xbf16>
    "tpu.trace_start"() <{level = 10 : i32, message = "bqd,bkd->bqk"}> : () -> ()
    %cst_116 = arith.constant dense<0.000000e+00> : vector<2x24x24xf32>
    %292 = tpu.matmul %290, %291, %cst_116 {dimension_numbers = #tpu.dot_dimension_numbers<[2], [2], [1], [1], [0, 0, 0, 1, 1, 1], [0], [0]>} : vector<2x24x8xbf16>, vector<2x24x8xbf16>, vector<2x24x24xf32> -> vector<2x24x24xf32>
    "tpu.trace_stop"() : () -> ()
    %cst_117 = arith.constant 0.353553385 : f32
    %293 = vector.broadcast %cst_117 : f32 to vector<2x24x24xf32>
    %294 = arith.mulf %292, %293 : vector<2x24x24xf32>
    %cst_118 = arith.constant -1.000000e+30 : f32
    %295 = vector.shape_cast %25 : vector<1x1x24xi1> to vector<1x1x24xi1>
    %296 = vector.broadcast %295 : vector<1x1x24xi1> to vector<2x24x24xi1>
    %297 = vector.broadcast %cst_118 : f32 to vector<2x24x24xf32>
    %298 = arith.select %296, %294, %297 : vector<2x24x24xi1>, vector<2x24x24xf32>
    %cst_119 = arith.constant dense<0xFF800000> : vector<2x24xf32>
    %299 = vector.multi_reduction <maximumf>, %298, %cst_119 [2] : vector<2x24x24xf32> to vector<2x24xf32>
    %300 = vector.shape_cast %299 : vector<2x24xf32> to vector<2x24x1xf32>
    %301 = vector.broadcast %300 : vector<2x24x1xf32> to vector<2x24x24xf32>
    %302 = arith.subf %298, %301 : vector<2x24x24xf32>
    %303 = math.exp %302 : vector<2x24x24xf32>
    %cst_120 = arith.constant dense<0.000000e+00> : vector<2x24xf32>
    %304 = vector.multi_reduction <add>, %303, %cst_120 [2] : vector<2x24x24xf32> to vector<2x24xf32>
    %305 = vector.shape_cast %304 : vector<2x24xf32> to vector<2x24x1xf32>
    %306 = tpu.reciprocal %305 {approx = true} : vector<2x24x1xf32> -> vector<2x24x1xf32>
    %307 = vector.broadcast %306 : vector<2x24x1xf32> to vector<2x24x24xf32>
    %308 = arith.mulf %303, %307 : vector<2x24x24xf32>
    %309 = arith.truncf %308 : vector<2x24x24xf32> to vector<2x24x24xbf16>
    %310 = arith.truncf %289 : vector<2x24x8xf32> to vector<2x24x8xbf16>
    "tpu.trace_start"() <{level = 10 : i32, message = "bqk,bkd->bqd"}> : () -> ()
    %cst_121 = arith.constant dense<0.000000e+00> : vector<2x24x8xf32>
    %311 = tpu.matmul %309, %310, %cst_121 {dimension_numbers = #tpu.dot_dimension_numbers<[2], [1], [1], [2], [0, 0, 0, 1, 1, 2], [0], [0]>} : vector<2x24x24xbf16>, vector<2x24x8xbf16>, vector<2x24x8xf32> -> vector<2x24x8xf32>
    "tpu.trace_stop"() : () -> ()
    %312 = vector.extract_strided_slice %261 {offsets = [0, 0, 16], sizes = [2, 24, 8], strides = [1, 1, 1]} : vector<2x24x96xf32> to vector<2x24x8xf32>
    %313 = vector.extract_strided_slice %261 {offsets = [0, 0, 48], sizes = [2, 24, 8], strides = [1, 1, 1]} : vector<2x24x96xf32> to vector<2x24x8xf32>
    %314 = vector.extract_strided_slice %261 {offsets = [0, 0, 80], sizes = [2, 24, 8], strides = [1, 1, 1]} : vector<2x24x96xf32> to vector<2x24x8xf32>
    %315 = arith.truncf %312 : vector<2x24x8xf32> to vector<2x24x8xbf16>
    %316 = arith.truncf %313 : vector<2x24x8xf32> to vector<2x24x8xbf16>
    "tpu.trace_start"() <{level = 10 : i32, message = "bqd,bkd->bqk"}> : () -> ()
    %cst_122 = arith.constant dense<0.000000e+00> : vector<2x24x24xf32>
    %317 = tpu.matmul %315, %316, %cst_122 {dimension_numbers = #tpu.dot_dimension_numbers<[2], [2], [1], [1], [0, 0, 0, 1, 1, 1], [0], [0]>} : vector<2x24x8xbf16>, vector<2x24x8xbf16>, vector<2x24x24xf32> -> vector<2x24x24xf32>
    "tpu.trace_stop"() : () -> ()
    %cst_123 = arith.constant 0.353553385 : f32
    %318 = vector.broadcast %cst_123 : f32 to vector<2x24x24xf32>
    %319 = arith.mulf %317, %318 : vector<2x24x24xf32>
    %cst_124 = arith.constant -1.000000e+30 : f32
    %320 = vector.shape_cast %25 : vector<1x1x24xi1> to vector<1x1x24xi1>
    %321 = vector.broadcast %320 : vector<1x1x24xi1> to vector<2x24x24xi1>
    %322 = vector.broadcast %cst_124 : f32 to vector<2x24x24xf32>
    %323 = arith.select %321, %319, %322 : vector<2x24x24xi1>, vector<2x24x24xf32>
    %cst_125 = arith.constant dense<0xFF800000> : vector<2x24xf32>
    %324 = vector.multi_reduction <maximumf>, %323, %cst_125 [2] : vector<2x24x24xf32> to vector<2x24xf32>
    %325 = vector.shape_cast %324 : vector<2x24xf32> to vector<2x24x1xf32>
    %326 = vector.broadcast %325 : vector<2x24x1xf32> to vector<2x24x24xf32>
    %327 = arith.subf %323, %326 : vector<2x24x24xf32>
    %328 = math.exp %327 : vector<2x24x24xf32>
    %cst_126 = arith.constant dense<0.000000e+00> : vector<2x24xf32>
    %329 = vector.multi_reduction <add>, %328, %cst_126 [2] : vector<2x24x24xf32> to vector<2x24xf32>
    %330 = vector.shape_cast %329 : vector<2x24xf32> to vector<2x24x1xf32>
    %331 = tpu.reciprocal %330 {approx = true} : vector<2x24x1xf32> -> vector<2x24x1xf32>
    %332 = vector.broadcast %331 : vector<2x24x1xf32> to vector<2x24x24xf32>
    %333 = arith.mulf %328, %332 : vector<2x24x24xf32>
    %334 = arith.truncf %333 : vector<2x24x24xf32> to vector<2x24x24xbf16>
    %335 = arith.truncf %314 : vector<2x24x8xf32> to vector<2x24x8xbf16>
    "tpu.trace_start"() <{level = 10 : i32, message = "bqk,bkd->bqd"}> : () -> ()
    %cst_127 = arith.constant dense<0.000000e+00> : vector<2x24x8xf32>
    %336 = tpu.matmul %334, %335, %cst_127 {dimension_numbers = #tpu.dot_dimension_numbers<[2], [1], [1], [2], [0, 0, 0, 1, 1, 2], [0], [0]>} : vector<2x24x24xbf16>, vector<2x24x8xbf16>, vector<2x24x8xf32> -> vector<2x24x8xf32>
    "tpu.trace_stop"() : () -> ()
    %337 = vector.extract_strided_slice %261 {offsets = [0, 0, 24], sizes = [2, 24, 8], strides = [1, 1, 1]} : vector<2x24x96xf32> to vector<2x24x8xf32>
    %338 = vector.extract_strided_slice %261 {offsets = [0, 0, 56], sizes = [2, 24, 8], strides = [1, 1, 1]} : vector<2x24x96xf32> to vector<2x24x8xf32>
    %339 = vector.extract_strided_slice %261 {offsets = [0, 0, 88], sizes = [2, 24, 8], strides = [1, 1, 1]} : vector<2x24x96xf32> to vector<2x24x8xf32>
    %340 = arith.truncf %337 : vector<2x24x8xf32> to vector<2x24x8xbf16>
    %341 = arith.truncf %338 : vector<2x24x8xf32> to vector<2x24x8xbf16>
    "tpu.trace_start"() <{level = 10 : i32, message = "bqd,bkd->bqk"}> : () -> ()
    %cst_128 = arith.constant dense<0.000000e+00> : vector<2x24x24xf32>
    %342 = tpu.matmul %340, %341, %cst_128 {dimension_numbers = #tpu.dot_dimension_numbers<[2], [2], [1], [1], [0, 0, 0, 1, 1, 1], [0], [0]>} : vector<2x24x8xbf16>, vector<2x24x8xbf16>, vector<2x24x24xf32> -> vector<2x24x24xf32>
    "tpu.trace_stop"() : () -> ()
    %cst_129 = arith.constant 0.353553385 : f32
    %343 = vector.broadcast %cst_129 : f32 to vector<2x24x24xf32>
    %344 = arith.mulf %342, %343 : vector<2x24x24xf32>
    %cst_130 = arith.constant -1.000000e+30 : f32
    %345 = vector.shape_cast %25 : vector<1x1x24xi1> to vector<1x1x24xi1>
    %346 = vector.broadcast %345 : vector<1x1x24xi1> to vector<2x24x24xi1>
    %347 = vector.broadcast %cst_130 : f32 to vector<2x24x24xf32>
    %348 = arith.select %346, %344, %347 : vector<2x24x24xi1>, vector<2x24x24xf32>
    %cst_131 = arith.constant dense<0xFF800000> : vector<2x24xf32>
    %349 = vector.multi_reduction <maximumf>, %348, %cst_131 [2] : vector<2x24x24xf32> to vector<2x24xf32>
    %350 = vector.shape_cast %349 : vector<2x24xf32> to vector<2x24x1xf32>
    %351 = vector.broadcast %350 : vector<2x24x1xf32> to vector<2x24x24xf32>
    %352 = arith.subf %348, %351 : vector<2x24x24xf32>
    %353 = math.exp %352 : vector<2x24x24xf32>
    %cst_132 = arith.constant dense<0.000000e+00> : vector<2x24xf32>
    %354 = vector.multi_reduction <add>, %353, %cst_132 [2] : vector<2x24x24xf32> to vector<2x24xf32>
    %355 = vector.shape_cast %354 : vector<2x24xf32> to vector<2x24x1xf32>
    %356 = tpu.reciprocal %355 {approx = true} : vector<2x24x1xf32> -> vector<2x24x1xf32>
    %357 = vector.broadcast %356 : vector<2x24x1xf32> to vector<2x24x24xf32>
    %358 = arith.mulf %353, %357 : vector<2x24x24xf32>
    %359 = arith.truncf %358 : vector<2x24x24xf32> to vector<2x24x24xbf16>
    %360 = arith.truncf %339 : vector<2x24x8xf32> to vector<2x24x8xbf16>
    "tpu.trace_start"() <{level = 10 : i32, message = "bqk,bkd->bqd"}> : () -> ()
    %cst_133 = arith.constant dense<0.000000e+00> : vector<2x24x8xf32>
    %361 = tpu.matmul %359, %360, %cst_133 {dimension_numbers = #tpu.dot_dimension_numbers<[2], [1], [1], [2], [0, 0, 0, 1, 1, 2], [0], [0]>} : vector<2x24x24xbf16>, vector<2x24x8xbf16>, vector<2x24x8xf32> -> vector<2x24x8xf32>
    "tpu.trace_stop"() : () -> ()
    %362 = tpu.concatenate %286, %311, %336, %361 in 2 : vector<2x24x8xf32>, vector<2x24x8xf32>, vector<2x24x8xf32>, vector<2x24x8xf32> -> vector<2x24x32xf32>
    %363 = vector.shape_cast %362 : vector<2x24x32xf32> to vector<48x32xf32>
    %364 = arith.truncf %363 : vector<48x32xf32> to vector<48x32xbf16>
    %cst_134 = arith.constant dense<0.000000e+00> : vector<48x32xf32>
    %365 = tpu.matmul %364, %254, %cst_134 {dimension_numbers = #tpu.dot_dimension_numbers<[1], [0], [0], [1], [0, 0, 1, 1], [], []>} : vector<48x32xbf16>, vector<32x32xbf16>, vector<48x32xf32> -> vector<48x32xf32>
    %366 = vector.broadcast %256 : vector<1x32xf32> to vector<48x32xf32>
    %367 = arith.addf %365, %366 : vector<48x32xf32>
    %368 = arith.addf %222, %367 : vector<48x32xf32>
    %c1_135 = arith.constant 1 : index
    %c0_136 = arith.constant 0 : index
    %c0_137 = arith.constant 0 : index
    %369 = vector.load %arg12[%c1_135, %c0_136, %c0_137] : memref<2x1x32xf32, #tpu.memory_space<vmem>>, vector<1x1x32xf32>
    %370 = vector.shape_cast %369 : vector<1x1x32xf32> to vector<1x32xf32>
    %c1_138 = arith.constant 1 : index
    %c0_139 = arith.constant 0 : index
    %c0_140 = arith.constant 0 : index
    %371 = vector.load %arg13[%c1_138, %c0_139, %c0_140] : memref<2x1x32xf32, #tpu.memory_space<vmem>>, vector<1x1x32xf32>
    %372 = vector.shape_cast %371 : vector<1x1x32xf32> to vector<1x32xf32>
    %cst_141 = arith.constant dense<0.000000e+00> : vector<48xf32>
    %373 = vector.multi_reduction <add>, %368, %cst_141 [1] : vector<48x32xf32> to vector<48xf32>
    %374 = vector.shape_cast %373 : vector<48xf32> to vector<48x1xf32>
    %cst_142 = arith.constant 3.200000e+01 : f32
    %375 = vector.broadcast %cst_142 : f32 to vector<48x1xf32>
    %376 = arith.divf %374, %375 : vector<48x1xf32>
    %377 = vector.broadcast %376 : vector<48x1xf32> to vector<48x32xf32>
    %378 = arith.subf %368, %377 : vector<48x32xf32>
    %379 = arith.mulf %378, %378 : vector<48x32xf32>
    %cst_143 = arith.constant dense<0.000000e+00> : vector<48xf32>
    %380 = vector.multi_reduction <add>, %379, %cst_143 [1] : vector<48x32xf32> to vector<48xf32>
    %381 = vector.shape_cast %380 : vector<48xf32> to vector<48x1xf32>
    %cst_144 = arith.constant 3.200000e+01 : f32
    %382 = vector.broadcast %cst_144 : f32 to vector<48x1xf32>
    %383 = arith.divf %381, %382 : vector<48x1xf32>
    %384 = vector.broadcast %376 : vector<48x1xf32> to vector<48x32xf32>
    %385 = arith.subf %368, %384 : vector<48x32xf32>
    %cst_145 = arith.constant 9.99999974E-6 : f32
    %386 = vector.broadcast %cst_145 : f32 to vector<48x1xf32>
    %387 = arith.addf %383, %386 : vector<48x1xf32>
    %388 = math.rsqrt %387 : vector<48x1xf32>
    %389 = vector.broadcast %388 : vector<48x1xf32> to vector<48x32xf32>
    %390 = arith.mulf %385, %389 : vector<48x32xf32>
    %391 = vector.broadcast %370 : vector<1x32xf32> to vector<48x32xf32>
    %392 = arith.mulf %390, %391 : vector<48x32xf32>
    %393 = vector.broadcast %372 : vector<1x32xf32> to vector<48x32xf32>
    %394 = arith.addf %392, %393 : vector<48x32xf32>
    %395 = arith.truncf %394 : vector<48x32xf32> to vector<48x32xbf16>
    %c1_146 = arith.constant 1 : index
    %c0_147 = arith.constant 0 : index
    %c0_148 = arith.constant 0 : index
    %396 = vector.load %arg14[%c1_146, %c0_147, %c0_148] : memref<2x32x64xbf16, #tpu.memory_space<vmem>>, vector<1x32x64xbf16>
    %397 = vector.shape_cast %396 : vector<1x32x64xbf16> to vector<32x64xbf16>
    %cst_149 = arith.constant dense<0.000000e+00> : vector<48x64xf32>
    %398 = tpu.matmul %395, %397, %cst_149 {dimension_numbers = #tpu.dot_dimension_numbers<[1], [0], [0], [1], [0, 0, 1, 1], [], []>} : vector<48x32xbf16>, vector<32x64xbf16>, vector<48x64xf32> -> vector<48x64xf32>
    %c1_150 = arith.constant 1 : index
    %c0_151 = arith.constant 0 : index
    %c0_152 = arith.constant 0 : index
    %399 = vector.load %arg15[%c1_150, %c0_151, %c0_152] : memref<2x1x64xf32, #tpu.memory_space<vmem>>, vector<1x1x64xf32>
    %400 = vector.shape_cast %399 : vector<1x1x64xf32> to vector<1x64xf32>
    %401 = vector.broadcast %400 : vector<1x64xf32> to vector<48x64xf32>
    %402 = arith.addf %398, %401 : vector<48x64xf32>
    %cst_153 = arith.constant 5.000000e-01 : f32
    %403 = vector.broadcast %cst_153 : f32 to vector<48x64xf32>
    %404 = arith.mulf %403, %402 : vector<48x64xf32>
    %cst_154 = arith.constant 0.707106769 : f32
    %405 = vector.broadcast %cst_154 : f32 to vector<48x64xf32>
    %406 = arith.mulf %402, %405 : vector<48x64xf32>
    %407 = math.erf %406 : vector<48x64xf32>
    %cst_155 = arith.constant 1.000000e+00 : f32
    %408 = vector.broadcast %cst_155 : f32 to vector<48x64xf32>
    %409 = arith.addf %408, %407 : vector<48x64xf32>
    %410 = arith.mulf %404, %409 : vector<48x64xf32>
    %411 = arith.truncf %410 : vector<48x64xf32> to vector<48x64xbf16>
    %c1_156 = arith.constant 1 : index
    %c0_157 = arith.constant 0 : index
    %c0_158 = arith.constant 0 : index
    %412 = vector.load %arg16[%c1_156, %c0_157, %c0_158] : memref<2x64x32xbf16, #tpu.memory_space<vmem>>, vector<1x64x32xbf16>
    %413 = vector.shape_cast %412 : vector<1x64x32xbf16> to vector<64x32xbf16>
    %cst_159 = arith.constant dense<0.000000e+00> : vector<48x32xf32>
    %414 = tpu.matmul %411, %413, %cst_159 {dimension_numbers = #tpu.dot_dimension_numbers<[1], [0], [0], [1], [0, 0, 1, 1], [], []>} : vector<48x64xbf16>, vector<64x32xbf16>, vector<48x32xf32> -> vector<48x32xf32>
    %c1_160 = arith.constant 1 : index
    %c0_161 = arith.constant 0 : index
    %c0_162 = arith.constant 0 : index
    %415 = vector.load %arg17[%c1_160, %c0_161, %c0_162] : memref<2x1x32xf32, #tpu.memory_space<vmem>>, vector<1x1x32xf32>
    %416 = vector.shape_cast %415 : vector<1x1x32xf32> to vector<1x32xf32>
    %417 = vector.broadcast %416 : vector<1x32xf32> to vector<48x32xf32>
    %418 = arith.addf %414, %417 : vector<48x32xf32>
    %419 = arith.addf %368, %418 : vector<48x32xf32>
    %420 = vector.shape_cast %419 : vector<48x32xf32> to vector<2x24x32xf32>
    %c16_i32_163 = arith.constant 16 : i32
    %421 = vector.broadcast %c16_i32_163 : i32 to vector<1x24x1xi32>
    %422 = arith.cmpi eq, %8, %421 : vector<1x24x1xi32>
    %cst_164 = arith.constant 0.000000e+00 : f32
    %423 = vector.shape_cast %422 : vector<1x24x1xi1> to vector<1x24x1xi1>
    %424 = vector.broadcast %423 : vector<1x24x1xi1> to vector<2x24x32xi1>
    %425 = vector.broadcast %cst_164 : f32 to vector<2x24x32xf32>
    %426 = arith.select %424, %420, %425 : vector<2x24x32xi1>, vector<2x24x32xf32>
    %cst_165 = arith.constant dense<0.000000e+00> : vector<2x32xf32>
    %427 = vector.multi_reduction <add>, %426, %cst_165 [1] : vector<2x24x32xf32> to vector<2x32xf32>
    %c0_166 = arith.constant 0 : index
    %c0_167 = arith.constant 0 : index
    %428 = vector.load %arg18[%c0_166, %c0_167] : memref<1x32xf32, #tpu.memory_space<vmem>>, vector<1x32xf32>
    %c0_168 = arith.constant 0 : index
    %c0_169 = arith.constant 0 : index
    %429 = vector.load %arg19[%c0_168, %c0_169] : memref<1x32xf32, #tpu.memory_space<vmem>>, vector<1x32xf32>
    %cst_170 = arith.constant dense<0.000000e+00> : vector<2xf32>
    %430 = vector.multi_reduction <add>, %427, %cst_170 [1] : vector<2x32xf32> to vector<2xf32>
    %431 = vector.shape_cast %430 : vector<2xf32> to vector<2x1xf32>
    %cst_171 = arith.constant 3.200000e+01 : f32
    %432 = vector.broadcast %cst_171 : f32 to vector<2x1xf32>
    %433 = arith.divf %431, %432 : vector<2x1xf32>
    %434 = vector.broadcast %433 : vector<2x1xf32> to vector<2x32xf32>
    %435 = arith.subf %427, %434 : vector<2x32xf32>
    %436 = arith.mulf %435, %435 : vector<2x32xf32>
    %cst_172 = arith.constant dense<0.000000e+00> : vector<2xf32>
    %437 = vector.multi_reduction <add>, %436, %cst_172 [1] : vector<2x32xf32> to vector<2xf32>
    %438 = vector.shape_cast %437 : vector<2xf32> to vector<2x1xf32>
    %cst_173 = arith.constant 3.200000e+01 : f32
    %439 = vector.broadcast %cst_173 : f32 to vector<2x1xf32>
    %440 = arith.divf %438, %439 : vector<2x1xf32>
    %441 = vector.broadcast %433 : vector<2x1xf32> to vector<2x32xf32>
    %442 = arith.subf %427, %441 : vector<2x32xf32>
    %cst_174 = arith.constant 9.99999974E-6 : f32
    %443 = vector.broadcast %cst_174 : f32 to vector<2x1xf32>
    %444 = arith.addf %440, %443 : vector<2x1xf32>
    %445 = math.rsqrt %444 : vector<2x1xf32>
    %446 = vector.broadcast %445 : vector<2x1xf32> to vector<2x32xf32>
    %447 = arith.mulf %442, %446 : vector<2x32xf32>
    %448 = vector.broadcast %428 : vector<1x32xf32> to vector<2x32xf32>
    %449 = arith.mulf %447, %448 : vector<2x32xf32>
    %450 = vector.broadcast %429 : vector<1x32xf32> to vector<2x32xf32>
    %451 = arith.addf %449, %450 : vector<2x32xf32>
    %452 = arith.truncf %451 : vector<2x32xf32> to vector<2x32xbf16>
    %c0_175 = arith.constant 0 : index
    %c0_176 = arith.constant 0 : index
    %453 = vector.load %arg20[%c0_175, %c0_176] : memref<32x128xbf16, #tpu.memory_space<vmem>>, vector<32x128xbf16>
    %cst_177 = arith.constant dense<0.000000e+00> : vector<2x128xf32>
    %454 = tpu.matmul %452, %453, %cst_177 {dimension_numbers = #tpu.dot_dimension_numbers<[1], [0], [0], [1], [0, 0, 1, 1], [], []>} : vector<2x32xbf16>, vector<32x128xbf16>, vector<2x128xf32> -> vector<2x128xf32>
    %c0_178 = arith.constant 0 : index
    %c0_179 = arith.constant 0 : index
    %455 = vector.load %arg21[%c0_178, %c0_179] : memref<1x128xf32, #tpu.memory_space<vmem>>, vector<1x128xf32>
    %456 = vector.broadcast %455 : vector<1x128xf32> to vector<2x128xf32>
    %457 = arith.addf %454, %456 : vector<2x128xf32>
    %c0_180 = arith.constant 0 : index
    %c0_181 = arith.constant 0 : index
    %458 = vector.load %arg22[%c0_180, %c0_181] : memref<2x128xf32, #tpu.memory_space<vmem>>, vector<2x128xf32>
    tpu.vector_store %arg22[%c0_180, %c0_181], %457 {strides = array<i32>} : memref<2x128xf32, #tpu.memory_space<vmem>>, vector<2x128xf32>,
    return
  }
  func.func @transform_0(%arg0: i32) -> (i32, i32) {
    %c0_i32 = arith.constant 0 : i32
    %c0_i32_0 = arith.constant 0 : i32
    return %arg0, %c0_i32 : i32, i32
  }
  func.func @transform_1(%arg0: i32) -> (i32, i32) {
    %c0_i32 = arith.constant 0 : i32
    %c0_i32_0 = arith.constant 0 : i32
    %c0_i32_1 = arith.constant 0 : i32
    return %c0_i32, %c0_i32_0 : i32, i32
  }
  func.func @transform_2(%arg0: i32) -> (i32, i32) {
    %c0_i32 = arith.constant 0 : i32
    %c0_i32_0 = arith.constant 0 : i32
    %c0_i32_1 = arith.constant 0 : i32
    return %c0_i32, %c0_i32_0 : i32, i32
  }
  func.func @transform_3(%arg0: i32) -> (i32, i32) {
    %c0_i32 = arith.constant 0 : i32
    %c0_i32_0 = arith.constant 0 : i32
    %c0_i32_1 = arith.constant 0 : i32
    return %c0_i32, %c0_i32_0 : i32, i32
  }
  func.func @transform_4(%arg0: i32) -> (i32, i32) {
    %c0_i32 = arith.constant 0 : i32
    %c0_i32_0 = arith.constant 0 : i32
    %c0_i32_1 = arith.constant 0 : i32
    return %c0_i32, %c0_i32_0 : i32, i32
  }
  func.func @transform_5(%arg0: i32) -> (i32, i32, i32) {
    %c0_i32 = arith.constant 0 : i32
    %c0_i32_0 = arith.constant 0 : i32
    %c0_i32_1 = arith.constant 0 : i32
    %c0_i32_2 = arith.constant 0 : i32
    return %c0_i32, %c0_i32_0, %c0_i32_1 : i32, i32, i32
  }
  func.func @transform_6(%arg0: i32) -> (i32, i32, i32) {
    %c0_i32 = arith.constant 0 : i32
    %c0_i32_0 = arith.constant 0 : i32
    %c0_i32_1 = arith.constant 0 : i32
    %c0_i32_2 = arith.constant 0 : i32
    return %c0_i32, %c0_i32_0, %c0_i32_1 : i32, i32, i32
  }
  func.func @transform_7(%arg0: i32) -> (i32, i32, i32) {
    %c0_i32 = arith.constant 0 : i32
    %c0_i32_0 = arith.constant 0 : i32
    %c0_i32_1 = arith.constant 0 : i32
    %c0_i32_2 = arith.constant 0 : i32
    return %c0_i32, %c0_i32_0, %c0_i32_1 : i32, i32, i32
  }
  func.func @transform_8(%arg0: i32) -> (i32, i32, i32) {
    %c0_i32 = arith.constant 0 : i32
    %c0_i32_0 = arith.constant 0 : i32
    %c0_i32_1 = arith.constant 0 : i32
    %c0_i32_2 = arith.constant 0 : i32
    return %c0_i32, %c0_i32_0, %c0_i32_1 : i32, i32, i32
  }
  func.func @transform_9(%arg0: i32) -> (i32, i32, i32) {
    %c0_i32 = arith.constant 0 : i32
    %c0_i32_0 = arith.constant 0 : i32
    %c0_i32_1 = arith.constant 0 : i32
    %c0_i32_2 = arith.constant 0 : i32
    return %c0_i32, %c0_i32_0, %c0_i32_1 : i32, i32, i32
  }
  func.func @transform_10(%arg0: i32) -> (i32, i32, i32) {
    %c0_i32 = arith.constant 0 : i32
    %c0_i32_0 = arith.constant 0 : i32
    %c0_i32_1 = arith.constant 0 : i32
    %c0_i32_2 = arith.constant 0 : i32
    return %c0_i32, %c0_i32_0, %c0_i32_1 : i32, i32, i32
  }
  func.func @transform_11(%arg0: i32) -> (i32, i32, i32) {
    %c0_i32 = arith.constant 0 : i32
    %c0_i32_0 = arith.constant 0 : i32
    %c0_i32_1 = arith.constant 0 : i32
    %c0_i32_2 = arith.constant 0 : i32
    return %c0_i32, %c0_i32_0, %c0_i32_1 : i32, i32, i32
  }
  func.func @transform_12(%arg0: i32) -> (i32, i32, i32) {
    %c0_i32 = arith.constant 0 : i32
    %c0_i32_0 = arith.constant 0 : i32
    %c0_i32_1 = arith.constant 0 : i32
    %c0_i32_2 = arith.constant 0 : i32
    return %c0_i32, %c0_i32_0, %c0_i32_1 : i32, i32, i32
  }
  func.func @transform_13(%arg0: i32) -> (i32, i32, i32) {
    %c0_i32 = arith.constant 0 : i32
    %c0_i32_0 = arith.constant 0 : i32
    %c0_i32_1 = arith.constant 0 : i32
    %c0_i32_2 = arith.constant 0 : i32
    return %c0_i32, %c0_i32_0, %c0_i32_1 : i32, i32, i32
  }
  func.func @transform_14(%arg0: i32) -> (i32, i32, i32) {
    %c0_i32 = arith.constant 0 : i32
    %c0_i32_0 = arith.constant 0 : i32
    %c0_i32_1 = arith.constant 0 : i32
    %c0_i32_2 = arith.constant 0 : i32
    return %c0_i32, %c0_i32_0, %c0_i32_1 : i32, i32, i32
  }
  func.func @transform_15(%arg0: i32) -> (i32, i32, i32) {
    %c0_i32 = arith.constant 0 : i32
    %c0_i32_0 = arith.constant 0 : i32
    %c0_i32_1 = arith.constant 0 : i32
    %c0_i32_2 = arith.constant 0 : i32
    return %c0_i32, %c0_i32_0, %c0_i32_1 : i32, i32, i32
  }
  func.func @transform_16(%arg0: i32) -> (i32, i32, i32) {
    %c0_i32 = arith.constant 0 : i32
    %c0_i32_0 = arith.constant 0 : i32
    %c0_i32_1 = arith.constant 0 : i32
    %c0_i32_2 = arith.constant 0 : i32
    return %c0_i32, %c0_i32_0, %c0_i32_1 : i32, i32, i32
  }
  func.func @transform_17(%arg0: i32) -> (i32, i32) {
    %c0_i32 = arith.constant 0 : i32
    %c0_i32_0 = arith.constant 0 : i32
    %c0_i32_1 = arith.constant 0 : i32
    return %c0_i32, %c0_i32_0 : i32, i32
  }
  func.func @transform_18(%arg0: i32) -> (i32, i32) {
    %c0_i32 = arith.constant 0 : i32
    %c0_i32_0 = arith.constant 0 : i32
    %c0_i32_1 = arith.constant 0 : i32
    return %c0_i32, %c0_i32_0 : i32, i32
  }
  func.func @transform_19(%arg0: i32) -> (i32, i32) {
    %c0_i32 = arith.constant 0 : i32
    %c0_i32_0 = arith.constant 0 : i32
    %c0_i32_1 = arith.constant 0 : i32
    return %c0_i32, %c0_i32_0 : i32, i32
  }
  func.func @transform_20(%arg0: i32) -> (i32, i32) {
    %c0_i32 = arith.constant 0 : i32
    %c0_i32_0 = arith.constant 0 : i32
    %c0_i32_1 = arith.constant 0 : i32
    return %c0_i32, %c0_i32_0 : i32, i32
  }
  func.func @transform_21(%arg0: i32) -> (i32, i32) {
    %c0_i32 = arith.constant 0 : i32
    %c0_i32_0 = arith.constant 0 : i32
    return %arg0, %c0_i32 : i32, i32
  }
}

</mosaic_0001>

<bundles_post_ra>
// kernel: vit_forward.1
= control target key start
LH: loop header
LB: loop body
LE: loop exit
PB: predicated region body
PF: predicated region fallthrough
CT: control target
= control target key end

     0   :  { %s7256_s0 = inlined_call_operand.vmem [shape: f32[48,64], index: 0, kind: input, shape index: {}]   ;;  %s7257_s1 = inlined_call_operand.vmem [shape: bf16[64,32], index: 1, kind: input, shape index: {}]   ;;  %s7258_s2 = inlined_call_operand.vmem [shape: f32[1,32], index: 2, kind: input, shape index: {}]   ;;  %s7259_s3 = inlined_call_operand.vmem [shape: f32[1,32], index: 3, kind: input, shape index: {}]   ;;  %s7260_s4 = inlined_call_operand.vmem [shape: f32[24,32], index: 4, kind: input, shape index: {}]   ;;  %s7261_s5 = inlined_call_operand.vmem [shape: f32[2,1,32], index: 5, kind: input, shape index: {}]   ;;  %s7262_s6 = inlined_call_operand.vmem [shape: f32[2,1,32], index: 6, kind: input, shape index: {}]   ;;  %s7263_s7 = inlined_call_operand.vmem [shape: bf16[2,32,96], index: 7, kind: input, shape index: {}]   ;;  %s7264_s8 = inlined_call_operand.vmem [shape: f32[2,1,96], index: 8, kind: input, shape index: {}]   ;;  %s7265_s9 = inlined_call_operand.vmem [shape: bf16[2,32,32], index: 9, kind: input, shape index: {}]   ;;  %s7266_s10 = inlined_call_operand.vmem [shape: f32[2,1,32], index: 10, kind: input, shape index: {}]   ;;  %s7267_s11 = inlined_call_operand.vmem [shape: f32[2,1,32], index: 11, kind: input, shape index: {}]   ;;  %s7268_s12 = inlined_call_operand.vmem [shape: f32[2,1,32], index: 12, kind: input, shape index: {}]   ;;  %s7269_s13 = inlined_call_operand.vmem [shape: bf16[2,32,64], index: 13, kind: input, shape index: {}]   ;;  %s7270_s14 = inlined_call_operand.vmem [shape: f32[2,1,64], index: 14, kind: input, shape index: {}]   ;;  %s7271_s15 = inlined_call_operand.vmem [shape: bf16[2,64,32], index: 15, kind: input, shape index: {}]   ;;  %s7272_s16 = inlined_call_operand.vmem [shape: f32[2,1,32], index: 16, kind: input, shape index: {}]   ;;  %s7273_s17 = inlined_call_operand.vmem [shape: f32[1,32], index: 17, kind: input, shape index: {}]   ;;  %s7274_s18 = inlined_call_operand.vmem [shape: f32[1,32], index: 18, kind: input, shape index: {}]   ;;  %s7275_s19 = inlined_call_operand.vmem [shape: bf16[32,128], index: 19, kind: input, shape index: {}]   ;;  %s7276_s20 = inlined_call_operand.vmem [shape: f32[1,128], index: 20, kind: input, shape index: {}]   ;;  %s7277_s21 = inlined_call_operand.hbm [shape: f32[2,128], index: 21, kind: output, shape index: {}]  }
   0x1   :  { %7298 = sst [smem:[#allocation5_spill]] %s7256_s0 }
   0x2   :  { %7299 = sst [smem:[#allocation6_spill]] %s7257_s1 }
   0x3   :  { %7300 = sst [smem:[#allocation7_spill]] %s7258_s2 }
   0x4   :  { %7301 = sst [smem:[#allocation8_spill]] %s7259_s3 }
   0x5   :  { %7302 = sst [smem:[#allocation9_spill]] %s7260_s4 }
   0x6   :  { %7303 = sst [smem:[#allocation10_spill]] %s7261_s5 }
   0x7   :  { %s7304_s26 = sld [smem:[#allocation6_spill]]  ;;  %v5838_v1 = vmov 0.0   ;;  %vm5839_vm0 = vmmov 0   ;;  %vm118_vm1 = vcmask 523264   ;;  %s7305_s22 = sld [smem:[#allocation5_spill]] }
   0x8   :  { %4947 = vmatprep.subr.bf16.mxu0 %v5838_v1  ;;  %4967 = vmatprep.subr.bf16.mxu1 %v5838_v1 }
   0x9   :  { %4955 = vmatprep.mubr.msk.bf16.mxu0 %vm5839_vm0, %v5838_v1  ;;  %4971 = vmatprep.mubr.msk.bf16.mxu1 %vm5839_vm0, %v5838_v1 }
   0xd   :  { %v5522_v0 = vld [vmem:[%s7304_s26] sm:$0xff]   ;;  %v5523_v2 = vld [vmem:[%s7304_s26 + $0x8] sm:$0xff]   ;;  %v5524_v3 = vld [vmem:[%s7304_s26 + $0x10] sm:$0xff]  }
   0xe   :  { %4948 = vmatpush3.bf16.msra.mxu0 %v5522_v0  ;;  %v5525_v4 = vld [vmem:[%s7304_s26 + $0x18] sm:$0xff]   ;;  %v70_v5 = vld [vmem:[%s7305_s22] sm:$0xff]  ;;  %v71_v6 = vld [vmem:[%s7305_s22 + $0x8] sm:$0xff] }
   0xf   :  { %4949 = vmatprep.subr.bf16.mxu0 %v5838_v1  ;;  %v76_v7 = vpack.c.bf16 %v71_v6, %v70_v5  ;;  %v72_v8 = vld [vmem:[%s7305_s22 + $0x10] sm:$0xff]  ;;  %v73_v9 = vld [vmem:[%s7305_s22 + $0x18] sm:$0xff] }
  0x10   :  { %v77_v10 = vpack.c.bf16 %v73_v9, %v72_v8 }
  0x12   :  { %4950 = vmatpush3.bf16.msra.mxu0 %v5523_v2 }
  0x13   :  { %4951 = vmatprep.subr.bf16.mxu0 %v5838_v1 }
  0x16   :  { %4952 = vmatpush3.bf16.msra.mxu0 %v5524_v3 }
  0x17   :  { %4953 = vmatprep.subr.bf16.mxu0 %v5838_v1 }
  0x1a   :  { %4954 = vmatpush3.bf16.msra.mxu0 %v5525_v4 }
  0x1d   :  { %4956 = vmatmul.mubr.msk.bf16.vlgmr.msra.gmra.mrb[0].mxu0 %vm118_vm1, %v76_v7 }
  0x1e   :  { %4959 = vmatprep.mubr.msk.bf16.mxu0 %vm5839_vm0, %v5838_v1 }
  0x1f   :  { %26 = vsyncpa [#allocation3], 0  ;;  %v74_v11 = vld [vmem:[%s7305_s22 + $0x20] sm:$0xff]  ;;  %v75_v12 = vld [vmem:[%s7305_s22 + $0x28] sm:$0xff]  ;;  %v185_v14 = vlaneseq  ;;  %s7306_s30 = sld [smem:[#allocation7_spill]]  ;;  %s7307_s1 = sld [smem:[#allocation9_spill]] }
  0x20   :  { %v78_v13 = vpack.c.bf16 %v75_v12, %v74_v11  ;;  %vm225_vm2 = vcmask 261120   ;;  %s7308_s27 = sld [smem:[#allocation8_spill]]  ;;  %s7309_s23 = sld [smem:[#allocation10_spill]]  ;;  %vm436_vm4 = vcmask 64512   ;;  %vm577_vm6 = vcmask 195584  }
  0x21   :  { %v186_v18 = vshrl.u32 %v185_v14, 7  ;;  %s5840_s25 = smov 96   ;;  %s5842_s26 = smov 88   ;;  %vm659_vm7 = vcmask 1043456   ;;  %vm1877_vm8 = vcmask 130048   ;;  %vm4459_vm9 = vcmask 1041409  }
  0x22   :  { %s5843_s3 = smov 120   ;;  %s5844_s28 = smov 56   ;;  %vm4462_vm10 = vcmask 254976  }
  0x23   :  { %v6023_v26 = vadd.s32 16, %v186_v18  ;;  %s5845_s29 = smov 80   ;;  %s7296_s0 = smov 112  }
  0x24   :  { %s7294_s4 = smov 48   ;;  %s7284_s5 = smov 104  }
  0x25   :  { %4960 = vmatmul.mubr.msk.bf16.gmra.mrb[4].mxu0 %vm118_vm1, %v77_v10  ;;  %v4598_v15 = vld [vmem:[%s7306_s30] ss:$0 sm:$0xff]  ;;  %v212_v22 = vld [vmem:[%s7307_s1 + $0x8] sm:$0xff]  ;;  %vm191_vm3 = vcmp.eq.s32.totalorder %v6023_v26, 16  ;;  %v213_v34 = vld [vmem:[%s7307_s1 + $0x10] sm:$0xff]  ;;  %s7286_s30 = smov 72  }
  0x26   :  { %4963 = vmatprep.mubr.msk.bf16.mxu0 %vm5839_vm0, %v5838_v1  ;;  %v211_v17 = vld [vmem:[%s7307_s1] sm:$0xff]  ;;  %s7282_s1 = smov 40   ;;  %s7290_s24 = smov 8  }
  0x27   :  { %v4606_v30 = vld [vmem:[%s7308_s27] ss:$0 sm:$0xff]  ;;  %s5841_s27 = smov 64   ;;  %s7292_s22 = smov 16  }
  0x2d   :  { %4964 = vmatmul.mubr.msk.bf16.gmra.mrb[8].mxu0 %vm118_vm1, %v78_v13 }
  0xf0   :  { %v162_v16 = vpop.f32.mrb[0].mxu0 }
  0xf1   :  { %v163_v19 = vadd.f32 %v4598_v15, %v162_v16  ;;  %v4957_v20 = vpop.f32.mrb[1].mxu0 }
  0xf2   :  { %v165_v21 = vpop.f32.mrb[2].mxu0 }
  0xf3   :  { %v6021_v23 = vadd.f32 %v211_v17, %v163_v19  ;;  %v166_v24 = vadd.f32 %v4598_v15, %v165_v21  ;;  %v4958_v25 = vpop.f32.mrb[3].mxu0 }
  0xf5   :  { %v6025_v27 = vadd.f32 %v212_v22, %v166_v24  ;;  %v226_v28 = vsel %vm225_vm2, %v6021_v23, 0.0  ;;  %v5527_v24 = vld [vmem:[%s7263_s7 + $0x8] sm:$0xff]  }
  0xf6   :  { %227 = vadd.xlane.f32.xlu0 %v226_v28 }
  0xf7   :  { %v229_v33 = vsel %vm225_vm2, %v6025_v27, 0.0 }
  0xf8   :  { %v170_v29 = vpop.f32.mrb[4].mxu0 }
  0xf9   :  { %v171_v31 = vadd.f32 %v4598_v15, %v170_v29  ;;  %v4961_v32 = vpop.f32.mrb[5].mxu0 }
  0xfa   :  { %230 = vadd.xlane.f32.xlu0 %v229_v33  ;;  %v173_v35 = vpop.f32.mrb[6].mxu0 }
  0xfb   :  { %v207_v36 = vsel %vm191_vm3, %v4606_v30, %v171_v31  ;;  %v174_v37 = vadd.f32 %v4598_v15, %v173_v35  ;;  %v4962_v38 = vpop.f32.mrb[7].mxu0 }
  0xfc   :  { %v6040_v39 = vadd.f32 %v213_v34, %v207_v36 }
  0xfd   :  { %v6042_v40 = vadd.f32 %v211_v17, %v174_v37 }
  0xfe   :  { %v232_v41 = vsel %vm225_vm2, %v6040_v39, 0.0 }
  0xff   :  { %233 = vadd.xlane.f32.xlu1 %v232_v41  ;;  %v235_v46 = vsel %vm225_vm2, %v6042_v40, 0.0 }
 0x100   :  { %v178_v42 = vpop.f32.mrb[8].mxu0 }
 0x101   :  { %v179_v43 = vadd.f32 %v4598_v15, %v178_v42  ;;  %v4965_v44 = vpop.f32.mrb[9].mxu0 }
 0x102   :  { %v181_v45 = vpop.f32.mrb[10].mxu0 }
 0x103   :  { %v6048_v47 = vadd.f32 %v212_v22, %v179_v43  ;;  %v182_v48 = vadd.f32 %v4598_v15, %v181_v45  ;;  %236 = vadd.xlane.f32.xlu1 %v235_v46  ;;  %v4966_v49 = vpop.f32.mrb[11].mxu0  ;;  %v5526_v22 = vld [vmem:[%s7263_s7] sm:$0xff]  }
 0x104   :  { %4968 = vmatpush3.bf16.msra.mxu1 %v5526_v22  ;;  %v4607_v45 = vld [vmem:[%s7309_s23] ss:$0 sm:$0xff] }
 0x105   :  { %v210_v50 = vsel %vm191_vm3, %v4606_v30, %v182_v48  ;;  %v238_v51 = vsel %vm225_vm2, %v6048_v47, 0.0  ;;  %4969 = vmatprep.subr.bf16.mxu1 %v5838_v1 }
 0x106   :  { %239 = vadd.xlane.f32.xlu0 %v238_v51  ;;  %v6054_v52 = vadd.f32 %v213_v34, %v210_v50 }
 0x108   :  { %v241_v53 = vsel %vm225_vm2, %v6054_v52, 0.0  ;;  %4970 = vmatpush3.bf16.msra.mxu1 %v5527_v24 }
 0x109   :  { %242 = vadd.xlane.f32.xlu1 %v241_v53 }
 0x183   :  { %v228_v54 = vpop.xlane.xlu0 %227 }
 0x184   :  { %v245_v55 = vmul.f32 0.03125, %v228_v54  ;;  %v4608_v54 = vld [vmem:[%s7262_s6] ss:$0 sm:$0xff] }
 0x186   :  { %v251_v56 = vsub.f32 %v6021_v23, %v245_v55 }
 0x187   :  { %v231_v57 = vpop.xlane.xlu0 %230 }
 0x188   :  { %v246_v58 = vmul.f32 0.03125, %v231_v57  ;;  %v257_v59 = vmul.f32 %v251_v56, %v251_v56 }
 0x18a   :  { %v252_v60 = vsub.f32 %v6025_v27, %v246_v58  ;;  %v263_v61 = vsel %vm225_vm2, %v257_v59, 0.0 }
 0x18b   :  { %264 = vadd.xlane.f32.xlu0 %v263_v61 }
 0x18c   :  { %v234_v62 = vpop.xlane.xlu1 %233  ;;  %v258_v63 = vmul.f32 %v252_v60, %v252_v60 }
 0x18d   :  { %v247_v0 = vmul.f32 0.03125, %v234_v62 }
 0x18e   :  { %v266_v2 = vsel %vm225_vm2, %v258_v63, 0.0 }
 0x18f   :  { %v6063_v3 = vsub.f32 %v6040_v39, %v247_v0  ;;  %267 = vadd.xlane.f32.xlu1 %v266_v2 }
 0x190   :  { %v237_v4 = vpop.xlane.xlu1 %236 }
 0x191   :  { %v248_v5 = vmul.f32 0.03125, %v237_v4  ;;  %v259_v6 = vmul.f32 %v6063_v3, %v6063_v3 }
 0x193   :  { %v6068_v7 = vsub.f32 %v6042_v40, %v248_v5  ;;  %v240_v8 = vpop.xlane.xlu0 %239  ;;  %v269_v9 = vsel %vm225_vm2, %v259_v6, 0.0 }
 0x194   :  { %v249_v10 = vmul.f32 0.03125, %v240_v8  ;;  %270 = vadd.xlane.f32.xlu0 %v269_v9 }
 0x195   :  { %v260_v11 = vmul.f32 %v6068_v7, %v6068_v7 }
 0x196   :  { %v6074_v12 = vsub.f32 %v6048_v47, %v249_v10  ;;  %v243_v13 = vpop.xlane.xlu1 %242 }
 0x197   :  { %v250_v15 = vmul.f32 0.03125, %v243_v13  ;;  %v272_v16 = vsel %vm225_vm2, %v260_v11, 0.0 }
 0x198   :  { %273 = vadd.xlane.f32.xlu1 %v272_v16  ;;  %v261_v17 = vmul.f32 %v6074_v12, %v6074_v12 }
 0x199   :  { %v256_v18 = vsub.f32 %v6054_v52, %v250_v15 }
 0x19a   :  { %v275_v19 = vsel %vm225_vm2, %v261_v17, 0.0  ;;  %v4609_v17 = vld [vmem:[%s7264_s8] ss:$0 sm:$0xff] }
 0x19b   :  { %276 = vadd.xlane.f32.xlu0 %v275_v19  ;;  %v262_v20 = vmul.f32 %v256_v18, %v256_v18 }
 0x19d   :  { %v278_v21 = vsel %vm225_vm2, %v262_v20, 0.0 }
 0x19e   :  { %279 = vadd.xlane.f32.xlu1 %v278_v21 }
 0x218   :  { %v265_v25 = vpop.xlane.xlu0 %264 }
 0x219   :  { %v281_v28 = vmul.f32 0.03125, %v265_v25 }
 0x21b   :  { %v287_v29 = vadd.f32 1e-05, %v281_v28 }
 0x21c   :  { %v268_v30 = vpop.xlane.xlu1 %267 }
 0x21d   :  { %5548 = vrsqrt.f32 %v287_v29  ;;  %v282_v31 = vmul.f32 0.03125, %v268_v30 }
 0x21f   :  { %v288_v32 = vadd.f32 1e-05, %v282_v31 }
 0x221   :  { %5550 = vrsqrt.f32 %v288_v32  ;;  %v271_v33 = vpop.xlane.xlu0 %270 }
 0x222   :  { %v283_v34 = vmul.f32 0.03125, %v271_v33 }
 0x224   :  { %v289_v35 = vadd.f32 1e-05, %v283_v34 }
 0x225   :  { %v274_v36 = vpop.xlane.xlu1 %273 }
 0x226   :  { %5552 = vrsqrt.f32 %v289_v35  ;;  %v284_v37 = vmul.f32 0.03125, %v274_v36 }
 0x227   :  { %v5549_v38 = vpop.eup %5548 }
 0x228   :  { %v290_v41 = vadd.f32 1e-05, %v284_v37  ;;  %v277_v42 = vpop.xlane.xlu0 %276  ;;  %v299_v43 = vmul.f32 %v5549_v38, %v251_v56 }
 0x229   :  { %v285_v44 = vmul.f32 0.03125, %v277_v42 }
 0x22a   :  { %5554 = vrsqrt.f32 %v290_v41  ;;  %v311_v53 = vmul.f32 %v4607_v45, %v299_v43 }
 0x22b   :  { %v5551_v46 = vpop.eup %5550  ;;  %v291_v48 = vadd.f32 1e-05, %v285_v44  ;;  %v280_v49 = vpop.xlane.xlu1 %279 }
 0x22c   :  { %v286_v50 = vmul.f32 0.03125, %v280_v49  ;;  %v300_v51 = vmul.f32 %v5551_v46, %v252_v60  ;;  %v323_v58 = vadd.f32 %v4608_v54, %v311_v53 }
 0x22d   :  { %5556 = vrsqrt.f32 %v291_v48 }
 0x22e   :  { %v292_v55 = vadd.f32 1e-05, %v286_v50  ;;  %v312_v57 = vmul.f32 %v4607_v45, %v300_v51 }
 0x230   :  { %v5553_v56 = vpop.eup %5552  ;;  %5558 = vrsqrt.f32 %v292_v55  ;;  %v324_v59 = vadd.f32 %v4608_v54, %v312_v57 }
 0x231   :  { %v301_v61 = vmul.f32 %v5553_v56, %v6063_v3 }
 0x232   :  { %v339_v62 = vpack.c.bf16 %v324_v59, %v323_v58 }
 0x233   :  { %v313_v0 = vmul.f32 %v4607_v45, %v301_v61 }
 0x234   :  { %v5555_v63 = vpop.eup %5554  ;;  %4972 = vmatmul.mubr.msk.bf16.vlgmr.msra.gmra.mrb[0].mxu1 %vm225_vm2, %v339_v62 }
 0x235   :  { %4975 = vmatprep.mubr.msk.bf16.mxu1 %vm5839_vm0, %v5838_v1  ;;  %v302_v60 = vmul.f32 %v5555_v63, %v6068_v7  ;;  %v325_v5 = vadd.f32 %v4608_v54, %v313_v0 }
 0x237   :  { %v5557_v2 = vpop.eup %5556  ;;  %v314_v4 = vmul.f32 %v4607_v45, %v302_v60 }
 0x238   :  { %v303_v8 = vmul.f32 %v5557_v2, %v6074_v12 }
 0x239   :  { %v326_v6 = vadd.f32 %v4608_v54, %v314_v4 }
 0x23a   :  { %v5559_v9 = vpop.eup %5558  ;;  %v315_v3 = vmul.f32 %v4607_v45, %v303_v8 }
 0x23b   :  { %v340_v10 = vpack.c.bf16 %v326_v6, %v325_v5  ;;  %v304_v11 = vmul.f32 %v5559_v9, %v256_v18 }
 0x23c   :  { %v327_v16 = vadd.f32 %v4608_v54, %v315_v3 }
 0x23d   :  { %4976 = vmatmul.mubr.msk.bf16.gmra.mrb[4].mxu1 %vm225_vm2, %v340_v10  ;;  %v316_v13 = vmul.f32 %v4607_v45, %v304_v11 }
 0x23e   :  { %4979 = vmatprep.mubr.msk.bf16.mxu1 %vm5839_vm0, %v5838_v1 }
 0x23f   :  { %v328_v15 = vadd.f32 %v4608_v54, %v316_v13  ;;  %v6141_v54 = vand.u32 127, %v185_v14 }
 0x241   :  { %v341_v7 = vpack.c.bf16 %v328_v15, %v327_v16  ;;  %vm222_vm5 = vcmp.le.s32.totalorder %v6141_v54, 16 }
 0x245   :  { %4980 = vmatmul.mubr.msk.bf16.gmra.mrb[8].mxu1 %vm225_vm2, %v341_v7 }
 0x307   :  { %v403_v12 = vpop.f32.mrb[0].mxu1 }
 0x308   :  { %v4973_v19 = vpop.f32.mrb[1].mxu1  ;;  %v404_v18 = vadd.f32 %v4609_v17, %v403_v12 }
 0x309   :  { %v406_v20 = vpop.f32.mrb[2].mxu1 }
 0x30a   :  { %v407_v21 = vadd.f32 %v4609_v17, %v406_v20  ;;  %v4974_v22 = vpop.f32.mrb[3].mxu1 }
 0x30c   :  { %v6108_v24 = vpack.c.bf16 %v407_v21, %v404_v18 }
 0x30e   :  { %432 = vrot.lane.b32.xlu0 %v6108_v24, %s5840_s25  ;;  %4987 = vmatprep.mubr.msk.bf16.mxu1 %vm436_vm4, %v6108_v24 }
 0x310   :  { %v411_v25 = vpop.f32.mrb[4].mxu1 }
 0x311   :  { %v412_v28 = vadd.f32 %v4609_v17, %v411_v25  ;;  %v4977_v29 = vpop.f32.mrb[5].mxu1 }
 0x312   :  { %v414_v30 = vpop.f32.mrb[6].mxu1 }
 0x313   :  { %v6114_v31 = vpack.c.bf16 %v412_v28, %v412_v28  ;;  %v4978_v32 = vpop.f32.mrb[7].mxu1  ;;  %v415_v34 = vadd.f32 %v4609_v17, %v414_v30 }
 0x315   :  { %434 = vrot.lane.b32.xlu1 %v6114_v31, %s5840_s25 }
 0x318   :  { %v419_v33 = vpop.f32.mrb[8].mxu1 }
 0x319   :  { %v420_v35 = vadd.f32 %v4609_v17, %v419_v33  ;;  %v4981_v36 = vpop.f32.mrb[9].mxu1 }
 0x31a   :  { %v422_v37 = vpop.f32.mrb[10].mxu1 }
 0x31b   :  { %v6118_v38 = vpack.c.bf16 %v420_v35, %v415_v34  ;;  %v423_v41 = vadd.f32 %v4609_v17, %v422_v37  ;;  %v4982_v42 = vpop.f32.mrb[11].mxu1 }
 0x31d   :  { %499 = vrot.lane.b32.xlu1 %v6118_v38, %s5840_s25  ;;  %4995 = vmatprep.mubr.msk.bf16.mxu0 %vm436_vm4, %v6118_v38  ;;  %v6124_v43 = vpack.c.bf16 %v423_v41, %v423_v41 }
 0x321   :  { %501 = vrot.lane.b32.xlu1 %v6124_v43, %s5840_s25 }
 0x380   :  { %v433_v44 = vpop.permute.xlu0 %432 }
 0x381   :  { %5367 = vmatprep.subr.msk.bf16.mxu1 %vm436_vm4, %v433_v44  ;;  %v444_v45 = vsel %vm436_vm4, %v433_v44, 0 }
 0x382   :  { %4984 = vmatpush3.bf16.xpose.msra.mxu1 %v444_v45 }
 0x387   :  { %v435_v46 = vpop.permute.xlu1 %434 }
 0x388   :  { %5368 = vmatprep.subr.msk.bf16.mxu1 %vm436_vm4, %v435_v46  ;;  %v447_v48 = vsel %vm436_vm4, %v435_v46, 0 }
 0x38a   :  { %4986 = vmatpush3.bf16.xpose.msra.mxu1 %v447_v48 }
 0x38f   :  { %v500_v49 = vpop.permute.xlu1 %499 }
 0x390   :  { %5369 = vmatprep.subr.msk.bf16.mxu0 %vm436_vm4, %v500_v49  ;;  %v510_v50 = vsel %vm436_vm4, %v500_v49, 0 }
 0x391   :  { %4988 = vmatmul.mubr.msk.bf16.vlgmr.msra.gmra.mrb[12].mxu1 %vm436_vm4, %v6114_v31  ;;  %4992 = vmatpush3.bf16.xpose.msra.mxu0 %v510_v50 }
 0x393   :  { %v502_v51 = vpop.permute.xlu1 %501 }
 0x394   :  { %5370 = vmatprep.subr.msk.bf16.mxu0 %vm436_vm4, %v502_v51  ;;  %v513_v53 = vsel %vm436_vm4, %v502_v51, 0 }
 0x399   :  { %4994 = vmatpush3.bf16.xpose.msra.mxu0 %v513_v53 }
 0x3a0   :  { %4996 = vmatmul.mubr.msk.bf16.vlgmr.msra.gmra.mrb[12].mxu0 %vm436_vm4, %v6124_v43 }
 0x464   :  { %v4989_v55 = vpop.f32.mrb[12].mxu1 }
 0x465   :  { %v483_v57 = vpop.f32.mrb[13].mxu1  ;;  %v565_v56 = vmul.f32 0.35355338, %v4989_v55 }
 0x466   :  { %v563_v58 = vmul.f32 0.35355338, %v483_v57  ;;  %v4990_v59 = vpop.f32.mrb[14].mxu1 }
 0x467   :  { %v486_v61 = vpop.f32.mrb[15].mxu1  ;;  %v573_v0 = vsel %vm222_vm5, %v565_v56, -1e+30 }
 0x468   :  { %v564_v62 = vmul.f32 0.35355338, %v486_v61  ;;  %v571_v63 = vsel %vm222_vm5, %v563_v58, -1e+30  ;;  %v584_v4 = vsel %vm577_vm6, %v573_v0, -inf }
 0x469   :  { %v578_v60 = vsel %vm577_vm6, %v571_v63, -inf }
 0x46a   :  { %579 = vmax.xlane.f32.xlu0 %v578_v60  ;;  %v572_v14 = vsel %vm222_vm5, %v564_v62, -1e+30 }
 0x46b   :  { %v581_v2 = vsel %vm577_vm6, %v572_v14, -inf }
 0x46c   :  { %582 = vmax.xlane.f32.xlu1 %v581_v2 }
 0x46e   :  { %585 = vmax.xlane.f32.xlu0 %v584_v4 }
 0x473   :  { %v4997_v5 = vpop.f32.mrb[12].mxu0 }
 0x474   :  { %v568_v6 = vmul.f32 0.35355338, %v4997_v5  ;;  %v549_v8 = vpop.f32.mrb[13].mxu0 }
 0x475   :  { %v566_v9 = vmul.f32 0.35355338, %v549_v8  ;;  %v4998_v10 = vpop.f32.mrb[14].mxu0 }
 0x476   :  { %v552_v11 = vpop.f32.mrb[15].mxu0  ;;  %v576_v3 = vsel %vm222_vm5, %v568_v6, -1e+30 }
 0x477   :  { %v567_v13 = vmul.f32 0.35355338, %v552_v11  ;;  %v593_v15 = vsel %vm577_vm6, %v576_v3, -inf  ;;  %v574_v16 = vsel %vm222_vm5, %v566_v9, -1e+30 }
 0x478   :  { %594 = vmax.xlane.f32.xlu1 %v593_v15  ;;  %v587_v7 = vsel %vm577_vm6, %v574_v16, -inf }
 0x479   :  { %588 = vmax.xlane.f32.xlu0 %v587_v7  ;;  %v6161_v17 = vsel %vm222_vm5, %v567_v13, -1e+30 }
 0x47a   :  { %v590_v12 = vsel %vm577_vm6, %v6161_v17, -inf }
 0x47d   :  { %591 = vmax.xlane.f32.xlu0 %v590_v12 }
 0x489   :  { %650 = vrot.lane.b32.xlu1 %v6114_v31, %s5841_s27 }
 0x48d   :  { %711 = vrot.lane.b32.xlu1 %v6118_v38, %s5841_s27 }
 0x491   :  { %777 = vrot.lane.b32.xlu1 %v6108_v24, %s5842_s26 }
 0x493   :  { %648 = vrot.lane.b32.xlu0 %v6108_v24, %s5841_s27 }
 0x495   :  { %779 = vrot.lane.b32.xlu1 %v6114_v31, %s5842_s26 }
 0x4f7   :  { %v580_v19 = vpop.xlane.xlu0 %579 }
 0x4f8   :  { %v596_v18 = vsub.f32 %v571_v63, %v580_v19 }
 0x4f9   :  { %v583_v20 = vpop.xlane.xlu1 %582 }
 0x4fa   :  { %v597_v21 = vsub.f32 %v572_v14, %v583_v20  ;;  %v602_v29 = vmul.f32 1.442695, %v596_v18 }
 0x4fb   :  { %v586_v22 = vpop.xlane.xlu0 %585 }
 0x4fc   :  { %v604_v25 = vmul.f32 1.442695, %v597_v21  ;;  %v598_v28 = vsub.f32 %v573_v0, %v586_v22 }
 0x4fe   :  { %5560 = vpow2.f32 %v604_v25  ;;  %v606_v30 = vmul.f32 1.442695, %v598_v28 }
 0x500   :  { %5562 = vpow2.f32 %v606_v30 }
 0x501   :  { %5564 = vpow2.f32 %v602_v29 }
 0x505   :  { %v595_v32 = vpop.xlane.xlu1 %594 }
 0x506   :  { %v601_v33 = vsub.f32 %v576_v3, %v595_v32  ;;  %v589_v34 = vpop.xlane.xlu0 %588 }
 0x507   :  { %v599_v35 = vsub.f32 %v574_v16, %v589_v34 }
 0x508   :  { %v6175_v36 = vpop.eup %5560  ;;  %v612_v37 = vmul.f32 1.442695, %v601_v33 }
 0x509   :  { %v608_v41 = vmul.f32 1.442695, %v599_v35  ;;  %v651_v42 = vpop.permute.xlu1 %650  ;;  %v617_v44 = vsel %vm577_vm6, %v6175_v36, 0.0 }
 0x50a   :  { %v5563_v45 = vpop.eup %5562  ;;  %5566 = vpow2.f32 %v612_v37  ;;  %618 = vadd.xlane.f32.xlu1 %v617_v44  ;;  %v592_v46 = vpop.xlane.xlu0 %591  ;;  %v661_v55 = vsel %vm659_vm7, %v651_v42, 0 }
 0x50b   :  { %v620_v48 = vsel %vm577_vm6, %v5563_v45, 0.0  ;;  %v5565_v49 = vpop.eup %5564  ;;  %5568 = vpow2.f32 %v608_v41  ;;  %v600_v62 = vsub.f32 %v6161_v17, %v592_v46 }
 0x50c   :  { %621 = vadd.xlane.f32.xlu0 %v620_v48  ;;  %v614_v53 = vsel %vm577_vm6, %v5565_v49, 0.0 }
 0x50d   :  { %v712_v50 = vpop.permute.xlu1 %711  ;;  %v610_v63 = vmul.f32 1.442695, %v600_v62 }
 0x50e   :  { %5007 = vmatprep.subr.bf16.mxu0 %v712_v50  ;;  %v649_v51 = vpop.permute.xlu0 %648 }
 0x50f   :  { %4999 = vmatprep.subr.bf16.mxu1 %v649_v51  ;;  %5008 = vmatpush3.bf16.msra.mxu0 %v712_v50  ;;  %5570 = vpow2.f32 %v610_v63 }
 0x510   :  { %615 = vadd.xlane.f32.xlu0 %v614_v53  ;;  %5000 = vmatpush3.bf16.msra.mxu1 %v649_v51 }
 0x511   :  { %5371 = vmatprep.subr.msk.bf16.mxu1 %vm659_vm7, %v651_v42  ;;  %v778_v56 = vpop.permute.xlu1 %777 }
 0x512   :  { %v788_v20 = vsel %vm436_vm4, %v778_v56, 0 }
 0x514   :  { %v6183_v57 = vpop.eup %5566  ;;  %5002 = vmatpush3.bf16.msra.mxu1 %v661_v55 }
 0x515   :  { %5373 = vmatprep.subr.msk.bf16.mxu1 %vm436_vm4, %v778_v56  ;;  %v629_v58 = vsel %vm577_vm6, %v6183_v57, 0.0  ;;  %v5569_v59 = vpop.eup %5568  ;;  %v780_v0 = vpop.permute.xlu1 %779 }
 0x516   :  { %630 = vadd.xlane.f32.xlu1 %v629_v58  ;;  %v623_v61 = vsel %vm577_vm6, %v5569_v59, 0.0  ;;  %v791_v18 = vsel %vm436_vm4, %v780_v0, 0 }
 0x519   :  { %v5571_v60 = vpop.eup %5570 }
 0x51a   :  { %624 = vadd.xlane.f32.xlu1 %v623_v61  ;;  %v626_v14 = vsel %vm577_vm6, %v5571_v60, 0.0 }
 0x526   :  { %713 = vrot.lane.b32.xlu0 %v6124_v43, %s5841_s27 }
 0x52b   :  { %773 = vrot.lane.b32.xlu1 %v6108_v24, %s5843_s3 }
 0x52f   :  { %847 = vrot.lane.b32.xlu1 %v6124_v43, %s5842_s26 }
 0x533   :  { %843 = vrot.lane.b32.xlu1 %v6124_v43, %s5843_s3 }
 0x545   :  { %627 = vadd.xlane.f32.xlu0 %v626_v14 }
 0x55b   :  { %845 = vrot.lane.b32.xlu0 %v6118_v38, %s5842_s26 }
 0x55f   :  { %775 = vrot.lane.b32.xlu0 %v6114_v31, %s5843_s3 }
 0x563   :  { %841 = vrot.lane.b32.xlu0 %v6118_v38, %s5843_s3 }
 0x597   :  { %v619_v2 = vpop.xlane.xlu1 %618 }
 0x599   :  { %v622_v4 = vpop.xlane.xlu0 %621 }
 0x59a   :  { %5572 = vrcp.f32 %v622_v4 }
 0x59b   :  { %5574 = vrcp.f32 %v619_v2 }
 0x59d   :  { %v616_v5 = vpop.xlane.xlu0 %615 }
 0x59e   :  { %5576 = vrcp.f32 %v616_v5 }
 0x5a1   :  { %v714_v6 = vpop.permute.xlu0 %713 }
 0x5a2   :  { %5372 = vmatprep.subr.msk.bf16.mxu0 %vm659_vm7, %v714_v6  ;;  %v723_v8 = vsel %vm659_vm7, %v714_v6, 0 }
 0x5a3   :  { %v631_v9 = vpop.xlane.xlu1 %630  ;;  %5010 = vmatpush3.bf16.msra.mxu0 %v723_v8 }
 0x5a4   :  { %v5573_v10 = vpop.eup %5572  ;;  %5578 = vrcp.f32 %v631_v9 }
 0x5a5   :  { %v5575_v11 = vpop.eup %5574  ;;  %v640_v15 = vmul.f32 %v5573_v10, %v5563_v45 }
 0x5a6   :  { %v639_v7 = vmul.f32 %v5575_v11, %v6175_v36 }
 0x5a7   :  { %v625_v13 = vpop.xlane.xlu1 %624  ;;  %v645_v12 = vpack.c.bf16 %v640_v15, %v640_v15 }
 0x5a8   :  { %v5577_v3 = vpop.eup %5576  ;;  %5580 = vrcp.f32 %v625_v13 }
 0x5a9   :  { %v638_v16 = vmul.f32 %v5577_v3, %v5565_v49 }
 0x5ab   :  { %v644_v17 = vpack.c.bf16 %v639_v7, %v638_v16  ;;  %v774_v19 = vpop.permute.xlu1 %773 }
 0x5ad   :  { %5003 = vmatprep.mubr.msk.bf16.mxu1 %vm577_vm6, %v644_v17 }
 0x5ae   :  { %5004 = vmatmul.mubr.msk.bf16.vlgmr.msra.gmra.mrb[16].mxu1 %vm577_vm6, %v645_v12  ;;  %v5579_v25 = vpop.eup %5578 }
 0x5af   :  { %5016 = vmatpush3.bf16.xpose.msra.mxu1 %v788_v20  ;;  %5019 = vmatprep.mubr.msk.bf16.mxu1 %vm436_vm4, %v774_v19  ;;  %v643_v32 = vmul.f32 %v5579_v25, %v6183_v57  ;;  %v848_v42 = vpop.permute.xlu1 %847 }
 0x5b0   :  { %5374 = vmatprep.subr.msk.bf16.mxu1 %vm436_vm4, %v780_v0  ;;  %v859_v44 = vsel %vm436_vm4, %v848_v42, 0 }
 0x5b1   :  { %v647_v36 = vpack.c.bf16 %v643_v32, %v643_v32 }
 0x5b2   :  { %v5581_v29 = vpop.eup %5580 }
 0x5b3   :  { %v641_v33 = vmul.f32 %v5581_v29, %v5569_v59  ;;  %v844_v45 = vpop.permute.xlu1 %843 }
 0x5b7   :  { %5018 = vmatpush3.bf16.xpose.msra.mxu1 %v791_v18 }
 0x5d2   :  { %v628_v21 = vpop.xlane.xlu0 %627 }
 0x5d3   :  { %5582 = vrcp.f32 %v628_v21 }
 0x5d6   :  { %v846_v22 = vpop.permute.xlu0 %845 }
 0x5d7   :  { %5375 = vmatprep.subr.msk.bf16.mxu0 %vm436_vm4, %v846_v22  ;;  %v856_v41 = vsel %vm436_vm4, %v846_v22, 0 }
 0x5da   :  { %v776_v28 = vpop.permute.xlu0 %775 }
 0x5db   :  { %5020 = vmatmul.mubr.msk.bf16.vlgmr.msra.gmra.mrb[20].mxu1 %vm436_vm4, %v776_v28 }
 0x5dd   :  { %v5583_v30 = vpop.eup %5582 }
 0x5de   :  { %v642_v34 = vmul.f32 %v5583_v30, %v5571_v60  ;;  %v842_v37 = vpop.permute.xlu0 %841 }
 0x5e0   :  { %v646_v35 = vpack.c.bf16 %v642_v34, %v641_v33 }
 0x5e2   :  { %5011 = vmatprep.mubr.msk.bf16.mxu0 %vm577_vm6, %v646_v35 }
 0x5e3   :  { %5012 = vmatmul.mubr.msk.bf16.vlgmr.msra.gmra.mrb[16].mxu0 %vm577_vm6, %v647_v36 }
 0x5e4   :  { %5024 = vmatpush3.bf16.xpose.msra.mxu0 %v856_v41  ;;  %5027 = vmatprep.mubr.msk.bf16.mxu0 %vm436_vm4, %v842_v37 }
 0x5e5   :  { %5376 = vmatprep.subr.msk.bf16.mxu0 %vm436_vm4, %v848_v42 }
 0x5ec   :  { %5026 = vmatpush3.bf16.xpose.msra.mxu0 %v859_v44 }
 0x5f3   :  { %5028 = vmatmul.mubr.msk.bf16.vlgmr.msra.gmra.mrb[20].mxu0 %vm436_vm4, %v844_v45 }
 0x681   :  { %v6224_v46 = vpop.f32.mrb[16].mxu1 }
 0x682   :  { %v6226_v48 = vpop.f32.mrb[17].mxu1 }
 0x683   :  { %v5006_v49 = vpop.f32.mrb[18].mxu1 }
 0x684   :  { %v6228_v50 = vpop.f32.mrb[19].mxu1 }
 0x6ae   :  { %v5021_v51 = vpop.f32.mrb[20].mxu1 }
 0x6af   :  { %v827_v53 = vpop.f32.mrb[21].mxu1  ;;  %v911_v55 = vmul.f32 0.35355338, %v5021_v51 }
 0x6b0   :  { %v909_v57 = vmul.f32 0.35355338, %v827_v53  ;;  %v5022_v56 = vpop.f32.mrb[22].mxu1 }
 0x6b1   :  { %v830_v58 = vpop.f32.mrb[23].mxu1  ;;  %v917_v60 = vsel %vm222_vm5, %v911_v55, -1e+30 }
 0x6b2   :  { %v910_v59 = vmul.f32 0.35355338, %v830_v58  ;;  %v915_v61 = vsel %vm222_vm5, %v909_v57, -1e+30  ;;  %v927_v4 = vsel %vm577_vm6, %v917_v60, -inf }
 0x6b3   :  { %v921_v62 = vsel %vm577_vm6, %v915_v61, -inf }
 0x6b4   :  { %922 = vmax.xlane.f32.xlu0 %v921_v62  ;;  %v916_v63 = vsel %vm222_vm5, %v910_v59, -1e+30 }
 0x6b5   :  { %v924_v14 = vsel %vm577_vm6, %v916_v63, -inf }
 0x6b6   :  { %v6238_v0 = vpop.f32.mrb[16].mxu0  ;;  %925 = vmax.xlane.f32.xlu1 %v924_v14 }
 0x6b7   :  { %v6240_v2 = vpop.f32.mrb[17].mxu0 }
 0x6b8   :  { %v5014_v5 = vpop.f32.mrb[18].mxu0  ;;  %928 = vmax.xlane.f32.xlu0 %v927_v4 }
 0x6b9   :  { %v6243_v6 = vpop.f32.mrb[19].mxu0 }
 0x6c6   :  { %v5029_v8 = vpop.f32.mrb[20].mxu0 }
 0x6c7   :  { %v914_v9 = vmul.f32 0.35355338, %v5029_v8  ;;  %v895_v10 = vpop.f32.mrb[21].mxu0 }
 0x6c8   :  { %v912_v11 = vmul.f32 0.35355338, %v895_v10  ;;  %v5030_v3 = vpop.f32.mrb[22].mxu0 }
 0x6c9   :  { %v898_v13 = vpop.f32.mrb[23].mxu0  ;;  %v920_v15 = vsel %vm222_vm5, %v914_v9, -1e+30 }
 0x6ca   :  { %v913_v16 = vmul.f32 0.35355338, %v898_v13  ;;  %v936_v7 = vsel %vm577_vm6, %v920_v15, -inf  ;;  %v918_v17 = vsel %vm222_vm5, %v912_v11, -1e+30 }
 0x6cb   :  { %937 = vmax.xlane.f32.xlu1 %v936_v7  ;;  %v930_v12 = vsel %vm577_vm6, %v918_v17, -inf }
 0x6cc   :  { %931 = vmax.xlane.f32.xlu0 %v930_v12  ;;  %v919_v19 = vsel %vm222_vm5, %v913_v16, -1e+30 }
 0x6cd   :  { %v933_v20 = vsel %vm577_vm6, %v919_v19, -inf }
 0x6d0   :  { %934 = vmax.xlane.f32.xlu0 %v933_v20 }
 0x6dc   :  { %993 = vrot.lane.b32.xlu1 %v6114_v31, %s5844_s28 }
 0x6e0   :  { %1053 = vrot.lane.b32.xlu1 %v6118_v38, %s5844_s28 }
 0x6e4   :  { %1119 = vrot.lane.b32.xlu1 %v6108_v24, %s5845_s29 }
 0x6e6   :  { %991 = vrot.lane.b32.xlu0 %v6108_v24, %s5844_s28 }
 0x6e8   :  { %1121 = vrot.lane.b32.xlu1 %v6114_v31, %s5845_s29 }
 0x741   :  { %v923_v18 = vpop.xlane.xlu0 %922 }
 0x742   :  { %v939_v22 = vsub.f32 %v915_v61, %v923_v18 }
 0x743   :  { %v926_v21 = vpop.xlane.xlu1 %925 }
 0x744   :  { %v940_v25 = vsub.f32 %v916_v63, %v926_v21  ;;  %v945_v32 = vmul.f32 1.442695, %v939_v22 }
 0x745   :  { %v929_v28 = vpop.xlane.xlu0 %928 }
 0x746   :  { %v947_v29 = vmul.f32 1.442695, %v940_v25  ;;  %v941_v30 = vsub.f32 %v917_v60, %v929_v28 }
 0x748   :  { %5584 = vpow2.f32 %v947_v29  ;;  %v949_v33 = vmul.f32 1.442695, %v941_v30 }
 0x74a   :  { %5586 = vpow2.f32 %v949_v33 }
 0x74b   :  { %5588 = vpow2.f32 %v945_v32 }
 0x752   :  { %v6264_v34 = vpop.eup %5584 }
 0x753   :  { %v960_v35 = vsel %vm577_vm6, %v6264_v34, 0.0 }
 0x754   :  { %v5587_v36 = vpop.eup %5586  ;;  %961 = vadd.xlane.f32.xlu1 %v960_v35 }
 0x755   :  { %v963_v37 = vsel %vm577_vm6, %v5587_v36, 0.0  ;;  %v5589_v41 = vpop.eup %5588 }
 0x756   :  { %964 = vadd.xlane.f32.xlu0 %v963_v37  ;;  %v957_v49 = vsel %vm577_vm6, %v5589_v41, 0.0 }
 0x758   :  { %v938_v42 = vpop.xlane.xlu1 %937 }
 0x759   :  { %v944_v44 = vsub.f32 %v920_v15, %v938_v42  ;;  %v932_v45 = vpop.xlane.xlu0 %931 }
 0x75a   :  { %v942_v51 = vsub.f32 %v918_v17, %v932_v45  ;;  %958 = vadd.xlane.f32.xlu0 %v957_v49 }
 0x75b   :  { %v955_v53 = vmul.f32 1.442695, %v944_v44 }
 0x75c   :  { %v951_v55 = vmul.f32 1.442695, %v942_v51  ;;  %v994_v57 = vpop.permute.xlu1 %993 }
 0x75d   :  { %5590 = vpow2.f32 %v955_v53  ;;  %v935_v56 = vpop.xlane.xlu0 %934  ;;  %v1003_v61 = vsel %vm659_vm7, %v994_v57, 0 }
 0x75e   :  { %5592 = vpow2.f32 %v951_v55  ;;  %v943_v5 = vsub.f32 %v919_v19, %v935_v56 }
 0x760   :  { %v1054_v58 = vpop.permute.xlu1 %1053  ;;  %v953_v8 = vmul.f32 1.442695, %v943_v5 }
 0x761   :  { %5039 = vmatprep.subr.bf16.mxu0 %v1054_v58  ;;  %v992_v59 = vpop.permute.xlu0 %991 }
 0x762   :  { %5031 = vmatprep.subr.bf16.mxu1 %v992_v59  ;;  %5040 = vmatpush3.bf16.msra.mxu0 %v1054_v58  ;;  %5594 = vpow2.f32 %v953_v8 }
 0x763   :  { %5032 = vmatpush3.bf16.msra.mxu1 %v992_v59 }
 0x764   :  { %5377 = vmatprep.subr.msk.bf16.mxu1 %vm659_vm7, %v994_v57  ;;  %v1120_v63 = vpop.permute.xlu1 %1119 }
 0x765   :  { %v1130_v29 = vsel %vm436_vm4, %v1120_v63, 0 }
 0x767   :  { %v6272_v62 = vpop.eup %5590  ;;  %5034 = vmatpush3.bf16.msra.mxu1 %v1003_v61 }
 0x768   :  { %5379 = vmatprep.subr.msk.bf16.mxu1 %vm436_vm4, %v1120_v63  ;;  %v972_v60 = vsel %vm577_vm6, %v6272_v62, 0.0  ;;  %v5593_v14 = vpop.eup %5592  ;;  %v1122_v11 = vpop.permute.xlu1 %1121 }
 0x769   :  { %973 = vadd.xlane.f32.xlu1 %v972_v60  ;;  %v966_v4 = vsel %vm577_vm6, %v5593_v14, 0.0  ;;  %v1133_v33 = vsel %vm436_vm4, %v1122_v11, 0 }
 0x76c   :  { %v5595_v9 = vpop.eup %5594 }
 0x76d   :  { %967 = vadd.xlane.f32.xlu1 %v966_v4  ;;  %v969_v10 = vsel %vm577_vm6, %v5595_v9, 0.0 }
 0x770   :  { %1055 = vrot.lane.b32.xlu0 %v6124_v43, %s5844_s28 }
 0x77e   :  { %1115 = vrot.lane.b32.xlu1 %v6108_v24, %s7296_s0 }
 0x782   :  { %1189 = vrot.lane.b32.xlu1 %v6124_v43, %s5845_s29 }
 0x786   :  { %1185 = vrot.lane.b32.xlu1 %v6124_v43, %s7296_s0 }
 0x78f   :  { %970 = vadd.xlane.f32.xlu0 %v969_v10 }
 0x7a5   :  { %1187 = vrot.lane.b32.xlu0 %v6118_v38, %s5845_s29 }
 0x7a9   :  { %1117 = vrot.lane.b32.xlu0 %v6114_v31, %s7296_s0 }
 0x7ad   :  { %1183 = vrot.lane.b32.xlu0 %v6118_v38, %s7296_s0 }
 0x7e1   :  { %v962_v3 = vpop.xlane.xlu1 %961 }
 0x7e3   :  { %v965_v13 = vpop.xlane.xlu0 %964 }
 0x7e4   :  { %5596 = vrcp.f32 %v965_v13 }
 0x7e5   :  { %5598 = vrcp.f32 %v962_v3 }
 0x7e7   :  { %v959_v15 = vpop.xlane.xlu0 %958 }
 0x7e8   :  { %5600 = vrcp.f32 %v959_v15 }
 0x7eb   :  { %v1056_v16 = vpop.permute.xlu0 %1055 }
 0x7ec   :  { %5378 = vmatprep.subr.msk.bf16.mxu0 %vm659_vm7, %v1056_v16  ;;  %v1065_v7 = vsel %vm659_vm7, %v1056_v16, 0 }
 0x7ed   :  { %5042 = vmatpush3.bf16.msra.mxu0 %v1065_v7 }
 0x7ee   :  { %v5597_v17 = vpop.eup %5596 }
 0x7ef   :  { %v5599_v12 = vpop.eup %5598  ;;  %v983_v20 = vmul.f32 %v5597_v17, %v5587_v36 }
 0x7f0   :  { %v982_v21 = vmul.f32 %v5599_v12, %v6264_v34 }
 0x7f1   :  { %v988_v28 = vpack.c.bf16 %v983_v20, %v983_v20 }
 0x7f2   :  { %v5601_v19 = vpop.eup %5600 }
 0x7f3   :  { %v981_v18 = vmul.f32 %v5601_v19, %v5589_v41 }
 0x7f5   :  { %v987_v22 = vpack.c.bf16 %v982_v21, %v981_v18 }
 0x7f6   :  { %v974_v25 = vpop.xlane.xlu1 %973 }
 0x7f7   :  { %5035 = vmatprep.mubr.msk.bf16.mxu1 %vm577_vm6, %v987_v22  ;;  %5602 = vrcp.f32 %v974_v25 }
 0x7f8   :  { %5036 = vmatmul.mubr.msk.bf16.vlgmr.msra.gmra.mrb[24].mxu1 %vm577_vm6, %v988_v28 }
 0x7f9   :  { %5048 = vmatpush3.bf16.xpose.msra.mxu1 %v1130_v29 }
 0x7fa   :  { %v968_v30 = vpop.xlane.xlu1 %967  ;;  %5380 = vmatprep.subr.msk.bf16.mxu1 %vm436_vm4, %v1122_v11 }
 0x7fb   :  { %5604 = vrcp.f32 %v968_v30 }
 0x7fe   :  { %v1116_v32 = vpop.permute.xlu1 %1115 }
 0x7ff   :  { %5051 = vmatprep.mubr.msk.bf16.mxu1 %vm436_vm4, %v1116_v32 }
 0x801   :  { %5050 = vmatpush3.bf16.xpose.msra.mxu1 %v1133_v33  ;;  %v5603_v36 = vpop.eup %5602 }
 0x802   :  { %v986_v44 = vmul.f32 %v5603_v36, %v6272_v62  ;;  %v1190_v56 = vpop.permute.xlu1 %1189 }
 0x803   :  { %v1201_v58 = vsel %vm436_vm4, %v1190_v56, 0 }
 0x804   :  { %v990_v53 = vpack.c.bf16 %v986_v44, %v986_v44 }
 0x805   :  { %v5605_v41 = vpop.eup %5604 }
 0x806   :  { %v984_v45 = vmul.f32 %v5605_v41, %v5593_v14  ;;  %v1186_v59 = vpop.permute.xlu1 %1185 }
 0x81c   :  { %v971_v34 = vpop.xlane.xlu0 %970 }
 0x81d   :  { %5606 = vrcp.f32 %v971_v34 }
 0x820   :  { %v1188_v35 = vpop.permute.xlu0 %1187 }
 0x821   :  { %5381 = vmatprep.subr.msk.bf16.mxu0 %vm436_vm4, %v1188_v35  ;;  %v1198_v57 = vsel %vm436_vm4, %v1188_v35, 0 }
 0x824   :  { %v1118_v37 = vpop.permute.xlu0 %1117 }
 0x825   :  { %5052 = vmatmul.mubr.msk.bf16.vlgmr.msra.gmra.mrb[28].mxu1 %vm436_vm4, %v1118_v37 }
 0x827   :  { %v5607_v42 = vpop.eup %5606 }
 0x828   :  { %v985_v49 = vmul.f32 %v5607_v42, %v5595_v9  ;;  %v1184_v55 = vpop.permute.xlu0 %1183 }
 0x82a   :  { %v989_v51 = vpack.c.bf16 %v985_v49, %v984_v45 }
 0x82c   :  { %5043 = vmatprep.mubr.msk.bf16.mxu0 %vm577_vm6, %v989_v51 }
 0x82d   :  { %5044 = vmatmul.mubr.msk.bf16.vlgmr.msra.gmra.mrb[24].mxu0 %vm577_vm6, %v990_v53 }
 0x82e   :  { %5056 = vmatpush3.bf16.xpose.msra.mxu0 %v1198_v57  ;;  %5059 = vmatprep.mubr.msk.bf16.mxu0 %vm436_vm4, %v1184_v55 }
 0x82f   :  { %5382 = vmatprep.subr.msk.bf16.mxu0 %vm436_vm4, %v1190_v56 }
 0x836   :  { %5058 = vmatpush3.bf16.xpose.msra.mxu0 %v1201_v58 }
 0x83d   :  { %5060 = vmatmul.mubr.msk.bf16.vlgmr.msra.gmra.mrb[28].mxu0 %vm436_vm4, %v1186_v59 }
 0x8cb   :  { %v6312_v61 = vpop.f32.mrb[24].mxu1 }
 0x8cc   :  { %v6314_v62 = vpop.f32.mrb[25].mxu1 }
 0x8cd   :  { %v5038_v63 = vpop.f32.mrb[26].mxu1 }
 0x8ce   :  { %v6316_v60 = vpop.f32.mrb[27].mxu1 }
 0x8cf   :  { %v5432_v14 = vpack.i.bf16 %v6316_v60, %v6314_v62 }
 0x8f8   :  { %v5053_v4 = vpop.f32.mrb[28].mxu1 }
 0x8f9   :  { %v1169_v5 = vpop.f32.mrb[29].mxu1  ;;  %v1253_v8 = vmul.f32 0.35355338, %v5053_v4 }
 0x8fa   :  { %v1251_v9 = vmul.f32 0.35355338, %v1169_v5  ;;  %v5054_v10 = vpop.f32.mrb[30].mxu1 }
 0x8fb   :  { %v1172_v11 = vpop.f32.mrb[31].mxu1  ;;  %v1259_v7 = vsel %vm222_vm5, %v1253_v8, -1e+30 }
 0x8fc   :  { %v1252_v3 = vmul.f32 0.35355338, %v1172_v11  ;;  %v1257_v13 = vsel %vm222_vm5, %v1251_v9, -1e+30  ;;  %v1269_v20 = vsel %vm577_vm6, %v1259_v7, -inf }
 0x8fd   :  { %v1263_v15 = vsel %vm577_vm6, %v1257_v13, -inf }
 0x8fe   :  { %1264 = vmax.xlane.f32.xlu0 %v1263_v15  ;;  %v1258_v16 = vsel %vm222_vm5, %v1252_v3, -1e+30 }
 0x8ff   :  { %v1266_v17 = vsel %vm577_vm6, %v1258_v16, -inf }
 0x900   :  { %v6328_v12 = vpop.f32.mrb[24].mxu0  ;;  %1267 = vmax.xlane.f32.xlu1 %v1266_v17 }
 0x901   :  { %v6330_v19 = vpop.f32.mrb[25].mxu0 }
 0x902   :  { %v5447_v18 = vpack.i.bf16 %v6330_v19, %v6312_v61  ;;  %v5046_v21 = vpop.f32.mrb[26].mxu0  ;;  %1270 = vmax.xlane.f32.xlu0 %v1269_v20 }
 0x903   :  { %v6335_v22 = vpop.f32.mrb[27].mxu0 }
 0x904   :  { %v5462_v25 = vpack.i.bf16 %v6328_v12, %v6335_v22 }
 0x910   :  { %v5061_v28 = vpop.f32.mrb[28].mxu0 }
 0x911   :  { %v1256_v29 = vmul.f32 0.35355338, %v5061_v28  ;;  %v1237_v30 = vpop.f32.mrb[29].mxu0 }
 0x912   :  { %v1254_v32 = vmul.f32 0.35355338, %v1237_v30  ;;  %v5062_v33 = vpop.f32.mrb[30].mxu0 }
 0x913   :  { %v1240_v34 = vpop.f32.mrb[31].mxu0  ;;  %v1262_v35 = vsel %vm222_vm5, %v1256_v29, -1e+30 }
 0x914   :  { %v1255_v36 = vmul.f32 0.35355338, %v1240_v34  ;;  %v1278_v37 = vsel %vm577_vm6, %v1262_v35, -inf  ;;  %v1260_v41 = vsel %vm222_vm5, %v1254_v32, -1e+30 }
 0x915   :  { %1279 = vmax.xlane.f32.xlu1 %v1278_v37  ;;  %v1272_v42 = vsel %vm577_vm6, %v1260_v41, -inf }
 0x916   :  { %1273 = vmax.xlane.f32.xlu0 %v1272_v42  ;;  %v1261_v44 = vsel %vm222_vm5, %v1255_v36, -1e+30 }
 0x917   :  { %v1275_v45 = vsel %vm577_vm6, %v1261_v44, -inf }
 0x91a   :  { %1276 = vmax.xlane.f32.xlu0 %v1275_v45 }
 0x926   :  { %1335 = vrot.lane.b32.xlu1 %v6114_v31, %s7294_s4 }
 0x92a   :  { %1395 = vrot.lane.b32.xlu1 %v6118_v38, %s7294_s4 }
 0x92e   :  { %1461 = vrot.lane.b32.xlu1 %v6108_v24, %s7286_s30 }
 0x930   :  { %1333 = vrot.lane.b32.xlu0 %v6108_v24, %s7294_s4 }
 0x932   :  { %1463 = vrot.lane.b32.xlu1 %v6114_v31, %s7286_s30 }
 0x98b   :  { %v1265_v49 = vpop.xlane.xlu0 %1264 }
 0x98c   :  { %v1281_v53 = vsub.f32 %v1257_v13, %v1265_v49 }
 0x98d   :  { %v1268_v51 = vpop.xlane.xlu1 %1267 }
 0x98e   :  { %v1282_v55 = vsub.f32 %v1258_v16, %v1268_v51  ;;  %v1287_v59 = vmul.f32 1.442695, %v1281_v53 }
 0x98f   :  { %v1271_v57 = vpop.xlane.xlu0 %1270 }
 0x990   :  { %v1289_v56 = vmul.f32 1.442695, %v1282_v55  ;;  %v1283_v58 = vsub.f32 %v1259_v7, %v1271_v57 }
 0x992   :  { %5608 = vpow2.f32 %v1289_v56  ;;  %v1291_v63 = vmul.f32 1.442695, %v1283_v58 }
 0x994   :  { %5610 = vpow2.f32 %v1291_v63 }
 0x995   :  { %5612 = vpow2.f32 %v1287_v59 }
 0x99c   :  { %v6358_v4 = vpop.eup %5608 }
 0x99d   :  { %v1302_v5 = vsel %vm577_vm6, %v6358_v4, 0.0 }
 0x99e   :  { %v5611_v8 = vpop.eup %5610  ;;  %1303 = vadd.xlane.f32.xlu1 %v1302_v5 }
 0x99f   :  { %v1305_v9 = vsel %vm577_vm6, %v5611_v8, 0.0  ;;  %v5613_v10 = vpop.eup %5612 }
 0x9a0   :  { %1306 = vadd.xlane.f32.xlu0 %v1305_v9  ;;  %v1299_v15 = vsel %vm577_vm6, %v5613_v10, 0.0 }
 0x9a2   :  { %v1280_v11 = vpop.xlane.xlu1 %1279 }
 0x9a3   :  { %v1286_v3 = vsub.f32 %v1262_v35, %v1280_v11  ;;  %v1274_v13 = vpop.xlane.xlu0 %1273 }
 0x9a4   :  { %v1284_v16 = vsub.f32 %v1260_v41, %v1274_v13  ;;  %1300 = vadd.xlane.f32.xlu0 %v1299_v15 }
 0x9a5   :  { %v1297_v7 = vmul.f32 1.442695, %v1286_v3 }
 0x9a6   :  { %v1293_v17 = vmul.f32 1.442695, %v1284_v16  ;;  %v1336_v20 = vpop.permute.xlu1 %1335 }
 0x9a7   :  { %5614 = vpow2.f32 %v1297_v7  ;;  %v1277_v21 = vpop.xlane.xlu0 %1276  ;;  %v1345_v30 = vsel %vm659_vm7, %v1336_v20, 0 }
 0x9a8   :  { %5616 = vpow2.f32 %v1293_v17  ;;  %v1285_v37 = vsub.f32 %v1261_v44, %v1277_v21 }
 0x9aa   :  { %v1396_v28 = vpop.permute.xlu1 %1395  ;;  %v1295_v41 = vmul.f32 1.442695, %v1285_v37 }
 0x9ab   :  { %5071 = vmatprep.subr.bf16.mxu0 %v1396_v28  ;;  %v1334_v29 = vpop.permute.xlu0 %1333 }
 0x9ac   :  { %5063 = vmatprep.subr.bf16.mxu1 %v1334_v29  ;;  %5072 = vmatpush3.bf16.msra.mxu0 %v1396_v28  ;;  %5618 = vpow2.f32 %v1295_v41 }
 0x9ad   :  { %5064 = vmatpush3.bf16.msra.mxu1 %v1334_v29 }
 0x9ae   :  { %5383 = vmatprep.subr.msk.bf16.mxu1 %vm659_vm7, %v1336_v20  ;;  %v1462_v33 = vpop.permute.xlu1 %1461 }
 0x9af   :  { %v1472_v15 = vsel %vm436_vm4, %v1462_v33, 0 }
 0x9b1   :  { %v6366_v32 = vpop.eup %5614  ;;  %5066 = vmatpush3.bf16.msra.mxu1 %v1345_v30 }
 0x9b2   :  { %5385 = vmatprep.subr.msk.bf16.mxu1 %vm436_vm4, %v1462_v33  ;;  %v1314_v34 = vsel %vm577_vm6, %v6366_v32, 0.0  ;;  %v5617_v35 = vpop.eup %5616  ;;  %v1464_v44 = vpop.permute.xlu1 %1463 }
 0x9b3   :  { %1315 = vadd.xlane.f32.xlu1 %v1314_v34  ;;  %v1308_v36 = vsel %vm577_vm6, %v5617_v35, 0.0 }
 0x9b6   :  { %v5619_v42 = vpop.eup %5618 }
 0x9b7   :  { %1309 = vadd.xlane.f32.xlu1 %v1308_v36  ;;  %v1311_v45 = vsel %vm577_vm6, %v5619_v42, 0.0 }
 0x9ba   :  { %1397 = vrot.lane.b32.xlu0 %v6124_v43, %s7294_s4 }
 0x9c8   :  { %1457 = vrot.lane.b32.xlu1 %v6108_v24, %s7284_s5 }
 0x9cc   :  { %1531 = vrot.lane.b32.xlu1 %v6124_v43, %s7286_s30 }
 0x9d0   :  { %1527 = vrot.lane.b32.xlu1 %v6124_v43, %s7284_s5 }
 0x9d9   :  { %1312 = vadd.xlane.f32.xlu0 %v1311_v45 }
 0x9ef   :  { %1529 = vrot.lane.b32.xlu0 %v6118_v38, %s7286_s30 }
 0x9f3   :  { %1459 = vrot.lane.b32.xlu0 %v6114_v31, %s7284_s5 }
 0x9f7   :  { %1525 = vrot.lane.b32.xlu0 %v6118_v38, %s7284_s5  ;;  %s7317_s5 = smov 24  }
 0xa2b   :  { %v1304_v49 = vpop.xlane.xlu1 %1303 }
 0xa2d   :  { %v1307_v51 = vpop.xlane.xlu0 %1306 }
 0xa2e   :  { %5620 = vrcp.f32 %v1307_v51 }
 0xa2f   :  { %5622 = vrcp.f32 %v1304_v49 }
 0xa31   :  { %v1301_v53 = vpop.xlane.xlu0 %1300 }
 0xa32   :  { %5624 = vrcp.f32 %v1301_v53 }
 0xa35   :  { %v1398_v55 = vpop.permute.xlu0 %1397 }
 0xa36   :  { %5384 = vmatprep.subr.msk.bf16.mxu0 %vm659_vm7, %v1398_v55  ;;  %v1407_v57 = vsel %vm659_vm7, %v1398_v55, 0 }
 0xa37   :  { %5074 = vmatpush3.bf16.msra.mxu0 %v1407_v57 }
 0xa38   :  { %v5621_v56 = vpop.eup %5620 }
 0xa39   :  { %v5623_v58 = vpop.eup %5622  ;;  %v1325_v63 = vmul.f32 %v5621_v56, %v5611_v8  ;;  %v1475_v8 = vsel %vm436_vm4, %v1464_v44, 0 }
 0xa3a   :  { %v1324_v9 = vmul.f32 %v5623_v58, %v6358_v4 }
 0xa3b   :  { %v1330_v13 = vpack.c.bf16 %v1325_v63, %v1325_v63 }
 0xa3c   :  { %v5625_v59 = vpop.eup %5624 }
 0xa3d   :  { %v1323_v5 = vmul.f32 %v5625_v59, %v5613_v10 }
 0xa3f   :  { %v1329_v11 = vpack.c.bf16 %v1324_v9, %v1323_v5 }
 0xa40   :  { %v1316_v3 = vpop.xlane.xlu1 %1315 }
 0xa41   :  { %5067 = vmatprep.mubr.msk.bf16.mxu1 %vm577_vm6, %v1329_v11  ;;  %5626 = vrcp.f32 %v1316_v3 }
 0xa42   :  { %5068 = vmatmul.mubr.msk.bf16.vlgmr.msra.gmra.mrb[32].mxu1 %vm577_vm6, %v1330_v13 }
 0xa43   :  { %5080 = vmatpush3.bf16.xpose.msra.mxu1 %v1472_v15 }
 0xa44   :  { %v1310_v16 = vpop.xlane.xlu1 %1309  ;;  %5386 = vmatprep.subr.msk.bf16.mxu1 %vm436_vm4, %v1464_v44 }
 0xa45   :  { %5628 = vrcp.f32 %v1310_v16 }
 0xa48   :  { %v1458_v7 = vpop.permute.xlu1 %1457 }
 0xa49   :  { %5083 = vmatprep.mubr.msk.bf16.mxu1 %vm436_vm4, %v1458_v7 }
 0xa4b   :  { %5082 = vmatpush3.bf16.xpose.msra.mxu1 %v1475_v8  ;;  %v5627_v17 = vpop.eup %5626 }
 0xa4c   :  { %v1328_v29 = vmul.f32 %v5627_v17, %v6366_v32  ;;  %v1532_v45 = vpop.permute.xlu1 %1531 }
 0xa4d   :  { %v1543_v44 = vsel %vm436_vm4, %v1532_v45, 0 }
 0xa4e   :  { %v1332_v36 = vpack.c.bf16 %v1328_v29, %v1328_v29 }
 0xa4f   :  { %v5629_v21 = vpop.eup %5628 }
 0xa50   :  { %v1326_v30 = vmul.f32 %v5629_v21, %v5617_v35  ;;  %v1528_v32 = vpop.permute.xlu1 %1527 }
 0xa66   :  { %v1313_v4 = vpop.xlane.xlu0 %1312 }
 0xa67   :  { %5630 = vrcp.f32 %v1313_v4 }
 0xa6a   :  { %v1530_v10 = vpop.permute.xlu0 %1529 }
 0xa6b   :  { %5387 = vmatprep.subr.msk.bf16.mxu0 %vm436_vm4, %v1530_v10  ;;  %v1540_v41 = vsel %vm436_vm4, %v1530_v10, 0 }
 0xa6e   :  { %v1460_v20 = vpop.permute.xlu0 %1459 }
 0xa6f   :  { %5084 = vmatmul.mubr.msk.bf16.vlgmr.msra.gmra.mrb[36].mxu1 %vm436_vm4, %v1460_v20 }
 0xa71   :  { %v5631_v28 = vpop.eup %5630 }
 0xa72   :  { %v1327_v33 = vmul.f32 %v5631_v28, %v5619_v42  ;;  %v1526_v37 = vpop.permute.xlu0 %1525 }
 0xa74   :  { %v1331_v34 = vpack.c.bf16 %v1327_v33, %v1326_v30 }
 0xa76   :  { %5075 = vmatprep.mubr.msk.bf16.mxu0 %vm577_vm6, %v1331_v34 }
 0xa77   :  { %5076 = vmatmul.mubr.msk.bf16.vlgmr.msra.gmra.mrb[32].mxu0 %vm577_vm6, %v1332_v36 }
 0xa78   :  { %5088 = vmatpush3.bf16.xpose.msra.mxu0 %v1540_v41  ;;  %5091 = vmatprep.mubr.msk.bf16.mxu0 %vm436_vm4, %v1526_v37 }
 0xa79   :  { %5388 = vmatprep.subr.msk.bf16.mxu0 %vm436_vm4, %v1532_v45 }
 0xa80   :  { %5090 = vmatpush3.bf16.xpose.msra.mxu0 %v1543_v44 }
 0xa87   :  { %5092 = vmatmul.mubr.msk.bf16.vlgmr.msra.gmra.mrb[36].mxu0 %vm436_vm4, %v1528_v32 }
 0xb15   :  { %v6406_v35 = vpop.f32.mrb[32].mxu1 }
 0xb16   :  { %v6408_v42 = vpop.f32.mrb[33].mxu1 }
 0xb17   :  { %v5070_v49 = vpop.f32.mrb[34].mxu1 }
 0xb18   :  { %v6410_v51 = vpop.f32.mrb[35].mxu1 }
 0xb19   :  { %v5437_v53 = vpack.i.bf16 %v6410_v51, %v6408_v42 }
 0xb42   :  { %v5085_v55 = vpop.f32.mrb[36].mxu1 }
 0xb43   :  { %v1511_v57 = vpop.f32.mrb[37].mxu1  ;;  %v1595_v56 = vmul.f32 0.35355338, %v5085_v55 }
 0xb44   :  { %v1593_v58 = vmul.f32 0.35355338, %v1511_v57  ;;  %v5086_v59 = vpop.f32.mrb[38].mxu1 }
 0xb45   :  { %v1514_v63 = vpop.f32.mrb[39].mxu1  ;;  %v1601_v13 = vsel %vm222_vm5, %v1595_v56, -1e+30 }
 0xb46   :  { %v1594_v5 = vmul.f32 0.35355338, %v1514_v63  ;;  %v1599_v9 = vsel %vm222_vm5, %v1593_v58, -1e+30  ;;  %v1611_v8 = vsel %vm577_vm6, %v1601_v13, -inf }
 0xb47   :  { %v1605_v11 = vsel %vm577_vm6, %v1599_v9, -inf }
 0xb48   :  { %1606 = vmax.xlane.f32.xlu0 %v1605_v11  ;;  %v1600_v3 = vsel %vm222_vm5, %v1594_v5, -1e+30 }
 0xb49   :  { %v1608_v15 = vsel %vm577_vm6, %v1600_v3, -inf }
 0xb4a   :  { %v6422_v16 = vpop.f32.mrb[32].mxu0  ;;  %1609 = vmax.xlane.f32.xlu1 %v1608_v15 }
 0xb4b   :  { %v6424_v7 = vpop.f32.mrb[33].mxu0 }
 0xb4c   :  { %v5452_v4 = vpack.i.bf16 %v6424_v7, %v6406_v35  ;;  %v5078_v10 = vpop.f32.mrb[34].mxu0  ;;  %1612 = vmax.xlane.f32.xlu0 %v1611_v8 }
 0xb4d   :  { %v6429_v17 = vpop.f32.mrb[35].mxu0 }
 0xb4e   :  { %v5467_v20 = vpack.i.bf16 %v6422_v16, %v6429_v17 }
 0xb5a   :  { %v5093_v21 = vpop.f32.mrb[36].mxu0 }
 0xb5b   :  { %v1598_v28 = vmul.f32 0.35355338, %v5093_v21  ;;  %v1579_v29 = vpop.f32.mrb[37].mxu0 }
 0xb5c   :  { %v1596_v30 = vmul.f32 0.35355338, %v1579_v29  ;;  %v5094_v33 = vpop.f32.mrb[38].mxu0 }
 0xb5d   :  { %v1582_v34 = vpop.f32.mrb[39].mxu0  ;;  %v1604_v36 = vsel %vm222_vm5, %v1598_v28, -1e+30 }
 0xb5e   :  { %v1597_v37 = vmul.f32 0.35355338, %v1582_v34  ;;  %v1620_v41 = vsel %vm577_vm6, %v1604_v36, -inf  ;;  %v1602_v45 = vsel %vm222_vm5, %v1596_v30, -1e+30 }
 0xb5f   :  { %1621 = vmax.xlane.f32.xlu1 %v1620_v41  ;;  %v1614_v44 = vsel %vm577_vm6, %v1602_v45, -inf }
 0xb60   :  { %1615 = vmax.xlane.f32.xlu0 %v1614_v44  ;;  %v1603_v32 = vsel %vm222_vm5, %v1597_v37, -1e+30 }
 0xb61   :  { %v1617_v49 = vsel %vm577_vm6, %v1603_v32, -inf }
 0xb64   :  { %1618 = vmax.xlane.f32.xlu0 %v1617_v49 }
 0xbd5   :  { %v1607_v55 = vpop.xlane.xlu0 %1606 }
 0xbd6   :  { %v1623_v56 = vsub.f32 %v1599_v9, %v1607_v55 }
 0xbd7   :  { %v1610_v57 = vpop.xlane.xlu1 %1609 }
 0xbd8   :  { %v1624_v58 = vsub.f32 %v1600_v3, %v1610_v57  ;;  %v1629_v11 = vmul.f32 1.442695, %v1623_v56 }
 0xbd9   :  { %v1613_v59 = vpop.xlane.xlu0 %1612 }
 0xbda   :  { %v1631_v63 = vmul.f32 1.442695, %v1624_v58  ;;  %v1625_v5 = vsub.f32 %v1601_v13, %v1613_v59 }
 0xbdc   :  { %5632 = vpow2.f32 %v1631_v63  ;;  %v1633_v15 = vmul.f32 1.442695, %v1625_v5 }
 0xbde   :  { %5634 = vpow2.f32 %v1633_v15 }
 0xbdf   :  { %5636 = vpow2.f32 %v1629_v11 }
 0xbe6   :  { %v5633_v8 = vpop.eup %5632 }
 0xbe7   :  { %v1644_v10 = vsel %vm577_vm6, %v5633_v8, 0.0 }
 0xbe8   :  { %v6443_v21 = vpop.eup %5634  ;;  %1645 = vadd.xlane.f32.xlu1 %v1644_v10 }
 0xbe9   :  { %v1647_v28 = vsel %vm577_vm6, %v6443_v21, 0.0  ;;  %v5637_v29 = vpop.eup %5636 }
 0xbea   :  { %1648 = vadd.xlane.f32.xlu0 %v1647_v28  ;;  %v1641_v13 = vsel %vm577_vm6, %v5637_v29, 0.0 }
 0xbec   :  { %v1622_v9 = vpop.xlane.xlu1 %1621 }
 0xbed   :  { %v1628_v3 = vsub.f32 %v1604_v36, %v1622_v9  ;;  %v1616_v30 = vpop.xlane.xlu0 %1615 }
 0xbee   :  { %v1626_v33 = vsub.f32 %v1602_v45, %v1616_v30  ;;  %1642 = vadd.xlane.f32.xlu0 %v1641_v13 }
 0xbef   :  { %v1639_v34 = vmul.f32 1.442695, %v1628_v3 }
 0xbf0   :  { %v1635_v37 = vmul.f32 1.442695, %v1626_v33  ;;  %v5528_v33 = vld [vmem:[%s7265_s9] sm:$0xff]  }
 0xbf1   :  { %5638 = vpow2.f32 %v1639_v34  ;;  %v1619_v41 = vpop.xlane.xlu0 %1618  ;;  %v5529_v34 = vld [vmem:[%s7265_s9 + $0x8] sm:$0xff]  }
 0xbf2   :  { %v1627_v44 = vsub.f32 %v1603_v32, %v1619_v41  ;;  %5640 = vpow2.f32 %v1635_v37 }
 0xbf4   :  { %v1637_v49 = vmul.f32 1.442695, %v1627_v44 }
 0xbf6   :  { %5642 = vpow2.f32 %v1637_v49 }
 0xbfb   :  { %v5639_v55 = vpop.eup %5638 }
 0xbfc   :  { %v1656_v57 = vsel %vm577_vm6, %v5639_v55, 0.0  ;;  %v5641_v56 = vpop.eup %5640 }
 0xbfd   :  { %1657 = vadd.xlane.f32.xlu1 %v1656_v57  ;;  %v1650_v36 = vsel %vm577_vm6, %v5641_v56, 0.0 }
 0xc00   :  { %v5643_v58 = vpop.eup %5642 }
 0xc01   :  { %1651 = vadd.xlane.f32.xlu1 %v1650_v36  ;;  %v1653_v45 = vsel %vm577_vm6, %v5643_v58, 0.0 }
 0xc02   :  { %1654 = vadd.xlane.f32.xlu0 %v1653_v45 }
 0xc12   :  { %1677 = vrot.lane.b32.xlu1 %v6114_v31, %s7282_s1 }
 0xc16   :  { %1737 = vrot.lane.b32.xlu1 %v6118_v38, %s7282_s1 }
 0xc18   :  { %1675 = vrot.lane.b32.xlu0 %v6108_v24, %s7282_s1 }
 0xc1a   :  { %1739 = vrot.lane.b32.xlu1 %v6124_v43, %s7282_s1  ;;  %s7288_s1 = smov 24  }
 0xc1c   :  { %5433 = vrot.lane.b32.xlu0 %v5432_v14, %s7290_s24 }
 0xc1e   :  { %5438 = vrot.lane.b32.xlu1 %v5437_v53, %s7292_s22 }
 0xc22   :  { %5448 = vrot.lane.b32.xlu1 %v5447_v18, %s7290_s24 }
 0xc75   :  { %v1646_v24 = vpop.xlane.xlu1 %1645 }
 0xc76   :  { %5644 = vrcp.f32 %v1646_v24 }
 0xc77   :  { %v1649_v31 = vpop.xlane.xlu0 %1648 }
 0xc7b   :  { %v1643_v38 = vpop.xlane.xlu0 %1642 }
 0xc7c   :  { %5646 = vrcp.f32 %v1643_v38 }
 0xc7d   :  { %5648 = vrcp.f32 %v1649_v31 }
 0xc80   :  { %v5645_v43 = vpop.eup %5644 }
 0xc81   :  { %v1666_v60 = vmul.f32 %v5645_v43, %v5633_v8 }
 0xc86   :  { %v5647_v32 = vpop.eup %5646 }
 0xc87   :  { %v1665_v62 = vmul.f32 %v5647_v32, %v5637_v29  ;;  %v5649_v19 = vpop.eup %5648 }
 0xc88   :  { %v1667_v63 = vmul.f32 %v5649_v19, %v6443_v21 }
 0xc89   :  { %v1671_v14 = vpack.c.bf16 %v1666_v60, %v1665_v62 }
 0xc8a   :  { %v1658_v59 = vpop.xlane.xlu1 %1657  ;;  %v1672_v28 = vpack.c.bf16 %v1667_v63, %v1667_v63 }
 0xc8b   :  { %5099 = vmatprep.mubr.msk.bf16.mxu1 %vm577_vm6, %v1671_v14  ;;  %5650 = vrcp.f32 %v1658_v59 }
 0xc8e   :  { %v1652_v42 = vpop.xlane.xlu1 %1651 }
 0xc8f   :  { %5652 = vrcp.f32 %v1652_v42  ;;  %v1655_v51 = vpop.xlane.xlu0 %1654 }
 0xc90   :  { %5654 = vrcp.f32 %v1655_v51 }
 0xc92   :  { %v1678_v61 = vpop.permute.xlu1 %1677 }
 0xc93   :  { %v1676_v18 = vpop.permute.xlu0 %1675  ;;  %v1687_v11 = vsel %vm659_vm7, %v1678_v61, 0 }
 0xc94   :  { %5095 = vmatprep.subr.bf16.mxu1 %v1676_v18 }
 0xc95   :  { %5096 = vmatpush3.bf16.msra.mxu1 %v1676_v18  ;;  %v5651_v5 = vpop.eup %5650 }
 0xc96   :  { %v1738_v53 = vpop.permute.xlu1 %1737  ;;  %5389 = vmatprep.subr.msk.bf16.mxu1 %vm659_vm7, %v1678_v61  ;;  %v1670_v9 = vmul.f32 %v5651_v5, %v5639_v55 }
 0xc97   :  { %5103 = vmatprep.subr.bf16.mxu0 %v1738_v53  ;;  %v5434_v38 = vpop.permute.xlu0 %5433 }
 0xc98   :  { %5104 = vmatpush3.bf16.msra.mxu0 %v1738_v53  ;;  %v1674_v13 = vpack.c.bf16 %v1670_v9, %v1670_v9  ;;  %v5436_v43 = vunpack.i.h.bf16 %v5434_v38  ;;  %v5435_v32 = vunpack.i.l.bf16 %v5434_v38 }
 0xc99   :  { %v5653_v15 = vpop.eup %5652  ;;  %5098 = vmatpush3.bf16.msra.mxu1 %v1687_v11 }
 0xc9a   :  { %v5655_v8 = vpop.eup %5654  ;;  %v1740_v10 = vpop.permute.xlu1 %1739  ;;  %v1668_v29 = vmul.f32 %v5653_v15, %v5641_v56  ;;  %5111 = vmatprep.subr.bf16.mxu1 %v5838_v1  ;;  %v1872_v16 = vsel %vm436_vm4, %v6228_v50, %v5436_v43 }
 0xc9b   :  { %5390 = vmatprep.subr.msk.bf16.mxu0 %vm659_vm7, %v1740_v10  ;;  %v1749_v3 = vsel %vm659_vm7, %v1740_v10, 0  ;;  %v1669_v30 = vmul.f32 %v5655_v8, %v5643_v58 }
 0xc9c   :  { %5100 = vmatmul.mubr.msk.bf16.vlgmr.msra.gmra.mrb[40].mxu1 %vm577_vm6, %v1672_v28  ;;  %5106 = vmatpush3.bf16.msra.mxu0 %v1749_v3 }
 0xc9d   :  { %v1673_v21 = vpack.c.bf16 %v1669_v30, %v1668_v29  ;;  %5115 = vmatprep.mubr.msk.bf16.mxu1 %vm5839_vm0, %v5838_v1  ;;  %5127 = vmatprep.subr.bf16.mxu0 %v5838_v1 }
 0xc9e   :  { %5112 = vmatpush3.bf16.msra.mxu1 %v5528_v33  ;;  %v5439_v31 = vpop.permute.xlu1 %5438 }
 0xc9f   :  { %5107 = vmatprep.mubr.msk.bf16.mxu0 %vm577_vm6, %v1673_v21  ;;  %5113 = vmatprep.subr.bf16.mxu1 %v5838_v1  ;;  %v5441_v62 = vunpack.i.h.bf16 %v5439_v31  ;;  %v5440_v60 = vunpack.i.l.bf16 %v5439_v31 }
 0xca0   :  { %5108 = vmatmul.mubr.msk.bf16.vlgmr.msra.gmra.mrb[40].mxu0 %vm577_vm6, %v1674_v13 }
 0xca1   :  { %5131 = vmatprep.mubr.msk.bf16.mxu0 %vm5839_vm0, %v5838_v1 }
 0xca2   :  { %5114 = vmatpush3.bf16.msra.mxu1 %v5529_v34  ;;  %v5449_v35 = vpop.permute.xlu1 %5448 }
 0xca3   :  { %5143 = vmatprep.subr.bf16.mxu1 %v5838_v1  ;;  %v5450_v14 = vunpack.i.l.bf16 %v5449_v35 }
 0xca5   :  { %v1873_v53 = vsel %vm436_vm4, %v6224_v46, %v5450_v14 }
 0xd6f   :  { %v5101_v37 = vpop.f32.mrb[40].mxu1 }
 0xd70   :  { %v1723_v41 = vpop.f32.mrb[41].mxu1 }
 0xd71   :  { %v5102_v44 = vpop.f32.mrb[42].mxu1 }
 0xd72   :  { %v1726_v49 = vpop.f32.mrb[43].mxu1 }
 0xd73   :  { %v5442_v55 = vpack.i.bf16 %v1726_v49, %v1723_v41  ;;  %v5109_v57 = vpop.f32.mrb[40].mxu0 }
 0xd74   :  { %v1785_v56 = vpop.f32.mrb[41].mxu0 }
 0xd75   :  { %v5457_v58 = vpack.i.bf16 %v1785_v56, %v5101_v37  ;;  %v5110_v36 = vpop.f32.mrb[42].mxu0  ;;  %5443 = vrot.lane.b32.xlu0 %v5442_v55, %s7288_s1 }
 0xd76   :  { %v1788_v45 = vpop.f32.mrb[43].mxu0 }
 0xd77   :  { %v5472_v24 = vpack.i.bf16 %v5109_v57, %v1788_v45  ;;  %5458 = vrot.lane.b32.xlu1 %v5457_v58, %s7288_s1 }
 0xd79   :  { %5453 = vrot.lane.b32.xlu0 %v5452_v4, %s7292_s22  ;;  %v1871_v4 = vsel %vm436_vm4, %v6226_v48, %v5435_v32 }
 0xd7a   :  { %v1878_v22 = vsel %vm1877_vm8, %v1871_v4, %v5440_v60 }
 0xd7b   :  { %5468 = vrot.lane.b32.xlu1 %v5467_v20, %s7292_s22  ;;  %v5451_v20 = vunpack.i.h.bf16 %v5449_v35 }
 0xd7d   :  { %5463 = vrot.lane.b32.xlu0 %v5462_v25, %s7290_s24  ;;  %v1879_v25 = vsel %vm1877_vm8, %v1872_v16, %v5441_v62  ;;  %v1874_v48 = vsel %vm436_vm4, %v6240_v2, %v5451_v20 }
 0xd81   :  { %5473 = vrot.lane.b32.xlu0 %v5472_v24, %s7288_s1 }
 0xde7   :  { %v5444_v7 = vpop.permute.xlu0 %5443 }
 0xde8   :  { %v5446_v17 = vunpack.i.h.bf16 %v5444_v7  ;;  %v5445_v12 = vunpack.i.l.bf16 %v5444_v7 }
 0xde9   :  { %v5459_v51 = vpop.permute.xlu1 %5458 }
 0xdea   :  { %v1884_v59 = vsel %vm577_vm6, %v1878_v22, %v5445_v12  ;;  %v1885_v42 = vsel %vm577_vm6, %v1879_v25, %v5446_v17  ;;  %v5461_v63 = vunpack.i.h.bf16 %v5459_v51  ;;  %v5460_v5 = vunpack.i.l.bf16 %v5459_v51 }
 0xdeb   :  { %v1890_v61 = vpack.c.bf16 %v1885_v42, %v1884_v59  ;;  %v5454_v19 = vpop.permute.xlu0 %5453 }
 0xdec   :  { %v5456_v18 = vunpack.i.h.bf16 %v5454_v19  ;;  %v5455_v50 = vunpack.i.l.bf16 %v5454_v19 }
 0xded   :  { %5116 = vmatmul.mubr.msk.bf16.vlgmr.msra.gmra.mrb[44].mxu1 %vm225_vm2, %v1890_v61  ;;  %v5469_v2 = vpop.permute.xlu1 %5468 }
 0xdee   :  { %v1881_v11 = vsel %vm1877_vm8, %v1874_v48, %v5456_v18  ;;  %v1880_v15 = vsel %vm1877_vm8, %v1873_v53, %v5455_v50  ;;  %5119 = vmatprep.mubr.msk.bf16.mxu1 %vm5839_vm0, %v5838_v1  ;;  %v5471_v21 = vunpack.i.h.bf16 %v5469_v2  ;;  %v5470_v13 = vunpack.i.l.bf16 %v5469_v2 }
 0xdef   :  { %v5464_v8 = vpop.permute.xlu0 %5463  ;;  %v1886_v10 = vsel %vm577_vm6, %v1880_v15, %v5460_v5  ;;  %v1887_v28 = vsel %vm577_vm6, %v1881_v11, %v5461_v63 }
 0xdf0   :  { %v5466_v29 = vunpack.i.h.bf16 %v5464_v8  ;;  %v5465_v9 = vunpack.i.l.bf16 %v5464_v8  ;;  %v1891_v46 = vpack.c.bf16 %v1887_v28, %v1886_v10 }
 0xdf2   :  { %v1876_v3 = vsel %vm436_vm4, %v6238_v0, %v5466_v29  ;;  %v1875_v30 = vsel %vm436_vm4, %v6243_v6, %v5465_v9  ;;  %v4647_v6 = vld [vmem:[%s7266_s10] ss:$0 sm:$0xff] }
 0xdf3   :  { %v5474_v33 = vpop.permute.xlu0 %5473  ;;  %v1882_v41 = vsel %vm1877_vm8, %v1875_v30, %v5470_v13  ;;  %v1883_v44 = vsel %vm1877_vm8, %v1876_v3, %v5471_v21 }
 0xdf4   :  { %v5476_v34 = vunpack.i.h.bf16 %v5474_v33  ;;  %v5475_v37 = vunpack.i.l.bf16 %v5474_v33 }
 0xdf5   :  { %5120 = vmatmul.mubr.msk.bf16.gmra.mrb[48].mxu1 %vm225_vm2, %v1891_v46 }
 0xdf6   :  { %v1888_v49 = vsel %vm577_vm6, %v1882_v41, %v5475_v37  ;;  %v1889_v55 = vsel %vm577_vm6, %v1883_v44, %v5476_v34  ;;  %5123 = vmatprep.mubr.msk.bf16.mxu1 %vm5839_vm0, %v5838_v1 }
 0xdf7   :  { %v1892_v0 = vpack.c.bf16 %v1889_v55, %v1888_v49 }
 0xdfd   :  { %5124 = vmatmul.mubr.msk.bf16.gmra.mrb[52].mxu1 %vm225_vm2, %v1892_v0 }
 0xdfe   :  { %5151 = vmatprep.mubr.msk.bf16.mxu1 %vm5839_vm0, %v5838_v1 }
 0xec0   :  { %v1954_v57 = vpop.f32.mrb[44].mxu1 }
 0xec1   :  { %v1955_v56 = vadd.f32 %v4647_v6, %v1954_v57  ;;  %v5117_v58 = vpop.f32.mrb[45].mxu1  ;;  %v5531_v57 = vld [vmem:[%s7269_s13 + $0x8] sm:$0xff]  }
 0xec2   :  { %v1957_v36 = vpop.f32.mrb[46].mxu1 }
 0xec3   :  { %v6546_v45 = vadd.f32 %v1955_v56, %v6021_v23  ;;  %v1958_v24 = vadd.f32 %v4647_v6, %v1957_v36  ;;  %v5118_v31 = vpop.f32.mrb[47].mxu1 }
 0xec5   :  { %v6549_v38 = vadd.f32 %v1958_v24, %v6025_v27  ;;  %v1985_v43 = vsel %vm225_vm2, %v6546_v45, 0.0 }
 0xec6   :  { %1986 = vadd.xlane.f32.xlu1 %v1985_v43 }
 0xec7   :  { %v1988_v32 = vsel %vm225_vm2, %v6549_v38, 0.0 }
 0xec8   :  { %1989 = vadd.xlane.f32.xlu0 %v1988_v32  ;;  %v1962_v62 = vpop.f32.mrb[48].mxu1 }
 0xec9   :  { %v1963_v60 = vadd.f32 %v4647_v6, %v1962_v62  ;;  %v5121_v35 = vpop.f32.mrb[49].mxu1 }
 0xeca   :  { %v1965_v7 = vpop.f32.mrb[50].mxu1 }
 0xecb   :  { %v6556_v23 = vadd.f32 %v1963_v60, %v6040_v39  ;;  %v1966_v16 = vadd.f32 %v4647_v6, %v1965_v7  ;;  %v5122_v4 = vpop.f32.mrb[51].mxu1 }
 0xecc   :  { %v4653_v4 = vld [vmem:[%s7267_s11] ss:$0 sm:$0xff] }
 0xecd   :  { %v6559_v27 = vadd.f32 %v1966_v16, %v6042_v40  ;;  %v1991_v17 = vsel %vm225_vm2, %v6556_v23, 0.0 }
 0xece   :  { %1992 = vadd.xlane.f32.xlu0 %v1991_v17 }
 0xecf   :  { %v1994_v20 = vsel %vm225_vm2, %v6559_v27, 0.0 }
 0xed0   :  { %v1970_v12 = vpop.f32.mrb[52].mxu1 }
 0xed1   :  { %v1971_v22 = vadd.f32 %v4647_v6, %v1970_v12  ;;  %v5125_v25 = vpop.f32.mrb[53].mxu1 }
 0xed2   :  { %1995 = vadd.xlane.f32.xlu0 %v1994_v20  ;;  %v1973_v14 = vpop.f32.mrb[54].mxu1 }
 0xed3   :  { %v6566_v39 = vadd.f32 %v1971_v22, %v6048_v47  ;;  %v1974_v59 = vadd.f32 %v4647_v6, %v1973_v14  ;;  %v5126_v42 = vpop.f32.mrb[55].mxu1  ;;  %v5530_v6 = vld [vmem:[%s7269_s13] sm:$0xff]  }
 0xed4   :  { %5128 = vmatpush3.bf16.msra.mxu0 %v5530_v6 }
 0xed5   :  { %v6569_v40 = vadd.f32 %v1974_v59, %v6054_v52  ;;  %v1997_v51 = vsel %vm225_vm2, %v6566_v39, 0.0  ;;  %5129 = vmatprep.subr.bf16.mxu0 %v5838_v1 }
 0xed6   :  { %1998 = vadd.xlane.f32.xlu1 %v1997_v51 }
 0xed7   :  { %v2000_v61 = vsel %vm225_vm2, %v6569_v40, 0.0 }
 0xed8   :  { %2001 = vadd.xlane.f32.xlu0 %v2000_v61  ;;  %5130 = vmatpush3.bf16.msra.mxu0 %v5531_v57 }
 0xed9   :  { %5163 = vmatprep.subr.bf16.mxu0 %v5838_v1 }
 0xf53   :  { %v1987_v19 = vpop.xlane.xlu1 %1986 }
 0xf54   :  { %v2003_v18 = vmul.f32 0.03125, %v1987_v19  ;;  %v4654_v19 = vld [vmem:[%s7268_s12] ss:$0 sm:$0xff] }
 0xf55   :  { %v1990_v50 = vpop.xlane.xlu0 %1989 }
 0xf56   :  { %v2009_v48 = vsub.f32 %v6546_v45, %v2003_v18  ;;  %v2004_v47 = vmul.f32 0.03125, %v1990_v50 }
 0xf58   :  { %v2010_v53 = vsub.f32 %v6549_v38, %v2004_v47  ;;  %v2015_v63 = vmul.f32 %v2009_v48, %v2009_v48 }
 0xf5a   :  { %v2021_v52 = vsel %vm225_vm2, %v2015_v63, 0.0  ;;  %v2016_v5 = vmul.f32 %v2010_v53, %v2010_v53 }
 0xf5b   :  { %v1993_v11 = vpop.xlane.xlu0 %1992  ;;  %2022 = vadd.xlane.f32.xlu1 %v2021_v52 }
 0xf5c   :  { %v2005_v15 = vmul.f32 0.03125, %v1993_v11  ;;  %v2024_v8 = vsel %vm225_vm2, %v2016_v5, 0.0 }
 0xf5d   :  { %2025 = vadd.xlane.f32.xlu0 %v2024_v8 }
 0xf5e   :  { %v6580_v10 = vsub.f32 %v6556_v23, %v2005_v15 }
 0xf5f   :  { %v1996_v28 = vpop.xlane.xlu0 %1995 }
 0xf60   :  { %v2006_v2 = vmul.f32 0.03125, %v1996_v28  ;;  %v2017_v29 = vmul.f32 %v6580_v10, %v6580_v10 }
 0xf62   :  { %v6585_v9 = vsub.f32 %v6559_v27, %v2006_v2  ;;  %v2027_v46 = vsel %vm225_vm2, %v2017_v29, 0.0 }
 0xf63   :  { %2028 = vadd.xlane.f32.xlu1 %v2027_v46  ;;  %v1999_v3 = vpop.xlane.xlu1 %1998 }
 0xf64   :  { %v2007_v30 = vmul.f32 0.03125, %v1999_v3  ;;  %v2018_v21 = vmul.f32 %v6585_v9, %v6585_v9 }
 0xf65   :  { %v2002_v13 = vpop.xlane.xlu0 %2001 }
 0xf66   :  { %v6591_v33 = vsub.f32 %v6566_v39, %v2007_v30  ;;  %v2008_v34 = vmul.f32 0.03125, %v2002_v13  ;;  %v2030_v37 = vsel %vm225_vm2, %v2018_v21, 0.0 }
 0xf67   :  { %2031 = vadd.xlane.f32.xlu0 %v2030_v37 }
 0xf68   :  { %v2014_v41 = vsub.f32 %v6569_v40, %v2008_v34  ;;  %v2019_v44 = vmul.f32 %v6591_v33, %v6591_v33 }
 0xf6a   :  { %v2033_v49 = vsel %vm225_vm2, %v2019_v44, 0.0  ;;  %v2020_v55 = vmul.f32 %v2014_v41, %v2014_v41  ;;  %v5534_v44 = vld [vmem:[%s7271_s15 + $0x10] sm:$0xff]  }
 0xf6b   :  { %2034 = vadd.xlane.f32.xlu1 %v2033_v49  ;;  %v5535_v49 = vld [vmem:[%s7271_s15 + $0x18] sm:$0xff]  }
 0xf6c   :  { %v2036_v0 = vsel %vm225_vm2, %v2020_v55, 0.0  ;;  %v4655_v55 = vld [vmem:[%s7270_s14] ss:$0 sm:$0xff] }
 0xf6d   :  { %2037 = vadd.xlane.f32.xlu0 %v2036_v0 }
 0xfe8   :  { %v2023_v56 = vpop.xlane.xlu1 %2022 }
 0xfe9   :  { %v2039_v58 = vmul.f32 0.03125, %v2023_v56 }
 0xfea   :  { %v2026_v36 = vpop.xlane.xlu0 %2025 }
 0xfeb   :  { %v2045_v24 = vadd.f32 1e-05, %v2039_v58  ;;  %v2040_v31 = vmul.f32 0.03125, %v2026_v36 }
 0xfed   :  { %5656 = vrsqrt.f32 %v2045_v24  ;;  %v2046_v43 = vadd.f32 1e-05, %v2040_v31 }
 0xfef   :  { %5658 = vrsqrt.f32 %v2046_v43 }
 0xff0   :  { %v2029_v32 = vpop.xlane.xlu1 %2028 }
 0xff1   :  { %v2041_v62 = vmul.f32 0.03125, %v2029_v32 }
 0xff3   :  { %v2047_v60 = vadd.f32 1e-05, %v2041_v62 }
 0xff4   :  { %v2032_v35 = vpop.xlane.xlu0 %2031 }
 0xff5   :  { %5660 = vrsqrt.f32 %v2047_v60  ;;  %v2042_v7 = vmul.f32 0.03125, %v2032_v35 }
 0xff7   :  { %v5657_v16 = vpop.eup %5656  ;;  %v2048_v17 = vadd.f32 1e-05, %v2042_v7 }
 0xff8   :  { %v2057_v12 = vmul.f32 %v5657_v16, %v2009_v48  ;;  %v2035_v22 = vpop.xlane.xlu1 %2034 }
 0xff9   :  { %v5659_v25 = vpop.eup %5658  ;;  %5662 = vrsqrt.f32 %v2048_v17  ;;  %v2043_v20 = vmul.f32 0.03125, %v2035_v22 }
 0xffa   :  { %v2069_v14 = vmul.f32 %v4653_v4, %v2057_v12  ;;  %v2058_v59 = vmul.f32 %v5659_v25, %v2010_v53  ;;  %v2038_v42 = vpop.xlane.xlu0 %2037 }
 0xffb   :  { %v2049_v51 = vadd.f32 1e-05, %v2043_v20  ;;  %v2044_v61 = vmul.f32 0.03125, %v2038_v42 }
 0xffc   :  { %v2070_v18 = vmul.f32 %v4653_v4, %v2058_v59  ;;  %v2081_v47 = vadd.f32 %v4654_v19, %v2069_v14 }
 0xffd   :  { %5664 = vrsqrt.f32 %v2049_v51  ;;  %v2050_v50 = vadd.f32 1e-05, %v2044_v61 }
 0xffe   :  { %v2082_v63 = vadd.f32 %v4654_v19, %v2070_v18 }
 0xfff   :  { %v5661_v52 = vpop.eup %5660  ;;  %5666 = vrsqrt.f32 %v2050_v50 }
0x1000   :  { %v2087_v48 = vpack.c.bf16 %v2082_v63, %v2081_v47  ;;  %v2059_v5 = vmul.f32 %v5661_v52, %v6580_v10 }
0x1002   :  { %5132 = vmatmul.mubr.msk.bf16.vlgmr.msra.gmra.mrb[44].mxu0 %vm225_vm2, %v2087_v48  ;;  %v2071_v15 = vmul.f32 %v4653_v4, %v2059_v5 }
0x1003   :  { %v5663_v53 = vpop.eup %5662  ;;  %5135 = vmatprep.mubr.msk.bf16.mxu0 %vm5839_vm0, %v5838_v1 }
0x1004   :  { %v2060_v11 = vmul.f32 %v5663_v53, %v6585_v9  ;;  %v2083_v2 = vadd.f32 %v4654_v19, %v2071_v15 }
0x1006   :  { %v2072_v8 = vmul.f32 %v4653_v4, %v2060_v11 }
0x1007   :  { %v5665_v28 = vpop.eup %5664 }
0x1008   :  { %v2084_v29 = vadd.f32 %v4654_v19, %v2072_v8  ;;  %v2061_v46 = vmul.f32 %v5665_v28, %v6591_v33  ;;  %v5532_v33 = vld [vmem:[%s7271_s15] sm:$0xff]  }
0x1009   :  { %v5667_v3 = vpop.eup %5666  ;;  %5144 = vmatpush3.bf16.msra.mxu1 %v5532_v33 }
0x100a   :  { %v2088_v30 = vpack.c.bf16 %v2084_v29, %v2083_v2  ;;  %v2062_v21 = vmul.f32 %v5667_v3, %v2014_v41  ;;  %v2073_v10 = vmul.f32 %v4653_v4, %v2061_v46  ;;  %5145 = vmatprep.subr.bf16.mxu1 %v5838_v1  ;;  %v5533_v41 = vld [vmem:[%s7271_s15 + $0x8] sm:$0xff]  }
0x100c   :  { %5136 = vmatmul.mubr.msk.bf16.gmra.mrb[48].mxu0 %vm225_vm2, %v2088_v30  ;;  %v2074_v13 = vmul.f32 %v4653_v4, %v2062_v21  ;;  %v2085_v37 = vadd.f32 %v4654_v19, %v2073_v10 }
0x100d   :  { %5139 = vmatprep.mubr.msk.bf16.mxu0 %vm5839_vm0, %v5838_v1  ;;  %5146 = vmatpush3.bf16.msra.mxu1 %v5533_v41  ;;  %v4661_v41 = vld [vmem:[%s7272_s16] ss:$0 sm:$0xff] }
0x100e   :  { %v2086_v34 = vadd.f32 %v4654_v19, %v2074_v13  ;;  %5147 = vmatprep.subr.bf16.mxu1 %v5838_v1 }
0x1010   :  { %v2089_v9 = vpack.c.bf16 %v2086_v34, %v2085_v37 }
0x1011   :  { %5148 = vmatpush3.bf16.msra.mxu1 %v5534_v44 }
0x1012   :  { %5149 = vmatprep.subr.bf16.mxu1 %v5838_v1 }
0x1014   :  { %5140 = vmatmul.mubr.msk.bf16.gmra.mrb[52].mxu0 %vm225_vm2, %v2089_v9 }
0x1015   :  { %5167 = vmatprep.mubr.msk.bf16.mxu0 %vm5839_vm0, %v5838_v1  ;;  %5150 = vmatpush3.bf16.msra.mxu1 %v5535_v49 }
0x10d5   :  { %v2156_v0 = vpop.f32.mrb[44].mxu0 }
0x10d6   :  { %v2157_v6 = vadd.f32 %v4655_v55, %v2156_v0  ;;  %v5133_v57 = vpop.f32.mrb[45].mxu0 }
0x10d7   :  { %v2159_v56 = vpop.f32.mrb[46].mxu0 }
0x10d8   :  { %v2185_v58 = vmul.f32 0.70710677, %v2157_v6  ;;  %v2160_v36 = vadd.f32 %v4655_v55, %v2159_v56  ;;  %v5134_v24 = vpop.f32.mrb[47].mxu0  ;;  %v2179_v25 = vmul.f32 0.5, %v2157_v6 }
0x10da   :  { %5668 = verf.f32 %v2185_v58  ;;  %v2186_v31 = vmul.f32 0.70710677, %v2160_v36  ;;  %v2180_v20 = vmul.f32 0.5, %v2160_v36 }
0x10dc   :  { %5670 = verf.f32 %v2186_v31 }
0x10df   :  { %v2164_v43 = vpop.f32.mrb[48].mxu0 }
0x10e0   :  { %v2165_v32 = vadd.f32 %v4655_v55, %v2164_v43  ;;  %v5137_v62 = vpop.f32.mrb[49].mxu0 }
0x10e1   :  { %v2167_v60 = vpop.f32.mrb[50].mxu0 }
0x10e2   :  { %v2187_v35 = vmul.f32 0.70710677, %v2165_v32  ;;  %v2168_v7 = vadd.f32 %v4655_v55, %v2167_v60  ;;  %v5138_v16 = vpop.f32.mrb[51].mxu0  ;;  %v2181_v15 = vmul.f32 0.5, %v2165_v32 }
0x10e4   :  { %v5669_v4 = vpop.eup %5668  ;;  %5672 = verf.f32 %v2187_v35  ;;  %v2188_v17 = vmul.f32 0.70710677, %v2168_v7  ;;  %v2182_v8 = vmul.f32 0.5, %v2168_v7 }
0x10e5   :  { %v2197_v12 = vadd.f32 1.0, %v5669_v4 }
0x10e6   :  { %v5671_v22 = vpop.eup %5670  ;;  %5674 = verf.f32 %v2188_v17 }
0x10e7   :  { %v2198_v14 = vadd.f32 1.0, %v5671_v22  ;;  %v2172_v59 = vpop.f32.mrb[52].mxu0  ;;  %v2203_v61 = vmul.f32 %v2197_v12, %v2179_v25 }
0x10e8   :  { %v2173_v42 = vadd.f32 %v4655_v55, %v2172_v59  ;;  %v5141_v51 = vpop.f32.mrb[53].mxu0 }
0x10e9   :  { %v2204_v19 = vmul.f32 %v2198_v14, %v2180_v20  ;;  %v2175_v18 = vpop.f32.mrb[54].mxu0 }
0x10ea   :  { %v2189_v50 = vmul.f32 0.70710677, %v2173_v42  ;;  %v2176_v47 = vadd.f32 %v4655_v55, %v2175_v18  ;;  %v5142_v63 = vpop.f32.mrb[55].mxu0  ;;  %v2183_v10 = vmul.f32 0.5, %v2173_v42 }
0x10eb   :  { %v2209_v52 = vpack.c.bf16 %v2204_v19, %v2203_v61 }
0x10ec   :  { %5676 = verf.f32 %v2189_v50  ;;  %v2190_v48 = vmul.f32 0.70710677, %v2176_v47  ;;  %v2184_v13 = vmul.f32 0.5, %v2176_v47 }
0x10ed   :  { %5152 = vmatmul.mubr.msk.bf16.vlgmr.msra.gmra.mrb[56].mxu1 %vm118_vm1, %v2209_v52 }
0x10ee   :  { %v5673_v5 = vpop.eup %5672  ;;  %5678 = verf.f32 %v2190_v48  ;;  %5155 = vmatprep.mubr.msk.bf16.mxu1 %vm5839_vm0, %v5838_v1 }
0x10ef   :  { %v2199_v53 = vadd.f32 1.0, %v5673_v5 }
0x10f0   :  { %v5675_v11 = vpop.eup %5674 }
0x10f1   :  { %v2200_v28 = vadd.f32 1.0, %v5675_v11  ;;  %v2205_v2 = vmul.f32 %v2199_v53, %v2181_v15 }
0x10f3   :  { %v2206_v29 = vmul.f32 %v2200_v28, %v2182_v8 }
0x10f5   :  { %v2210_v46 = vpack.c.bf16 %v2206_v29, %v2205_v2 }
0x10f6   :  { %v5677_v3 = vpop.eup %5676 }
0x10f7   :  { %v2201_v30 = vadd.f32 1.0, %v5677_v3  ;;  %5156 = vmatmul.mubr.msk.bf16.gmra.mrb[60].mxu1 %vm118_vm1, %v2210_v46 }
0x10f8   :  { %v5679_v21 = vpop.eup %5678  ;;  %5159 = vmatprep.mubr.msk.bf16.mxu1 %vm5839_vm0, %v5838_v1 }
0x10f9   :  { %v2202_v34 = vadd.f32 1.0, %v5679_v21  ;;  %v2207_v37 = vmul.f32 %v2201_v30, %v2183_v10 }
0x10fb   :  { %v2208_v9 = vmul.f32 %v2202_v34, %v2184_v13 }
0x10fd   :  { %v2211_v33 = vpack.c.bf16 %v2208_v9, %v2207_v37 }
0x10ff   :  { %5160 = vmatmul.mubr.msk.bf16.gmra.mrb[64].mxu1 %vm118_vm1, %v2211_v33 }
0x11c0   :  { %v2294_v44 = vpop.f32.mrb[56].mxu1 }
0x11c1   :  { %v2295_v49 = vadd.f32 %v4661_v41, %v2294_v44  ;;  %v5153_v55 = vpop.f32.mrb[57].mxu1  ;;  %v5537_v44 = vld [vmem:[%s7263_s7 + $0x18] sm:$0xff]  }
0x11c2   :  { %v2297_v0 = vpop.f32.mrb[58].mxu1 }
0x11c3   :  { %v6654_v6 = vadd.f32 %v2295_v49, %v6546_v45  ;;  %v2298_v57 = vadd.f32 %v4661_v41, %v2297_v0  ;;  %v5154_v56 = vpop.f32.mrb[59].mxu1 }
0x11c5   :  { %v6657_v58 = vadd.f32 %v2298_v57, %v6549_v38  ;;  %v2327_v36 = vsel %vm225_vm2, %v6654_v6, 0.0 }
0x11c6   :  { %2328 = vadd.xlane.f32.xlu1 %v2327_v36 }
0x11c7   :  { %v2330_v24 = vsel %vm225_vm2, %v6657_v58, 0.0 }
0x11c8   :  { %2331 = vadd.xlane.f32.xlu0 %v2330_v24 }
0x11ca   :  { %v2302_v31 = vpop.f32.mrb[60].mxu1 }
0x11cb   :  { %v2303_v43 = vadd.f32 %v4661_v41, %v2302_v31  ;;  %v5157_v32 = vpop.f32.mrb[61].mxu1 }
0x11cc   :  { %v2305_v62 = vpop.f32.mrb[62].mxu1 }
0x11cd   :  { %v6664_v45 = vadd.f32 %v2303_v43, %v6556_v23  ;;  %v2306_v60 = vadd.f32 %v4661_v41, %v2305_v62  ;;  %v5158_v35 = vpop.f32.mrb[63].mxu1 }
0x11ce   :  { %v4671_v35 = vld [vmem:[%s7309_s23 + $0x1] ss:$0 sm:$0xff] }
0x11cf   :  { %v6667_v38 = vadd.f32 %v2306_v60, %v6559_v27  ;;  %v2333_v7 = vsel %vm225_vm2, %v6664_v45, 0.0 }
0x11d0   :  { %2334 = vadd.xlane.f32.xlu1 %v2333_v7 }
0x11d1   :  { %v2336_v16 = vsel %vm225_vm2, %v6667_v38, 0.0 }
0x11d2   :  { %2337 = vadd.xlane.f32.xlu0 %v2336_v16  ;;  %v2310_v4 = vpop.f32.mrb[64].mxu1 }
0x11d3   :  { %v2311_v17 = vadd.f32 %v4661_v41, %v2310_v4  ;;  %v5161_v12 = vpop.f32.mrb[65].mxu1 }
0x11d4   :  { %v2313_v22 = vpop.f32.mrb[66].mxu1 }
0x11d5   :  { %v6674_v23 = vadd.f32 %v2311_v17, %v6566_v39  ;;  %v2314_v25 = vadd.f32 %v4661_v41, %v2313_v22  ;;  %v5162_v20 = vpop.f32.mrb[67].mxu1  ;;  %v5536_v41 = vld [vmem:[%s7263_s7 + $0x10] sm:$0xff]  }
0x11d6   :  { %5164 = vmatpush3.bf16.msra.mxu0 %v5536_v41 }
0x11d7   :  { %v6677_v27 = vadd.f32 %v2314_v25, %v6569_v40  ;;  %v2339_v14 = vsel %vm225_vm2, %v6674_v23, 0.0  ;;  %5165 = vmatprep.subr.bf16.mxu0 %v5838_v1  ;;  %v4672_v25 = vld [vmem:[%s7262_s6 + $0x1] ss:$0 sm:$0xff] }
0x11d8   :  { %2340 = vadd.xlane.f32.xlu1 %v2339_v14 }
0x11d9   :  { %v2342_v59 = vsel %vm225_vm2, %v6677_v27, 0.0 }
0x11da   :  { %2343 = vadd.xlane.f32.xlu0 %v2342_v59  ;;  %5166 = vmatpush3.bf16.msra.mxu0 %v5537_v44 }
0x1253   :  { %v2329_v42 = vpop.xlane.xlu1 %2328 }
0x1254   :  { %v2345_v51 = vmul.f32 0.03125, %v2329_v42 }
0x1255   :  { %v2332_v61 = vpop.xlane.xlu0 %2331 }
0x1256   :  { %v2351_v19 = vsub.f32 %v6654_v6, %v2345_v51  ;;  %v2346_v39 = vmul.f32 0.03125, %v2332_v61 }
0x1258   :  { %v2352_v18 = vsub.f32 %v6657_v58, %v2346_v39  ;;  %v2357_v50 = vmul.f32 %v2351_v19, %v2351_v19 }
0x125a   :  { %v2363_v40 = vsel %vm225_vm2, %v2357_v50, 0.0  ;;  %v2358_v47 = vmul.f32 %v2352_v18, %v2352_v18 }
0x125b   :  { %2364 = vadd.xlane.f32.xlu1 %v2363_v40 }
0x125c   :  { %v2366_v63 = vsel %vm225_vm2, %v2358_v47, 0.0 }
0x125d   :  { %v2335_v52 = vpop.xlane.xlu1 %2334  ;;  %2367 = vadd.xlane.f32.xlu0 %v2366_v63 }
0x125e   :  { %v2347_v48 = vmul.f32 0.03125, %v2335_v52 }
0x125f   :  { %v2338_v5 = vpop.xlane.xlu0 %2337 }
0x1260   :  { %v6688_v53 = vsub.f32 %v6664_v45, %v2347_v48  ;;  %v2348_v11 = vmul.f32 0.03125, %v2338_v5 }
0x1262   :  { %v6691_v15 = vsub.f32 %v6667_v38, %v2348_v11  ;;  %v2359_v8 = vmul.f32 %v6688_v53, %v6688_v53 }
0x1264   :  { %v2369_v28 = vsel %vm225_vm2, %v2359_v8, 0.0  ;;  %v2360_v2 = vmul.f32 %v6691_v15, %v6691_v15 }
0x1265   :  { %2370 = vadd.xlane.f32.xlu1 %v2369_v28  ;;  %v2341_v29 = vpop.xlane.xlu1 %2340 }
0x1266   :  { %v2349_v46 = vmul.f32 0.03125, %v2341_v29  ;;  %v2372_v3 = vsel %vm225_vm2, %v2360_v2, 0.0 }
0x1267   :  { %2373 = vadd.xlane.f32.xlu0 %v2372_v3  ;;  %v2344_v30 = vpop.xlane.xlu0 %2343 }
0x1268   :  { %v2355_v21 = vsub.f32 %v6674_v23, %v2349_v46  ;;  %v2350_v10 = vmul.f32 0.03125, %v2344_v30 }
0x126a   :  { %v2356_v13 = vsub.f32 %v6677_v27, %v2350_v10  ;;  %v2361_v34 = vmul.f32 %v2355_v21, %v2355_v21 }
0x126c   :  { %v2375_v37 = vsel %vm225_vm2, %v2361_v34, 0.0  ;;  %v2362_v9 = vmul.f32 %v2356_v13, %v2356_v13 }
0x126d   :  { %2376 = vadd.xlane.f32.xlu1 %v2375_v37 }
0x126e   :  { %v2378_v33 = vsel %vm225_vm2, %v2362_v9, 0.0 }
0x126f   :  { %2379 = vadd.xlane.f32.xlu0 %v2378_v33 }
0x12e8   :  { %v2365_v49 = vpop.xlane.xlu1 %2364 }
0x12e9   :  { %v2381_v55 = vmul.f32 0.03125, %v2365_v49 }
0x12ea   :  { %v2368_v0 = vpop.xlane.xlu0 %2367 }
0x12eb   :  { %v2387_v57 = vadd.f32 1e-05, %v2381_v55  ;;  %v2382_v56 = vmul.f32 0.03125, %v2368_v0 }
0x12ed   :  { %5680 = vrsqrt.f32 %v2387_v57  ;;  %v2388_v36 = vadd.f32 1e-05, %v2382_v56 }
0x12ef   :  { %5682 = vrsqrt.f32 %v2388_v36 }
0x12f2   :  { %v2371_v24 = vpop.xlane.xlu1 %2370 }
0x12f3   :  { %v2383_v31 = vmul.f32 0.03125, %v2371_v24 }
0x12f4   :  { %v2374_v43 = vpop.xlane.xlu0 %2373 }
0x12f5   :  { %v2389_v32 = vadd.f32 1e-05, %v2383_v31  ;;  %v2384_v62 = vmul.f32 0.03125, %v2374_v43 }
0x12f7   :  { %v5681_v60 = vpop.eup %5680  ;;  %5684 = vrsqrt.f32 %v2389_v32  ;;  %v2390_v7 = vadd.f32 1e-05, %v2384_v62 }
0x12f8   :  { %v2399_v16 = vmul.f32 %v5681_v60, %v2351_v19 }
0x12f9   :  { %v5683_v4 = vpop.eup %5682  ;;  %5686 = vrsqrt.f32 %v2390_v7 }
0x12fa   :  { %v2411_v17 = vmul.f32 %v4671_v35, %v2399_v16  ;;  %v2400_v12 = vmul.f32 %v5683_v4, %v2352_v18  ;;  %v2377_v22 = vpop.xlane.xlu1 %2376 }
0x12fb   :  { %v2385_v20 = vmul.f32 0.03125, %v2377_v22 }
0x12fc   :  { %v2412_v14 = vmul.f32 %v4671_v35, %v2400_v12  ;;  %v2380_v59 = vpop.xlane.xlu0 %2379  ;;  %v2423_v61 = vadd.f32 %v4672_v25, %v2411_v17 }
0x12fd   :  { %v2391_v42 = vadd.f32 1e-05, %v2385_v20  ;;  %v2386_v51 = vmul.f32 0.03125, %v2380_v59 }
0x12fe   :  { %v2424_v39 = vadd.f32 %v4672_v25, %v2412_v14 }
0x12ff   :  { %5688 = vrsqrt.f32 %v2391_v42  ;;  %v2392_v50 = vadd.f32 1e-05, %v2386_v51 }
0x1300   :  { %v2443_v40 = vpack.c.bf16 %v2424_v39, %v2423_v61 }
0x1301   :  { %v5685_v19 = vpop.eup %5684  ;;  %5690 = vrsqrt.f32 %v2392_v50 }
0x1302   :  { %5168 = vmatmul.mubr.msk.bf16.vlgmr.msra.gmra.mrb[56].mxu0 %vm225_vm2, %v2443_v40  ;;  %v2401_v18 = vmul.f32 %v5685_v19, %v6688_v53 }
0x1303   :  { %v5687_v47 = vpop.eup %5686  ;;  %5171 = vmatprep.mubr.msk.bf16.mxu0 %vm5839_vm0, %v5838_v1 }
0x1304   :  { %v2402_v63 = vmul.f32 %v5687_v47, %v6691_v15  ;;  %v2413_v52 = vmul.f32 %v4671_v35, %v2401_v18  ;;  %v4683_v15 = vld [vmem:[%s7264_s8 + $0x1] ss:$0 sm:$0xff]  ;;  %s7310_s8 = smov 112  }
0x1306   :  { %v2414_v48 = vmul.f32 %v4671_v35, %v2402_v63  ;;  %v2425_v5 = vadd.f32 %v4672_v25, %v2413_v52 }
0x1308   :  { %v2426_v11 = vadd.f32 %v4672_v25, %v2414_v48 }
0x1309   :  { %v5689_v8 = vpop.eup %5688 }
0x130a   :  { %v2444_v28 = vpack.c.bf16 %v2426_v11, %v2425_v5  ;;  %v2403_v2 = vmul.f32 %v5689_v8, %v2355_v21 }
0x130b   :  { %v5691_v29 = vpop.eup %5690 }
0x130c   :  { %5172 = vmatmul.mubr.msk.bf16.gmra.mrb[60].mxu0 %vm225_vm2, %v2444_v28  ;;  %v2404_v46 = vmul.f32 %v5691_v29, %v2356_v13  ;;  %v2415_v3 = vmul.f32 %v4671_v35, %v2403_v2 }
0x130d   :  { %5175 = vmatprep.mubr.msk.bf16.mxu0 %vm5839_vm0, %v5838_v1 }
0x130e   :  { %v2416_v53 = vmul.f32 %v4671_v35, %v2404_v46  ;;  %v2427_v30 = vadd.f32 %v4672_v25, %v2415_v3 }
0x1310   :  { %v2428_v10 = vadd.f32 %v4672_v25, %v2416_v53 }
0x1312   :  { %v2445_v34 = vpack.c.bf16 %v2428_v10, %v2427_v30 }
0x1314   :  { %5176 = vmatmul.mubr.msk.bf16.gmra.mrb[64].mxu0 %vm225_vm2, %v2445_v34 }
0x13d5   :  { %v2507_v37 = vpop.f32.mrb[56].mxu0 }
0x13d6   :  { %v5169_v21 = vpop.f32.mrb[57].mxu0  ;;  %v2508_v33 = vadd.f32 %v4683_v15, %v2507_v37 }
0x13d7   :  { %v2510_v9 = vpop.f32.mrb[58].mxu0 }
0x13d8   :  { %v2511_v41 = vadd.f32 %v4683_v15, %v2510_v9  ;;  %v5170_v13 = vpop.f32.mrb[59].mxu0 }
0x13da   :  { %v6728_v44 = vpack.c.bf16 %v2511_v41, %v2508_v33 }
0x13dc   :  { %2536 = vrot.lane.b32.xlu1 %v6728_v44, %s5840_s25  ;;  %5183 = vmatprep.mubr.msk.bf16.mxu1 %vm436_vm4, %v6728_v44 }
0x13df   :  { %v2515_v49 = vpop.f32.mrb[60].mxu0 }
0x13e0   :  { %v2516_v55 = vadd.f32 %v4683_v15, %v2515_v49  ;;  %v5173_v0 = vpop.f32.mrb[61].mxu0 }
0x13e1   :  { %v2518_v57 = vpop.f32.mrb[62].mxu0 }
0x13e2   :  { %v6734_v56 = vpack.c.bf16 %v2516_v55, %v2516_v55  ;;  %v5174_v36 = vpop.f32.mrb[63].mxu0  ;;  %v2519_v31 = vadd.f32 %v4683_v15, %v2518_v57 }
0x13e4   :  { %2538 = vrot.lane.b32.xlu0 %v6734_v56, %s5840_s25 }
0x13e7   :  { %v2523_v24 = vpop.f32.mrb[64].mxu0 }
0x13e8   :  { %v2524_v43 = vadd.f32 %v4683_v15, %v2523_v24  ;;  %v5177_v32 = vpop.f32.mrb[65].mxu0 }
0x13e9   :  { %v2526_v62 = vpop.f32.mrb[66].mxu0 }
0x13ea   :  { %v6738_v60 = vpack.c.bf16 %v2524_v43, %v2519_v31  ;;  %v2527_v35 = vadd.f32 %v4683_v15, %v2526_v62  ;;  %v5178_v7 = vpop.f32.mrb[67].mxu0 }
0x13ec   :  { %2602 = vrot.lane.b32.xlu1 %v6738_v60, %s5840_s25  ;;  %5191 = vmatprep.mubr.msk.bf16.mxu0 %vm436_vm4, %v6738_v60  ;;  %v6744_v16 = vpack.c.bf16 %v2527_v35, %v2527_v35 }
0x13f0   :  { %2604 = vrot.lane.b32.xlu1 %v6744_v16, %s5840_s25  ;;  %s7311_s25 = smov 48  }
0x144e   :  { %v2537_v4 = vpop.permute.xlu1 %2536 }
0x144f   :  { %5391 = vmatprep.subr.msk.bf16.mxu1 %vm436_vm4, %v2537_v4  ;;  %v2547_v17 = vsel %vm436_vm4, %v2537_v4, 0 }
0x1450   :  { %5180 = vmatpush3.bf16.xpose.msra.mxu1 %v2547_v17 }
0x1456   :  { %v2539_v12 = vpop.permute.xlu0 %2538 }
0x1457   :  { %5392 = vmatprep.subr.msk.bf16.mxu1 %vm436_vm4, %v2539_v12  ;;  %v2550_v22 = vsel %vm436_vm4, %v2539_v12, 0 }
0x1458   :  { %5182 = vmatpush3.bf16.xpose.msra.mxu1 %v2550_v22 }
0x145e   :  { %v2603_v25 = vpop.permute.xlu1 %2602 }
0x145f   :  { %5184 = vmatmul.mubr.msk.bf16.vlgmr.msra.gmra.mrb[68].mxu1 %vm436_vm4, %v6734_v56  ;;  %5393 = vmatprep.subr.msk.bf16.mxu0 %vm436_vm4, %v2603_v25  ;;  %v2613_v20 = vsel %vm436_vm4, %v2603_v25, 0 }
0x1460   :  { %5188 = vmatpush3.bf16.xpose.msra.mxu0 %v2613_v20 }
0x1462   :  { %v2605_v14 = vpop.permute.xlu1 %2604 }
0x1463   :  { %5394 = vmatprep.subr.msk.bf16.mxu0 %vm436_vm4, %v2605_v14  ;;  %v2616_v59 = vsel %vm436_vm4, %v2605_v14, 0 }
0x1468   :  { %5190 = vmatpush3.bf16.xpose.msra.mxu0 %v2616_v59 }
0x146f   :  { %5192 = vmatmul.mubr.msk.bf16.vlgmr.msra.gmra.mrb[68].mxu0 %vm436_vm4, %v6744_v16 }
0x1532   :  { %v5185_v42 = vpop.f32.mrb[68].mxu1 }
0x1533   :  { %v2586_v51 = vpop.f32.mrb[69].mxu1  ;;  %v2668_v40 = vmul.f32 0.35355338, %v5185_v42 }
0x1534   :  { %v2666_v61 = vmul.f32 0.35355338, %v2586_v51  ;;  %v5186_v39 = vpop.f32.mrb[70].mxu1 }
0x1535   :  { %v2589_v50 = vpop.f32.mrb[71].mxu1  ;;  %v2674_v48 = vsel %vm222_vm5, %v2668_v40, -1e+30 }
0x1536   :  { %v2672_v19 = vsel %vm222_vm5, %v2666_v61, -1e+30  ;;  %v2667_v18 = vmul.f32 0.35355338, %v2589_v50  ;;  %v2684_v5 = vsel %vm577_vm6, %v2674_v48, -inf }
0x1537   :  { %v2678_v47 = vsel %vm577_vm6, %v2672_v19, -inf }
0x1538   :  { %v2673_v63 = vsel %vm222_vm5, %v2667_v18, -1e+30  ;;  %2679 = vmax.xlane.f32.xlu1 %v2678_v47 }
0x1539   :  { %v2681_v52 = vsel %vm577_vm6, %v2673_v63, -inf }
0x153a   :  { %2682 = vmax.xlane.f32.xlu0 %v2681_v52 }
0x153e   :  { %2685 = vmax.xlane.f32.xlu0 %v2684_v5 }
0x1542   :  { %v5193_v11 = vpop.f32.mrb[68].mxu0 }
0x1543   :  { %v2652_v8 = vpop.f32.mrb[69].mxu0  ;;  %v2671_v28 = vmul.f32 0.35355338, %v5193_v11 }
0x1544   :  { %v2669_v2 = vmul.f32 0.35355338, %v2652_v8  ;;  %v5194_v29 = vpop.f32.mrb[70].mxu0 }
0x1545   :  { %v2655_v46 = vpop.f32.mrb[71].mxu0  ;;  %v2677_v30 = vsel %vm222_vm5, %v2671_v28, -1e+30 }
0x1546   :  { %v2675_v3 = vsel %vm222_vm5, %v2669_v2, -1e+30  ;;  %v2693_v10 = vsel %vm577_vm6, %v2677_v30, -inf  ;;  %v2670_v34 = vmul.f32 0.35355338, %v2655_v46 }
0x1547   :  { %v2687_v53 = vsel %vm577_vm6, %v2675_v3, -inf }
0x1548   :  { %2688 = vmax.xlane.f32.xlu0 %v2687_v53  ;;  %v2676_v15 = vsel %vm222_vm5, %v2670_v34, -1e+30 }
0x1549   :  { %2748 = vrot.lane.b32.xlu1 %v6728_v44, %s5841_s27  ;;  %v2690_v37 = vsel %vm577_vm6, %v2676_v15, -inf }
0x154c   :  { %2694 = vmax.xlane.f32.xlu0 %v2693_v10 }
0x154d   :  { %2810 = vrot.lane.b32.xlu1 %v6738_v60, %s5841_s27 }
0x1551   :  { %2876 = vrot.lane.b32.xlu1 %v6728_v44, %s5842_s26 }
0x1562   :  { %2750 = vrot.lane.b32.xlu0 %v6734_v56, %s5841_s27 }
0x1575   :  { %2691 = vmax.xlane.f32.xlu1 %v2690_v37 }
0x1586   :  { %2812 = vrot.lane.b32.xlu1 %v6744_v16, %s5841_s27  ;;  %s7312_s27 = smov 72  }
0x15c5   :  { %v2680_v21 = vpop.xlane.xlu1 %2679 }
0x15c6   :  { %v2696_v13 = vsub.f32 %v2672_v19, %v2680_v21 }
0x15c7   :  { %v2683_v9 = vpop.xlane.xlu0 %2682 }
0x15c8   :  { %v2697_v33 = vsub.f32 %v2673_v63, %v2683_v9  ;;  %v2702_v36 = vmul.f32 1.442695, %v2696_v13 }
0x15c9   :  { %v2749_v41 = vpop.permute.xlu1 %2748 }
0x15ca   :  { %v2704_v49 = vmul.f32 1.442695, %v2697_v33  ;;  %5195 = vmatprep.subr.bf16.mxu1 %v2749_v41 }
0x15cb   :  { %5196 = vmatpush3.bf16.msra.mxu1 %v2749_v41  ;;  %v2686_v55 = vpop.xlane.xlu0 %2685 }
0x15cc   :  { %5692 = vpow2.f32 %v2704_v49  ;;  %v2698_v0 = vsub.f32 %v2674_v48, %v2686_v55 }
0x15cd   :  { %v2811_v57 = vpop.permute.xlu1 %2810 }
0x15ce   :  { %v2706_v24 = vmul.f32 1.442695, %v2698_v0  ;;  %5203 = vmatprep.subr.bf16.mxu0 %v2811_v57 }
0x15cf   :  { %5204 = vmatpush3.bf16.msra.mxu0 %v2811_v57 }
0x15d0   :  { %5694 = vpow2.f32 %v2706_v24 }
0x15d1   :  { %5696 = vpow2.f32 %v2702_v36  ;;  %v2877_v59 = vpop.permute.xlu1 %2876 }
0x15d2   :  { %v2887_v21 = vsel %vm436_vm4, %v2877_v59, 0 }
0x15d5   :  { %v2689_v31 = vpop.xlane.xlu0 %2688 }
0x15d6   :  { %v5693_v43 = vpop.eup %5692  ;;  %v2699_v62 = vsub.f32 %v2675_v3, %v2689_v31 }
0x15d7   :  { %v2717_v32 = vsel %vm577_vm6, %v5693_v43, 0.0 }
0x15d8   :  { %2718 = vadd.xlane.f32.xlu0 %v2717_v32  ;;  %v2708_v22 = vmul.f32 1.442695, %v2699_v62 }
0x15d9   :  { %v2695_v35 = vpop.xlane.xlu0 %2694 }
0x15da   :  { %v5695_v7 = vpop.eup %5694  ;;  %v2701_v4 = vsub.f32 %v2677_v30, %v2695_v35 }
0x15db   :  { %v2720_v17 = vsel %vm577_vm6, %v5695_v7, 0.0  ;;  %v5697_v12 = vpop.eup %5696 }
0x15dc   :  { %v2712_v25 = vmul.f32 1.442695, %v2701_v4  ;;  %2721 = vadd.xlane.f32.xlu1 %v2720_v17  ;;  %v2714_v42 = vsel %vm577_vm6, %v5697_v12, 0.0 }
0x15dd   :  { %v2751_v20 = vpop.permute.xlu0 %2750 }
0x15de   :  { %5698 = vpow2.f32 %v2712_v25  ;;  %5395 = vmatprep.subr.msk.bf16.mxu1 %vm659_vm7, %v2751_v20  ;;  %v2760_v14 = vsel %vm659_vm7, %v2751_v20, 0 }
0x15df   :  { %5198 = vmatpush3.bf16.msra.mxu1 %v2760_v14  ;;  %5700 = vpow2.f32 %v2708_v22 }
0x15e0   :  { %2715 = vadd.xlane.f32.xlu1 %v2714_v42  ;;  %5397 = vmatprep.subr.msk.bf16.mxu1 %vm436_vm4, %v2877_v59 }
0x15e8   :  { %v5699_v51 = vpop.eup %5698 }
0x15e9   :  { %v2729_v61 = vsel %vm577_vm6, %v5699_v51, 0.0  ;;  %v5701_v39 = vpop.eup %5700 }
0x15ea   :  { %2730 = vadd.xlane.f32.xlu0 %v2729_v61  ;;  %v2723_v50 = vsel %vm577_vm6, %v5701_v39, 0.0 }
0x15ee   :  { %2724 = vadd.xlane.f32.xlu0 %v2723_v50 }
0x15f1   :  { %2944 = vrot.lane.b32.xlu1 %v6738_v60, %s5842_s26 }
0x1602   :  { %v2692_v40 = vpop.xlane.xlu1 %2691 }
0x1603   :  { %v2700_v19 = vsub.f32 %v2676_v15, %v2692_v40 }
0x1604   :  { %2878 = vrot.lane.b32.xlu0 %v6734_v56, %s5842_s26 }
0x1605   :  { %v2710_v18 = vmul.f32 1.442695, %v2700_v19 }
0x1606   :  { %v2813_v47 = vpop.permute.xlu1 %2812 }
0x1607   :  { %5702 = vpow2.f32 %v2710_v18  ;;  %5396 = vmatprep.subr.msk.bf16.mxu0 %vm659_vm7, %v2813_v47  ;;  %v2822_v63 = vsel %vm659_vm7, %v2813_v47, 0 }
0x1608   :  { %5206 = vmatpush3.bf16.msra.mxu0 %v2822_v63  ;;  %2872 = vrot.lane.b32.xlu0 %v6728_v44, %s5843_s3 }
0x160c   :  { %2946 = vrot.lane.b32.xlu0 %v6744_v16, %s5842_s26  ;;  %s7313_s26 = smov 104  }
0x1610   :  { %2942 = vrot.lane.b32.xlu0 %v6744_v16, %s5843_s3 }
0x1611   :  { %v5703_v52 = vpop.eup %5702 }
0x1612   :  { %v2726_v48 = vsel %vm577_vm6, %v5703_v52, 0.0 }
0x1615   :  { %2727 = vadd.xlane.f32.xlu1 %v2726_v48 }
0x1626   :  { %2874 = vrot.lane.b32.xlu1 %v6734_v56, %s5843_s3 }
0x162a   :  { %2940 = vrot.lane.b32.xlu1 %v6738_v60, %s5843_s3  ;;  %s7314_s3 = smov 40  }
0x1665   :  { %v2719_v5 = vpop.xlane.xlu0 %2718 }
0x1669   :  { %v2722_v11 = vpop.xlane.xlu1 %2721 }
0x166a   :  { %5704 = vrcp.f32 %v2722_v11 }
0x166b   :  { %5706 = vrcp.f32 %v2719_v5 }
0x166d   :  { %v2716_v8 = vpop.xlane.xlu1 %2715 }
0x166e   :  { %5708 = vrcp.f32 %v2716_v8 }
0x1671   :  { %v2945_v28 = vpop.permute.xlu1 %2944 }
0x1672   :  { %5399 = vmatprep.subr.msk.bf16.mxu0 %vm436_vm4, %v2945_v28  ;;  %v2955_v62 = vsel %vm436_vm4, %v2945_v28, 0 }
0x1674   :  { %v5705_v2 = vpop.eup %5704 }
0x1675   :  { %v5707_v29 = vpop.eup %5706  ;;  %v2740_v53 = vmul.f32 %v5705_v2, %v5695_v7 }
0x1676   :  { %v2739_v10 = vmul.f32 %v5707_v29, %v5693_v43 }
0x1677   :  { %v2731_v46 = vpop.xlane.xlu0 %2730  ;;  %v2745_v37 = vpack.c.bf16 %v2740_v53, %v2740_v53 }
0x1678   :  { %v5709_v3 = vpop.eup %5708  ;;  %5710 = vrcp.f32 %v2731_v46 }
0x1679   :  { %v2738_v30 = vmul.f32 %v5709_v3, %v5697_v12 }
0x167b   :  { %v2725_v34 = vpop.xlane.xlu0 %2724  ;;  %v2744_v15 = vpack.c.bf16 %v2739_v10, %v2738_v30 }
0x167c   :  { %5712 = vrcp.f32 %v2725_v34 }
0x167d   :  { %5199 = vmatprep.mubr.msk.bf16.mxu1 %vm577_vm6, %v2744_v15 }
0x167e   :  { %5200 = vmatmul.mubr.msk.bf16.vlgmr.msra.gmra.mrb[72].mxu1 %vm577_vm6, %v2745_v37 }
0x167f   :  { %5212 = vmatpush3.bf16.xpose.msra.mxu1 %v2887_v21  ;;  %v2879_v9 = vpop.permute.xlu0 %2878 }
0x1680   :  { %5398 = vmatprep.subr.msk.bf16.mxu1 %vm436_vm4, %v2879_v9  ;;  %v2890_v41 = vsel %vm436_vm4, %v2879_v9, 0 }
0x1682   :  { %v5711_v55 = vpop.eup %5710 }
0x1683   :  { %v2873_v33 = vpop.permute.xlu0 %2872  ;;  %v2743_v36 = vmul.f32 %v5711_v55, %v5699_v51 }
0x1684   :  { %5215 = vmatprep.mubr.msk.bf16.mxu1 %vm436_vm4, %v2873_v33 }
0x1685   :  { %v2747_v32 = vpack.c.bf16 %v2743_v36, %v2743_v36 }
0x1686   :  { %v5713_v0 = vpop.eup %5712 }
0x1687   :  { %5214 = vmatpush3.bf16.xpose.msra.mxu1 %v2890_v41  ;;  %v2741_v24 = vmul.f32 %v5713_v0, %v5701_v39  ;;  %v2947_v7 = vpop.permute.xlu0 %2946 }
0x1688   :  { %v2958_v4 = vsel %vm436_vm4, %v2947_v7, 0 }
0x168b   :  { %v2943_v17 = vpop.permute.xlu0 %2942 }
0x16a2   :  { %v2728_v13 = vpop.xlane.xlu1 %2727 }
0x16a3   :  { %5714 = vrcp.f32 %v2728_v13 }
0x16a6   :  { %v2875_v49 = vpop.permute.xlu1 %2874 }
0x16a7   :  { %5216 = vmatmul.mubr.msk.bf16.vlgmr.msra.gmra.mrb[76].mxu1 %vm436_vm4, %v2875_v49 }
0x16aa   :  { %v2941_v35 = vpop.permute.xlu1 %2940 }
0x16ad   :  { %v5715_v57 = vpop.eup %5714 }
0x16ae   :  { %v2742_v31 = vmul.f32 %v5715_v57, %v5703_v52 }
0x16b0   :  { %v2746_v43 = vpack.c.bf16 %v2742_v31, %v2741_v24 }
0x16b2   :  { %5207 = vmatprep.mubr.msk.bf16.mxu0 %vm577_vm6, %v2746_v43 }
0x16b3   :  { %5208 = vmatmul.mubr.msk.bf16.vlgmr.msra.gmra.mrb[72].mxu0 %vm577_vm6, %v2747_v32 }
0x16b4   :  { %5220 = vmatpush3.bf16.xpose.msra.mxu0 %v2955_v62  ;;  %5223 = vmatprep.mubr.msk.bf16.mxu0 %vm436_vm4, %v2941_v35 }
0x16b5   :  { %5400 = vmatprep.subr.msk.bf16.mxu0 %vm436_vm4, %v2947_v7 }
0x16bc   :  { %5222 = vmatpush3.bf16.xpose.msra.mxu0 %v2958_v4 }
0x16c3   :  { %5224 = vmatmul.mubr.msk.bf16.vlgmr.msra.gmra.mrb[76].mxu0 %vm436_vm4, %v2943_v17 }
0x1751   :  { %v6828_v12 = vpop.f32.mrb[72].mxu1 }
0x1752   :  { %v6830_v22 = vpop.f32.mrb[73].mxu1 }
0x1753   :  { %v5202_v25 = vpop.f32.mrb[74].mxu1 }
0x1754   :  { %v6832_v20 = vpop.f32.mrb[75].mxu1 }
0x177a   :  { %v5217_v14 = vpop.f32.mrb[76].mxu1 }
0x177b   :  { %v2926_v59 = vpop.f32.mrb[77].mxu1  ;;  %v3010_v39 = vmul.f32 0.35355338, %v5217_v14 }
0x177c   :  { %v3008_v42 = vmul.f32 0.35355338, %v2926_v59  ;;  %v5218_v51 = vpop.f32.mrb[78].mxu1 }
0x177d   :  { %v2929_v61 = vpop.f32.mrb[79].mxu1  ;;  %v3016_v63 = vsel %vm222_vm5, %v3010_v39, -1e+30 }
0x177e   :  { %v3014_v50 = vsel %vm222_vm5, %v3008_v42, -1e+30  ;;  %v3009_v40 = vmul.f32 0.35355338, %v2929_v61  ;;  %v3026_v52 = vsel %vm577_vm6, %v3016_v63, -inf }
0x177f   :  { %v3020_v19 = vsel %vm577_vm6, %v3014_v50, -inf }
0x1780   :  { %v3015_v18 = vsel %vm222_vm5, %v3009_v40, -1e+30  ;;  %3021 = vmax.xlane.f32.xlu1 %v3020_v19 }
0x1781   :  { %v3023_v47 = vsel %vm577_vm6, %v3015_v18, -inf }
0x1782   :  { %3024 = vmax.xlane.f32.xlu0 %v3023_v47 }
0x1786   :  { %v6843_v48 = vpop.f32.mrb[72].mxu0  ;;  %3027 = vmax.xlane.f32.xlu0 %v3026_v52 }
0x1787   :  { %v6845_v5 = vpop.f32.mrb[73].mxu0 }
0x1788   :  { %v5210_v11 = vpop.f32.mrb[74].mxu0 }
0x1789   :  { %v6847_v8 = vpop.f32.mrb[75].mxu0 }
0x1791   :  { %3090 = vrot.lane.b32.xlu1 %v6728_v44, %s5844_s28 }
0x1795   :  { %3152 = vrot.lane.b32.xlu1 %v6738_v60, %s5844_s28 }
0x1796   :  { %v5225_v28 = vpop.f32.mrb[76].mxu0 }
0x1797   :  { %v2994_v2 = vpop.f32.mrb[77].mxu0  ;;  %v3013_v29 = vmul.f32 0.35355338, %v5225_v28 }
0x1798   :  { %v3011_v46 = vmul.f32 0.35355338, %v2994_v2  ;;  %v5226_v3 = vpop.f32.mrb[78].mxu0 }
0x1799   :  { %v2997_v53 = vpop.f32.mrb[79].mxu0  ;;  %3218 = vrot.lane.b32.xlu1 %v6728_v44, %s5845_s29  ;;  %v3019_v34 = vsel %vm222_vm5, %v3013_v29, -1e+30 }
0x179a   :  { %v3017_v30 = vsel %vm222_vm5, %v3011_v46, -1e+30  ;;  %v3035_v15 = vsel %vm577_vm6, %v3019_v34, -inf  ;;  %v3012_v37 = vmul.f32 0.35355338, %v2997_v53 }
0x179b   :  { %v3029_v10 = vsel %vm577_vm6, %v3017_v30, -inf }
0x179c   :  { %3030 = vmax.xlane.f32.xlu0 %v3029_v10  ;;  %v3018_v21 = vsel %vm222_vm5, %v3012_v37, -1e+30 }
0x179d   :  { %v3032_v9 = vsel %vm577_vm6, %v3018_v21, -inf }
0x17a0   :  { %3036 = vmax.xlane.f32.xlu0 %v3035_v15 }
0x17b6   :  { %3092 = vrot.lane.b32.xlu0 %v6734_v56, %s5844_s28 }
0x17bd   :  { %3033 = vmax.xlane.f32.xlu1 %v3032_v9 }
0x17ce   :  { %3154 = vrot.lane.b32.xlu1 %v6744_v16, %s5844_s28  ;;  %s7315_s28 = smov 16  }
0x180d   :  { %v3022_v33 = vpop.xlane.xlu1 %3021 }
0x180e   :  { %v3038_v55 = vsub.f32 %v3014_v50, %v3022_v33 }
0x180f   :  { %v3025_v41 = vpop.xlane.xlu0 %3024 }
0x1810   :  { %v3039_v13 = vsub.f32 %v3015_v18, %v3025_v41  ;;  %v3044_v31 = vmul.f32 1.442695, %v3038_v55 }
0x1811   :  { %v3091_v49 = vpop.permute.xlu1 %3090 }
0x1812   :  { %v3046_v0 = vmul.f32 1.442695, %v3039_v13  ;;  %5227 = vmatprep.subr.bf16.mxu1 %v3091_v49 }
0x1813   :  { %5228 = vmatpush3.bf16.msra.mxu1 %v3091_v49  ;;  %v3028_v57 = vpop.xlane.xlu0 %3027 }
0x1814   :  { %5716 = vpow2.f32 %v3046_v0  ;;  %v3040_v36 = vsub.f32 %v3016_v63, %v3028_v57 }
0x1815   :  { %v3153_v24 = vpop.permute.xlu1 %3152 }
0x1816   :  { %v3048_v43 = vmul.f32 1.442695, %v3040_v36  ;;  %5235 = vmatprep.subr.bf16.mxu0 %v3153_v24 }
0x1817   :  { %5236 = vmatpush3.bf16.msra.mxu0 %v3153_v24 }
0x1818   :  { %5718 = vpow2.f32 %v3048_v43 }
0x1819   :  { %5720 = vpow2.f32 %v3044_v31  ;;  %v3219_v40 = vpop.permute.xlu1 %3218 }
0x181a   :  { %v3229_v55 = vsel %vm436_vm4, %v3219_v40, 0 }
0x181e   :  { %v5717_v32 = vpop.eup %5716 }
0x181f   :  { %v3059_v62 = vsel %vm577_vm6, %v5717_v32, 0.0 }
0x1820   :  { %3060 = vadd.xlane.f32.xlu0 %v3059_v62 }
0x1822   :  { %v5719_v35 = vpop.eup %5718 }
0x1823   :  { %v3062_v7 = vsel %vm577_vm6, %v5719_v35, 0.0  ;;  %v5721_v4 = vpop.eup %5720 }
0x1824   :  { %3063 = vadd.xlane.f32.xlu1 %v3062_v7  ;;  %v3056_v17 = vsel %vm577_vm6, %v5721_v4, 0.0 }
0x1828   :  { %3057 = vadd.xlane.f32.xlu1 %v3056_v17 }
0x1829   :  { %v3031_v25 = vpop.xlane.xlu0 %3030 }
0x182a   :  { %v3041_v14 = vsub.f32 %v3017_v30, %v3031_v25 }
0x182c   :  { %v3050_v51 = vmul.f32 1.442695, %v3041_v14 }
0x182d   :  { %v3037_v59 = vpop.xlane.xlu0 %3036 }
0x182e   :  { %v3043_v42 = vsub.f32 %v3019_v34, %v3037_v59 }
0x1830   :  { %v3054_v61 = vmul.f32 1.442695, %v3043_v42 }
0x1831   :  { %v3093_v39 = vpop.permute.xlu0 %3092 }
0x1832   :  { %5722 = vpow2.f32 %v3054_v61  ;;  %v3102_v50 = vsel %vm659_vm7, %v3093_v39, 0  ;;  %5401 = vmatprep.subr.msk.bf16.mxu1 %vm659_vm7, %v3093_v39 }
0x1833   :  { %5230 = vmatpush3.bf16.msra.mxu1 %v3102_v50  ;;  %5724 = vpow2.f32 %v3050_v51 }
0x1834   :  { %5403 = vmatprep.subr.msk.bf16.mxu1 %vm436_vm4, %v3219_v40 }
0x1839   :  { %3286 = vrot.lane.b32.xlu1 %v6738_v60, %s5845_s29 }
0x183c   :  { %v5723_v19 = vpop.eup %5722 }
0x183d   :  { %v3071_v18 = vsel %vm577_vm6, %v5723_v19, 0.0  ;;  %v5725_v47 = vpop.eup %5724 }
0x183e   :  { %3072 = vadd.xlane.f32.xlu0 %v3071_v18  ;;  %v3065_v63 = vsel %vm577_vm6, %v5725_v47, 0.0 }
0x1842   :  { %3066 = vadd.xlane.f32.xlu0 %v3065_v63 }
0x184a   :  { %v3034_v52 = vpop.xlane.xlu1 %3033 }
0x184b   :  { %v3042_v11 = vsub.f32 %v3018_v21, %v3034_v52 }
0x184d   :  { %v3052_v28 = vmul.f32 1.442695, %v3042_v11 }
0x184e   :  { %v3155_v2 = vpop.permute.xlu1 %3154 }
0x184f   :  { %5726 = vpow2.f32 %v3052_v28  ;;  %v3164_v29 = vsel %vm659_vm7, %v3155_v2, 0  ;;  %5402 = vmatprep.subr.msk.bf16.mxu0 %vm659_vm7, %v3155_v2 }
0x1850   :  { %5238 = vmatpush3.bf16.msra.mxu0 %v3164_v29 }
0x1858   :  { %3220 = vrot.lane.b32.xlu0 %v6734_v56, %s5845_s29 }
0x1859   :  { %v5727_v46 = vpop.eup %5726 }
0x185a   :  { %v3068_v3 = vsel %vm577_vm6, %v5727_v46, 0.0 }
0x185c   :  { %3214 = vrot.lane.b32.xlu0 %v6728_v44, %s7310_s8 }
0x185d   :  { %3069 = vadd.xlane.f32.xlu1 %v3068_v3 }
0x1860   :  { %3288 = vrot.lane.b32.xlu0 %v6744_v16, %s5845_s29  ;;  %s7316_s29 = smov 8  }
0x1864   :  { %3284 = vrot.lane.b32.xlu0 %v6744_v16, %s7310_s8 }
0x186e   :  { %3216 = vrot.lane.b32.xlu1 %v6734_v56, %s7310_s8 }
0x1872   :  { %3282 = vrot.lane.b32.xlu1 %v6738_v60, %s7310_s8 }
0x18ad   :  { %v3061_v53 = vpop.xlane.xlu0 %3060 }
0x18b1   :  { %v3064_v30 = vpop.xlane.xlu1 %3063 }
0x18b2   :  { %5728 = vrcp.f32 %v3064_v30 }
0x18b3   :  { %5730 = vrcp.f32 %v3061_v53 }
0x18b5   :  { %v3058_v10 = vpop.xlane.xlu1 %3057 }
0x18b6   :  { %5732 = vrcp.f32 %v3058_v10 }
0x18b9   :  { %v3287_v34 = vpop.permute.xlu1 %3286 }
0x18ba   :  { %5405 = vmatprep.subr.msk.bf16.mxu0 %vm436_vm4, %v3287_v34  ;;  %v3297_v42 = vsel %vm436_vm4, %v3287_v34, 0 }
0x18bc   :  { %v5729_v15 = vpop.eup %5728 }
0x18bd   :  { %v5731_v37 = vpop.eup %5730  ;;  %v3082_v9 = vmul.f32 %v5729_v15, %v5719_v35 }
0x18be   :  { %v3081_v41 = vmul.f32 %v5731_v37, %v5717_v32 }
0x18bf   :  { %v3087_v49 = vpack.c.bf16 %v3082_v9, %v3082_v9 }
0x18c0   :  { %v5733_v21 = vpop.eup %5732 }
0x18c1   :  { %v3080_v33 = vmul.f32 %v5733_v21, %v5721_v4 }
0x18c3   :  { %v3086_v13 = vpack.c.bf16 %v3081_v41, %v3080_v33 }
0x18c5   :  { %5231 = vmatprep.mubr.msk.bf16.mxu1 %vm577_vm6, %v3086_v13 }
0x18c6   :  { %5232 = vmatmul.mubr.msk.bf16.vlgmr.msra.gmra.mrb[80].mxu1 %vm577_vm6, %v3087_v49 }
0x18c7   :  { %5244 = vmatpush3.bf16.xpose.msra.mxu1 %v3229_v55 }
0x18cb   :  { %v3073_v0 = vpop.xlane.xlu0 %3072 }
0x18cc   :  { %5734 = vrcp.f32 %v3073_v0 }
0x18cf   :  { %v3067_v57 = vpop.xlane.xlu0 %3066 }
0x18d0   :  { %5736 = vrcp.f32 %v3067_v57 }
0x18d3   :  { %v3221_v36 = vpop.permute.xlu0 %3220 }
0x18d4   :  { %v3232_v24 = vsel %vm436_vm4, %v3221_v36, 0  ;;  %5404 = vmatprep.subr.msk.bf16.mxu1 %vm436_vm4, %v3221_v36 }
0x18d5   :  { %5246 = vmatpush3.bf16.xpose.msra.mxu1 %v3232_v24 }
0x18d6   :  { %v5735_v62 = vpop.eup %5734 }
0x18d7   :  { %v3215_v31 = vpop.permute.xlu0 %3214  ;;  %v3085_v4 = vmul.f32 %v5735_v62, %v5723_v19 }
0x18d8   :  { %5247 = vmatprep.mubr.msk.bf16.mxu1 %vm436_vm4, %v3215_v31 }
0x18d9   :  { %v3089_v59 = vpack.c.bf16 %v3085_v4, %v3085_v4 }
0x18da   :  { %v5737_v35 = vpop.eup %5736 }
0x18db   :  { %v3083_v17 = vmul.f32 %v5737_v35, %v5725_v47  ;;  %v3289_v61 = vpop.permute.xlu0 %3288 }
0x18dc   :  { %v3300_v39 = vsel %vm436_vm4, %v3289_v61, 0 }
0x18df   :  { %v3285_v50 = vpop.permute.xlu0 %3284 }
0x18ea   :  { %v3070_v43 = vpop.xlane.xlu1 %3069 }
0x18eb   :  { %5738 = vrcp.f32 %v3070_v43 }
0x18ee   :  { %v3217_v32 = vpop.permute.xlu1 %3216 }
0x18ef   :  { %5248 = vmatmul.mubr.msk.bf16.vlgmr.msra.gmra.mrb[84].mxu1 %vm436_vm4, %v3217_v32 }
0x18f2   :  { %v3283_v51 = vpop.permute.xlu1 %3282 }
0x18f5   :  { %v5739_v7 = vpop.eup %5738 }
0x18f6   :  { %v3084_v25 = vmul.f32 %v5739_v7, %v5727_v46 }
0x18f8   :  { %v3088_v14 = vpack.c.bf16 %v3084_v25, %v3083_v17 }
0x18fa   :  { %5239 = vmatprep.mubr.msk.bf16.mxu0 %vm577_vm6, %v3088_v14 }
0x18fb   :  { %5240 = vmatmul.mubr.msk.bf16.vlgmr.msra.gmra.mrb[80].mxu0 %vm577_vm6, %v3089_v59 }
0x18fc   :  { %5252 = vmatpush3.bf16.xpose.msra.mxu0 %v3297_v42  ;;  %5255 = vmatprep.mubr.msk.bf16.mxu0 %vm436_vm4, %v3283_v51 }
0x18fd   :  { %5406 = vmatprep.subr.msk.bf16.mxu0 %vm436_vm4, %v3289_v61 }
0x1904   :  { %5254 = vmatpush3.bf16.xpose.msra.mxu0 %v3300_v39 }
0x190b   :  { %5256 = vmatmul.mubr.msk.bf16.vlgmr.msra.gmra.mrb[84].mxu0 %vm436_vm4, %v3285_v50 }
0x1999   :  { %v6908_v40 = vpop.f32.mrb[80].mxu1 }
0x199a   :  { %v6910_v19 = vpop.f32.mrb[81].mxu1 }
0x199b   :  { %v5234_v18 = vpop.f32.mrb[82].mxu1 }
0x199c   :  { %v6912_v47 = vpop.f32.mrb[83].mxu1 }
0x199d   :  { %v5477_v63 = vpack.i.bf16 %v6912_v47, %v6910_v19 }
0x19c2   :  { %v5249_v52 = vpop.f32.mrb[84].mxu1 }
0x19c3   :  { %v3268_v11 = vpop.f32.mrb[85].mxu1  ;;  %v3352_v46 = vmul.f32 0.35355338, %v5249_v52 }
0x19c4   :  { %v3350_v28 = vmul.f32 0.35355338, %v3268_v11  ;;  %v5250_v2 = vpop.f32.mrb[86].mxu1 }
0x19c5   :  { %v3271_v29 = vpop.f32.mrb[87].mxu1  ;;  %v3358_v15 = vsel %vm222_vm5, %v3352_v46, -1e+30 }
0x19c6   :  { %v3356_v3 = vsel %vm222_vm5, %v3350_v28, -1e+30  ;;  %v3351_v53 = vmul.f32 0.35355338, %v3271_v29  ;;  %v3368_v37 = vsel %vm577_vm6, %v3358_v15, -inf }
0x19c7   :  { %v3362_v30 = vsel %vm577_vm6, %v3356_v3, -inf }
0x19c8   :  { %v3357_v10 = vsel %vm222_vm5, %v3351_v53, -1e+30  ;;  %3363 = vmax.xlane.f32.xlu1 %v3362_v30 }
0x19c9   :  { %v3365_v34 = vsel %vm577_vm6, %v3357_v10, -inf }
0x19ca   :  { %3366 = vmax.xlane.f32.xlu0 %v3365_v34 }
0x19ce   :  { %v6925_v21 = vpop.f32.mrb[80].mxu0  ;;  %3369 = vmax.xlane.f32.xlu0 %v3368_v37 }
0x19cf   :  { %v6927_v9 = vpop.f32.mrb[81].mxu0 }
0x19d0   :  { %v5492_v33 = vpack.i.bf16 %v6927_v9, %v6908_v40  ;;  %v5242_v41 = vpop.f32.mrb[82].mxu0 }
0x19d1   :  { %v6931_v13 = vpop.f32.mrb[83].mxu0 }
0x19d2   :  { %v5507_v49 = vpack.i.bf16 %v6925_v21, %v6931_v13 }
0x19d9   :  { %3432 = vrot.lane.b32.xlu1 %v6728_v44, %s7311_s25 }
0x19dd   :  { %3494 = vrot.lane.b32.xlu1 %v6738_v60, %s7311_s25 }
0x19de   :  { %v5257_v55 = vpop.f32.mrb[84].mxu0 }
0x19df   :  { %v3336_v0 = vpop.f32.mrb[85].mxu0  ;;  %v3355_v57 = vmul.f32 0.35355338, %v5257_v55 }
0x19e0   :  { %v3353_v36 = vmul.f32 0.35355338, %v3336_v0  ;;  %v5258_v24 = vpop.f32.mrb[86].mxu0 }
0x19e1   :  { %v3339_v31 = vpop.f32.mrb[87].mxu0  ;;  %3560 = vrot.lane.b32.xlu1 %v6728_v44, %s7312_s27  ;;  %v3361_v62 = vsel %vm222_vm5, %v3355_v57, -1e+30 }
0x19e2   :  { %v3359_v43 = vsel %vm222_vm5, %v3353_v36, -1e+30  ;;  %v3377_v35 = vsel %vm577_vm6, %v3361_v62, -inf  ;;  %v3354_v7 = vmul.f32 0.35355338, %v3339_v31 }
0x19e3   :  { %v3371_v32 = vsel %vm577_vm6, %v3359_v43, -inf }
0x19e4   :  { %3372 = vmax.xlane.f32.xlu0 %v3371_v32  ;;  %v3360_v4 = vsel %vm222_vm5, %v3354_v7, -1e+30 }
0x19e5   :  { %v3374_v17 = vsel %vm577_vm6, %v3360_v4, -inf }
0x19e8   :  { %3378 = vmax.xlane.f32.xlu0 %v3377_v35 }
0x19fe   :  { %3434 = vrot.lane.b32.xlu0 %v6734_v56, %s7311_s25 }
0x1a05   :  { %3375 = vmax.xlane.f32.xlu1 %v3374_v17 }
0x1a16   :  { %3496 = vrot.lane.b32.xlu1 %v6744_v16, %s7311_s25 }
0x1a55   :  { %v3364_v25 = vpop.xlane.xlu1 %3363 }
0x1a56   :  { %v3380_v51 = vsub.f32 %v3356_v3, %v3364_v25 }
0x1a57   :  { %v3367_v14 = vpop.xlane.xlu0 %3366 }
0x1a58   :  { %v3381_v59 = vsub.f32 %v3357_v10, %v3367_v14  ;;  %v3386_v52 = vmul.f32 1.442695, %v3380_v51 }
0x1a59   :  { %v3433_v42 = vpop.permute.xlu1 %3432 }
0x1a5a   :  { %v3388_v61 = vmul.f32 1.442695, %v3381_v59  ;;  %5259 = vmatprep.subr.bf16.mxu1 %v3433_v42 }
0x1a5b   :  { %5260 = vmatpush3.bf16.msra.mxu1 %v3433_v42  ;;  %v3370_v39 = vpop.xlane.xlu0 %3369 }
0x1a5c   :  { %5740 = vpow2.f32 %v3388_v61  ;;  %v3382_v50 = vsub.f32 %v3358_v15, %v3370_v39 }
0x1a5d   :  { %v3495_v18 = vpop.permute.xlu1 %3494 }
0x1a5e   :  { %v3390_v11 = vmul.f32 1.442695, %v3382_v50  ;;  %5267 = vmatprep.subr.bf16.mxu0 %v3495_v18 }
0x1a5f   :  { %5268 = vmatpush3.bf16.msra.mxu0 %v3495_v18 }
0x1a60   :  { %5742 = vpow2.f32 %v3390_v11 }
0x1a61   :  { %5744 = vpow2.f32 %v3386_v52  ;;  %v3561_v57 = vpop.permute.xlu1 %3560 }
0x1a66   :  { %v5741_v28 = vpop.eup %5740 }
0x1a67   :  { %v3401_v2 = vsel %vm577_vm6, %v5741_v28, 0.0 }
0x1a68   :  { %3402 = vadd.xlane.f32.xlu0 %v3401_v2 }
0x1a6a   :  { %v5743_v29 = vpop.eup %5742 }
0x1a6b   :  { %v3404_v46 = vsel %vm577_vm6, %v5743_v29, 0.0  ;;  %v5745_v3 = vpop.eup %5744 }
0x1a6c   :  { %3405 = vadd.xlane.f32.xlu1 %v3404_v46  ;;  %v3398_v53 = vsel %vm577_vm6, %v5745_v3, 0.0 }
0x1a70   :  { %3399 = vadd.xlane.f32.xlu1 %v3398_v53  ;;  %v3571_v53 = vsel %vm436_vm4, %v3561_v57, 0 }
0x1a71   :  { %v3373_v30 = vpop.xlane.xlu0 %3372 }
0x1a72   :  { %v3383_v10 = vsub.f32 %v3359_v43, %v3373_v30 }
0x1a74   :  { %v3392_v37 = vmul.f32 1.442695, %v3383_v10 }
0x1a75   :  { %v3379_v34 = vpop.xlane.xlu0 %3378 }
0x1a76   :  { %v3385_v15 = vsub.f32 %v3361_v62, %v3379_v34 }
0x1a78   :  { %v3396_v41 = vmul.f32 1.442695, %v3385_v15 }
0x1a79   :  { %v3435_v55 = vpop.permute.xlu0 %3434 }
0x1a7a   :  { %5746 = vpow2.f32 %v3396_v41  ;;  %v3444_v0 = vsel %vm659_vm7, %v3435_v55, 0  ;;  %5407 = vmatprep.subr.msk.bf16.mxu1 %vm659_vm7, %v3435_v55 }
0x1a7b   :  { %5262 = vmatpush3.bf16.msra.mxu1 %v3444_v0  ;;  %5748 = vpow2.f32 %v3392_v37 }
0x1a7c   :  { %5409 = vmatprep.subr.msk.bf16.mxu1 %vm436_vm4, %v3561_v57 }
0x1a81   :  { %3628 = vrot.lane.b32.xlu1 %v6738_v60, %s7312_s27 }
0x1a84   :  { %v5747_v36 = vpop.eup %5746 }
0x1a85   :  { %v3413_v24 = vsel %vm577_vm6, %v5747_v36, 0.0  ;;  %v5749_v31 = vpop.eup %5748 }
0x1a86   :  { %3414 = vadd.xlane.f32.xlu0 %v3413_v24  ;;  %v3407_v43 = vsel %vm577_vm6, %v5749_v31, 0.0 }
0x1a8a   :  { %3408 = vadd.xlane.f32.xlu0 %v3407_v43 }
0x1a92   :  { %v3376_v32 = vpop.xlane.xlu1 %3375 }
0x1a93   :  { %v3384_v62 = vsub.f32 %v3360_v4, %v3376_v32 }
0x1a95   :  { %v3394_v35 = vmul.f32 1.442695, %v3384_v62 }
0x1a96   :  { %v3497_v7 = vpop.permute.xlu1 %3496 }
0x1a97   :  { %5750 = vpow2.f32 %v3394_v35  ;;  %v3506_v17 = vsel %vm659_vm7, %v3497_v7, 0  ;;  %5408 = vmatprep.subr.msk.bf16.mxu0 %vm659_vm7, %v3497_v7 }
0x1a98   :  { %5270 = vmatpush3.bf16.msra.mxu0 %v3506_v17 }
0x1aa0   :  { %3562 = vrot.lane.b32.xlu0 %v6734_v56, %s7312_s27 }
0x1aa1   :  { %v5751_v25 = vpop.eup %5750 }
0x1aa2   :  { %v3410_v14 = vsel %vm577_vm6, %v5751_v25, 0.0 }
0x1aa4   :  { %3556 = vrot.lane.b32.xlu0 %v6728_v44, %s7313_s26 }
0x1aa5   :  { %3411 = vadd.xlane.f32.xlu1 %v3410_v14 }
0x1aa8   :  { %3630 = vrot.lane.b32.xlu0 %v6744_v16, %s7312_s27 }
0x1aac   :  { %3626 = vrot.lane.b32.xlu0 %v6744_v16, %s7313_s26 }
0x1ab6   :  { %3558 = vrot.lane.b32.xlu1 %v6734_v56, %s7313_s26 }
0x1aba   :  { %3624 = vrot.lane.b32.xlu1 %v6738_v60, %s7313_s26 }
0x1af5   :  { %v3403_v4 = vpop.xlane.xlu0 %3402 }
0x1af9   :  { %v3406_v59 = vpop.xlane.xlu1 %3405 }
0x1afa   :  { %5752 = vrcp.f32 %v3406_v59 }
0x1afb   :  { %5754 = vrcp.f32 %v3403_v4 }
0x1afd   :  { %v3400_v42 = vpop.xlane.xlu1 %3399 }
0x1afe   :  { %5756 = vrcp.f32 %v3400_v42 }
0x1b01   :  { %v3629_v51 = vpop.permute.xlu1 %3628 }
0x1b02   :  { %5411 = vmatprep.subr.msk.bf16.mxu0 %vm436_vm4, %v3629_v51  ;;  %v3639_v62 = vsel %vm436_vm4, %v3629_v51, 0 }
0x1b04   :  { %v5753_v61 = vpop.eup %5752 }
0x1b05   :  { %v5755_v39 = vpop.eup %5754  ;;  %v3424_v18 = vmul.f32 %v5753_v61, %v5743_v29 }
0x1b06   :  { %v3423_v11 = vmul.f32 %v5755_v39, %v5741_v28 }
0x1b07   :  { %v3429_v46 = vpack.c.bf16 %v3424_v18, %v3424_v18 }
0x1b08   :  { %v5757_v50 = vpop.eup %5756 }
0x1b09   :  { %v3422_v52 = vmul.f32 %v5757_v50, %v5745_v3 }
0x1b0b   :  { %v3428_v2 = vpack.c.bf16 %v3423_v11, %v3422_v52 }
0x1b0d   :  { %5263 = vmatprep.mubr.msk.bf16.mxu1 %vm577_vm6, %v3428_v2 }
0x1b0e   :  { %5264 = vmatmul.mubr.msk.bf16.vlgmr.msra.gmra.mrb[88].mxu1 %vm577_vm6, %v3429_v46 }
0x1b0f   :  { %5276 = vmatpush3.bf16.xpose.msra.mxu1 %v3571_v53 }
0x1b13   :  { %v3415_v30 = vpop.xlane.xlu0 %3414 }
0x1b14   :  { %5758 = vrcp.f32 %v3415_v30 }
0x1b17   :  { %v3409_v10 = vpop.xlane.xlu0 %3408 }
0x1b18   :  { %5760 = vrcp.f32 %v3409_v10 }
0x1b1b   :  { %v3563_v34 = vpop.permute.xlu0 %3562 }
0x1b1c   :  { %v3574_v15 = vsel %vm436_vm4, %v3563_v34, 0  ;;  %5410 = vmatprep.subr.msk.bf16.mxu1 %vm436_vm4, %v3563_v34 }
0x1b1d   :  { %5278 = vmatpush3.bf16.xpose.msra.mxu1 %v3574_v15 }
0x1b1e   :  { %v5759_v37 = vpop.eup %5758 }
0x1b1f   :  { %v3557_v29 = vpop.permute.xlu0 %3556  ;;  %v3427_v0 = vmul.f32 %v5759_v37, %v5747_v36 }
0x1b20   :  { %5279 = vmatprep.mubr.msk.bf16.mxu1 %vm436_vm4, %v3557_v29 }
0x1b21   :  { %v3431_v32 = vpack.c.bf16 %v3427_v0, %v3427_v0 }
0x1b22   :  { %v5761_v41 = vpop.eup %5760 }
0x1b23   :  { %v3425_v57 = vmul.f32 %v5761_v41, %v5749_v31  ;;  %v3631_v7 = vpop.permute.xlu0 %3630 }
0x1b24   :  { %v3642_v17 = vsel %vm436_vm4, %v3631_v7, 0 }
0x1b27   :  { %v3627_v36 = vpop.permute.xlu0 %3626 }
0x1b32   :  { %v3412_v28 = vpop.xlane.xlu1 %3411 }
0x1b33   :  { %5762 = vrcp.f32 %v3412_v28 }
0x1b36   :  { %v3559_v3 = vpop.permute.xlu1 %3558 }
0x1b37   :  { %5280 = vmatmul.mubr.msk.bf16.vlgmr.msra.gmra.mrb[92].mxu1 %vm436_vm4, %v3559_v3 }
0x1b3a   :  { %v3625_v35 = vpop.permute.xlu1 %3624 }
0x1b3d   :  { %v5763_v55 = vpop.eup %5762 }
0x1b3e   :  { %v3426_v24 = vmul.f32 %v5763_v55, %v5751_v25 }
0x1b40   :  { %v3430_v43 = vpack.c.bf16 %v3426_v24, %v3425_v57 }
0x1b42   :  { %5271 = vmatprep.mubr.msk.bf16.mxu0 %vm577_vm6, %v3430_v43 }
0x1b43   :  { %5272 = vmatmul.mubr.msk.bf16.vlgmr.msra.gmra.mrb[88].mxu0 %vm577_vm6, %v3431_v32 }
0x1b44   :  { %5284 = vmatpush3.bf16.xpose.msra.mxu0 %v3639_v62  ;;  %5287 = vmatprep.mubr.msk.bf16.mxu0 %vm436_vm4, %v3625_v35 }
0x1b45   :  { %5412 = vmatprep.subr.msk.bf16.mxu0 %vm436_vm4, %v3631_v7 }
0x1b4c   :  { %5286 = vmatpush3.bf16.xpose.msra.mxu0 %v3642_v17 }
0x1b53   :  { %5288 = vmatmul.mubr.msk.bf16.vlgmr.msra.gmra.mrb[92].mxu0 %vm436_vm4, %v3627_v36 }
0x1be1   :  { %v6994_v31 = vpop.f32.mrb[88].mxu1 }
0x1be2   :  { %v6996_v25 = vpop.f32.mrb[89].mxu1 }
0x1be3   :  { %v5266_v14 = vpop.f32.mrb[90].mxu1 }
0x1be4   :  { %v6998_v4 = vpop.f32.mrb[91].mxu1 }
0x1be5   :  { %v5482_v59 = vpack.i.bf16 %v6998_v4, %v6996_v25 }
0x1c0a   :  { %v5281_v42 = vpop.f32.mrb[92].mxu1 }
0x1c0b   :  { %v3610_v51 = vpop.f32.mrb[93].mxu1  ;;  %v3694_v18 = vmul.f32 0.35355338, %v5281_v42 }
0x1c0c   :  { %v3692_v61 = vmul.f32 0.35355338, %v3610_v51  ;;  %v5282_v39 = vpop.f32.mrb[94].mxu1 }
0x1c0d   :  { %v3613_v50 = vpop.f32.mrb[95].mxu1  ;;  %v3700_v30 = vsel %vm222_vm5, %v3694_v18, -1e+30 }
0x1c0e   :  { %v3698_v52 = vsel %vm222_vm5, %v3692_v61, -1e+30  ;;  %v3693_v11 = vmul.f32 0.35355338, %v3613_v50  ;;  %v3710_v10 = vsel %vm577_vm6, %v3700_v30, -inf }
0x1c0f   :  { %v3704_v2 = vsel %vm577_vm6, %v3698_v52, -inf }
0x1c10   :  { %v3699_v46 = vsel %vm222_vm5, %v3693_v11, -1e+30  ;;  %3705 = vmax.xlane.f32.xlu1 %v3704_v2 }
0x1c11   :  { %v3707_v53 = vsel %vm577_vm6, %v3699_v46, -inf }
0x1c12   :  { %3708 = vmax.xlane.f32.xlu0 %v3707_v53 }
0x1c16   :  { %v7011_v34 = vpop.f32.mrb[88].mxu0  ;;  %3711 = vmax.xlane.f32.xlu0 %v3710_v10 }
0x1c17   :  { %v7013_v15 = vpop.f32.mrb[89].mxu0 }
0x1c18   :  { %v5497_v29 = vpack.i.bf16 %v7013_v15, %v6994_v31  ;;  %v5274_v28 = vpop.f32.mrb[90].mxu0 }
0x1c19   :  { %v7017_v3 = vpop.f32.mrb[91].mxu0 }
0x1c1a   :  { %v5512_v37 = vpack.i.bf16 %v7011_v34, %v7017_v3 }
0x1c26   :  { %v5289_v41 = vpop.f32.mrb[92].mxu0 }
0x1c27   :  { %v3678_v55 = vpop.f32.mrb[93].mxu0  ;;  %v3697_v0 = vmul.f32 0.35355338, %v5289_v41 }
0x1c28   :  { %v3695_v57 = vmul.f32 0.35355338, %v3678_v55  ;;  %v5290_v24 = vpop.f32.mrb[94].mxu0 }
0x1c29   :  { %v3681_v43 = vpop.f32.mrb[95].mxu0  ;;  %v3703_v7 = vsel %vm222_vm5, %v3697_v0, -1e+30 }
0x1c2a   :  { %v3701_v32 = vsel %vm222_vm5, %v3695_v57, -1e+30  ;;  %v3696_v62 = vmul.f32 0.35355338, %v3681_v43  ;;  %v3719_v14 = vsel %vm577_vm6, %v3703_v7, -inf }
0x1c2b   :  { %v3713_v35 = vsel %vm577_vm6, %v3701_v32, -inf }
0x1c2c   :  { %v3702_v17 = vsel %vm222_vm5, %v3696_v62, -1e+30  ;;  %3714 = vmax.xlane.f32.xlu0 %v3713_v35 }
0x1c2d   :  { %v3716_v36 = vsel %vm577_vm6, %v3702_v17, -inf }
0x1c2e   :  { %3717 = vmax.xlane.f32.xlu1 %v3716_v36 }
0x1c30   :  { %3720 = vmax.xlane.f32.xlu0 %v3719_v14 }
0x1c3f   :  { %3774 = vrot.lane.b32.xlu1 %v6728_v44, %s7314_s3 }
0x1c9d   :  { %v3706_v42 = vpop.xlane.xlu1 %3705 }
0x1c9e   :  { %v3722_v39 = vsub.f32 %v3698_v52, %v3706_v42 }
0x1c9f   :  { %v3709_v51 = vpop.xlane.xlu0 %3708 }
0x1ca0   :  { %v3723_v61 = vsub.f32 %v3699_v46, %v3709_v51  ;;  %v3728_v54 = vmul.f32 1.442695, %v3722_v39 }
0x1ca2   :  { %v3730_v50 = vmul.f32 1.442695, %v3723_v61 }
0x1ca3   :  { %v3712_v18 = vpop.xlane.xlu0 %3711 }
0x1ca4   :  { %5764 = vpow2.f32 %v3730_v50  ;;  %v3724_v11 = vsub.f32 %v3700_v30, %v3712_v18 }
0x1ca6   :  { %v3732_v2 = vmul.f32 1.442695, %v3724_v11 }
0x1ca8   :  { %5766 = vpow2.f32 %v3732_v2 }
0x1ca9   :  { %5768 = vpow2.f32 %v3728_v54 }
0x1cae   :  { %v5765_v53 = vpop.eup %5764 }
0x1caf   :  { %v3743_v10 = vsel %vm577_vm6, %v5765_v53, 0.0 }
0x1cb0   :  { %3744 = vadd.xlane.f32.xlu0 %v3743_v10 }
0x1cb2   :  { %v5767_v28 = vpop.eup %5766 }
0x1cb3   :  { %v3746_v41 = vsel %vm577_vm6, %v5767_v28, 0.0  ;;  %v5769_v44 = vpop.eup %5768 }
0x1cb4   :  { %3747 = vadd.xlane.f32.xlu1 %v3746_v41  ;;  %v3740_v46 = vsel %vm577_vm6, %v5769_v44, 0.0 }
0x1cb8   :  { %3741 = vadd.xlane.f32.xlu1 %v3740_v46 }
0x1cb9   :  { %v3715_v52 = vpop.xlane.xlu0 %3714 }
0x1cba   :  { %v3725_v0 = vsub.f32 %v3701_v32, %v3715_v52 }
0x1cbb   :  { %v3718_v55 = vpop.xlane.xlu1 %3717 }
0x1cbc   :  { %v3734_v43 = vmul.f32 1.442695, %v3725_v0  ;;  %v3726_v32 = vsub.f32 %v3702_v17, %v3718_v55  ;;  %v5538_v0 = vld [vmem:[%s7265_s9 + $0x10] sm:$0xff]  }
0x1cbd   :  { %v3721_v30 = vpop.xlane.xlu0 %3720 }
0x1cbe   :  { %v3727_v57 = vsub.f32 %v3703_v7, %v3721_v30  ;;  %v3736_v7 = vmul.f32 1.442695, %v3726_v32  ;;  %v5539_v30 = vld [vmem:[%s7265_s9 + $0x18] sm:$0xff]  }
0x1cbf   :  { %v3775_v24 = vpop.permute.xlu1 %3774 }
0x1cc0   :  { %v3738_v62 = vmul.f32 1.442695, %v3727_v57  ;;  %5291 = vmatprep.subr.bf16.mxu1 %v3775_v24 }
0x1cc1   :  { %5292 = vmatpush3.bf16.msra.mxu1 %v3775_v24 }
0x1cc2   :  { %5770 = vpow2.f32 %v3738_v62 }
0x1cc3   :  { %5772 = vpow2.f32 %v3734_v43 }
0x1cc4   :  { %5774 = vpow2.f32 %v3736_v7 }
0x1cc9   :  { %3836 = vrot.lane.b32.xlu1 %v6738_v60, %s7314_s3 }
0x1ccc   :  { %v5771_v35 = vpop.eup %5770 }
0x1ccd   :  { %v3755_v36 = vsel %vm577_vm6, %v5771_v35, 0.0  ;;  %v5773_v14 = vpop.eup %5772 }
0x1cce   :  { %3756 = vadd.xlane.f32.xlu0 %v3755_v36  ;;  %v3749_v42 = vsel %vm577_vm6, %v5773_v14, 0.0  ;;  %v5775_v51 = vpop.eup %5774 }
0x1ccf   :  { %v3752_v60 = vsel %vm577_vm6, %v5775_v51, 0.0 }
0x1cd2   :  { %3750 = vadd.xlane.f32.xlu0 %v3749_v42 }
0x1ce8   :  { %3776 = vrot.lane.b32.xlu0 %v6734_v56, %s7314_s3 }
0x1cec   :  { %5483 = vrot.lane.b32.xlu0 %v5482_v59, %s7315_s28 }
0x1ced   :  { %3753 = vadd.xlane.f32.xlu1 %v3752_v60 }
0x1cf0   :  { %5493 = vrot.lane.b32.xlu0 %v5492_v33, %s7316_s29 }
0x1cfe   :  { %3838 = vrot.lane.b32.xlu1 %v6744_v16, %s7314_s3 }
0x1d02   :  { %5478 = vrot.lane.b32.xlu1 %v5477_v63, %s7316_s29 }
0x1d3d   :  { %v3745_v56 = vpop.xlane.xlu0 %3744 }
0x1d3e   :  { %5776 = vrcp.f32 %v3745_v56 }
0x1d41   :  { %v3748_v17 = vpop.xlane.xlu1 %3747 }
0x1d45   :  { %v3742_v25 = vpop.xlane.xlu1 %3741 }
0x1d46   :  { %5778 = vrcp.f32 %v3742_v25 }
0x1d47   :  { %5780 = vrcp.f32 %v3748_v17 }
0x1d48   :  { %v5777_v59 = vpop.eup %5776 }
0x1d49   :  { %v3837_v4 = vpop.permute.xlu1 %3836  ;;  %v3765_v9 = vmul.f32 %v5777_v59, %v5765_v53 }
0x1d4a   :  { %5299 = vmatprep.subr.bf16.mxu0 %v3837_v4 }
0x1d4b   :  { %5300 = vmatpush3.bf16.msra.mxu0 %v3837_v4 }
0x1d50   :  { %v5779_v61 = vpop.eup %5778 }
0x1d51   :  { %v3764_v40 = vmul.f32 %v5779_v61, %v5769_v44  ;;  %v5781_v39 = vpop.eup %5780 }
0x1d52   :  { %v3766_v47 = vmul.f32 %v5781_v39, %v5767_v28 }
0x1d53   :  { %v3770_v33 = vpack.c.bf16 %v3765_v9, %v3764_v40 }
0x1d54   :  { %v3771_v18 = vpack.c.bf16 %v3766_v47, %v3766_v47 }
0x1d55   :  { %5295 = vmatprep.mubr.msk.bf16.mxu1 %vm577_vm6, %v3770_v33 }
0x1d5b   :  { %v3757_v16 = vpop.xlane.xlu0 %3756 }
0x1d5c   :  { %5782 = vrcp.f32 %v3757_v16 }
0x1d5f   :  { %v3751_v19 = vpop.xlane.xlu0 %3750 }
0x1d60   :  { %5784 = vrcp.f32 %v3751_v19 }
0x1d63   :  { %v3777_v63 = vpop.permute.xlu0 %3776 }
0x1d64   :  { %v3786_v50 = vsel %vm659_vm7, %v3777_v63, 0  ;;  %5413 = vmatprep.subr.msk.bf16.mxu1 %vm659_vm7, %v3777_v63 }
0x1d65   :  { %5294 = vmatpush3.bf16.msra.mxu1 %v3786_v50 }
0x1d66   :  { %5307 = vmatprep.subr.bf16.mxu1 %v5838_v1  ;;  %v5783_v53 = vpop.eup %5782 }
0x1d67   :  { %v3769_v41 = vmul.f32 %v5783_v53, %v5771_v35  ;;  %v5484_v21 = vpop.permute.xlu0 %5483 }
0x1d68   :  { %5296 = vmatmul.mubr.msk.bf16.vlgmr.msra.gmra.mrb[96].mxu1 %vm577_vm6, %v3771_v18  ;;  %v5486_v60 = vunpack.i.h.bf16 %v5484_v21  ;;  %v5485_v56 = vunpack.i.l.bf16 %v5484_v21 }
0x1d69   :  { %5311 = vmatprep.mubr.msk.bf16.mxu1 %vm5839_vm0, %v5838_v1  ;;  %v3773_v55 = vpack.c.bf16 %v3769_v41, %v3769_v41  ;;  %5308 = vmatpush3.bf16.msra.mxu1 %v5538_v0 }
0x1d6a   :  { %v5785_v10 = vpop.eup %5784  ;;  %5309 = vmatprep.subr.bf16.mxu1 %v5838_v1 }
0x1d6b   :  { %v3767_v44 = vmul.f32 %v5785_v10, %v5773_v14 }
0x1d6d   :  { %5310 = vmatpush3.bf16.msra.mxu1 %v5539_v30 }
0x1d6e   :  { %5339 = vmatprep.subr.bf16.mxu1 %v5838_v1 }
0x1d7a   :  { %v3754_v11 = vpop.xlane.xlu1 %3753 }
0x1d7b   :  { %5786 = vrcp.f32 %v3754_v11 }
0x1d7e   :  { %v3839_v54 = vpop.permute.xlu1 %3838 }
0x1d7f   :  { %v3848_v2 = vsel %vm659_vm7, %v3839_v54, 0  ;;  %5414 = vmatprep.subr.msk.bf16.mxu0 %vm659_vm7, %v3839_v54 }
0x1d80   :  { %5302 = vmatpush3.bf16.msra.mxu0 %v3848_v2 }
0x1d81   :  { %5323 = vmatprep.subr.bf16.mxu0 %v5838_v1 }
0x1d82   :  { %v5479_v31 = vpop.permute.xlu1 %5478 }
0x1d83   :  { %v5481_v15 = vunpack.i.h.bf16 %v5479_v31 }
0x1d85   :  { %v5787_v28 = vpop.eup %5786  ;;  %v3971_v13 = vsel %vm436_vm4, %v6832_v20, %v5481_v15  ;;  %v5494_v20 = vpop.permute.xlu0 %5493 }
0x1d86   :  { %v3768_v46 = vmul.f32 %v5787_v28, %v5775_v51  ;;  %v3977_v34 = vsel %vm1877_vm8, %v3971_v13, %v5486_v60  ;;  %v5496_v40 = vunpack.i.h.bf16 %v5494_v20  ;;  %v5495_v9 = vunpack.i.l.bf16 %v5494_v20 }
0x1d88   :  { %v3772_v52 = vpack.c.bf16 %v3768_v46, %v3767_v44  ;;  %v3973_v47 = vsel %vm436_vm4, %v6845_v5, %v5496_v40  ;;  %v3972_v63 = vsel %vm436_vm4, %v6828_v12, %v5495_v9 }
0x1d8a   :  { %5303 = vmatprep.mubr.msk.bf16.mxu0 %vm577_vm6, %v3772_v52 }
0x1d8b   :  { %5304 = vmatmul.mubr.msk.bf16.vlgmr.msra.gmra.mrb[96].mxu0 %vm577_vm6, %v3773_v55 }
0x1d8c   :  { %5327 = vmatprep.mubr.msk.bf16.mxu0 %vm5839_vm0, %v5838_v1 }
0x1e3b   :  { %v5297_v57 = vpop.f32.mrb[96].mxu1 }
0x1e3c   :  { %v3822_v24 = vpop.f32.mrb[97].mxu1 }
0x1e3d   :  { %v5298_v43 = vpop.f32.mrb[98].mxu1 }
0x1e3e   :  { %v3825_v62 = vpop.f32.mrb[99].mxu1 }
0x1e3f   :  { %v5487_v35 = vpack.i.bf16 %v3825_v62, %v3822_v24 }
0x1e41   :  { %5488 = vrot.lane.b32.xlu1 %v5487_v35, %s7317_s5 }
0x1e45   :  { %5498 = vrot.lane.b32.xlu1 %v5497_v29, %s7315_s28  ;;  %v5480_v29 = vunpack.i.l.bf16 %v5479_v31 }
0x1e49   :  { %5508 = vrot.lane.b32.xlu1 %v5507_v49, %s7316_s29  ;;  %v3970_v49 = vsel %vm436_vm4, %v6830_v22, %v5480_v29 }
0x1e4a   :  { %v3976_v59 = vsel %vm1877_vm8, %v3970_v49, %v5485_v56 }
0x1e5e   :  { %v5305_v36 = vpop.f32.mrb[96].mxu0 }
0x1e5f   :  { %v3884_v14 = vpop.f32.mrb[97].mxu0 }
0x1e60   :  { %v5502_v42 = vpack.i.bf16 %v3884_v14, %v5297_v57  ;;  %v5306_v32 = vpop.f32.mrb[98].mxu0 }
0x1e61   :  { %v3887_v7 = vpop.f32.mrb[99].mxu0 }
0x1e62   :  { %v5517_v51 = vpack.i.bf16 %v5305_v36, %v3887_v7  ;;  %5503 = vrot.lane.b32.xlu0 %v5502_v42, %s7317_s5 }
0x1e64   :  { %5518 = vrot.lane.b32.xlu1 %v5517_v51, %s7317_s5 }
0x1e66   :  { %5513 = vrot.lane.b32.xlu0 %v5512_v37, %s7315_s28 }
0x1eb3   :  { %v5489_v17 = vpop.permute.xlu1 %5488 }
0x1eb4   :  { %v5491_v25 = vunpack.i.h.bf16 %v5489_v17  ;;  %v5490_v4 = vunpack.i.l.bf16 %v5489_v17 }
0x1eb6   :  { %v3982_v3 = vsel %vm577_vm6, %v3976_v59, %v5490_v4  ;;  %v3983_v37 = vsel %vm577_vm6, %v3977_v34, %v5491_v25 }
0x1eb7   :  { %v3988_v61 = vpack.c.bf16 %v3983_v37, %v3982_v3  ;;  %v5499_v22 = vpop.permute.xlu1 %5498 }
0x1eb8   :  { %v5501_v33 = vunpack.i.h.bf16 %v5499_v22  ;;  %v5500_v16 = vunpack.i.l.bf16 %v5499_v22 }
0x1eb9   :  { %5312 = vmatmul.mubr.msk.bf16.vlgmr.msra.gmra.mrb[100].mxu1 %vm225_vm2, %v3988_v61 }
0x1eba   :  { %5315 = vmatprep.mubr.msk.bf16.mxu1 %vm5839_vm0, %v5838_v1  ;;  %v3978_v11 = vsel %vm1877_vm8, %v3972_v63, %v5500_v16  ;;  %v3979_v54 = vsel %vm1877_vm8, %v3973_v47, %v5501_v33 }
0x1ebb   :  { %v5509_v39 = vpop.permute.xlu1 %5508 }
0x1ebc   :  { %v5511_v2 = vunpack.i.h.bf16 %v5509_v39  ;;  %v5510_v53 = vunpack.i.l.bf16 %v5509_v39 }
0x1ebe   :  { %v3975_v12 = vsel %vm436_vm4, %v6843_v48, %v5511_v2  ;;  %v3974_v55 = vsel %vm436_vm4, %v6847_v8, %v5510_v53  ;;  %v4721_v48 = vld [vmem:[%s7266_s10 + $0x1] ss:$0 sm:$0xff] }
0x1ed4   :  { %v5504_v19 = vpop.permute.xlu0 %5503 }
0x1ed5   :  { %v5506_v50 = vunpack.i.h.bf16 %v5504_v19  ;;  %v5505_v18 = vunpack.i.l.bf16 %v5504_v19 }
0x1ed6   :  { %v5519_v41 = vpop.permute.xlu1 %5518 }
0x1ed7   :  { %v3984_v10 = vsel %vm577_vm6, %v3978_v11, %v5505_v18  ;;  %v3985_v28 = vsel %vm577_vm6, %v3979_v54, %v5506_v50  ;;  %v5521_v0 = vunpack.i.h.bf16 %v5519_v41  ;;  %v5520_v30 = vunpack.i.l.bf16 %v5519_v41 }
0x1ed8   :  { %v3989_v44 = vpack.c.bf16 %v3985_v28, %v3984_v10  ;;  %v5514_v46 = vpop.permute.xlu0 %5513  ;;  %v5540_v28 = vld [vmem:[%s7269_s13 + $0x10] sm:$0xff]  }
0x1ed9   :  { %v5516_v52 = vunpack.i.h.bf16 %v5514_v46  ;;  %v5515_v5 = vunpack.i.l.bf16 %v5514_v46  ;;  %5324 = vmatpush3.bf16.msra.mxu0 %v5540_v28 }
0x1eda   :  { %5316 = vmatmul.mubr.msk.bf16.gmra.mrb[104].mxu1 %vm225_vm2, %v3989_v44  ;;  %5325 = vmatprep.subr.bf16.mxu0 %v5838_v1 }
0x1edb   :  { %v3981_v57 = vsel %vm1877_vm8, %v3975_v12, %v5516_v52  ;;  %v3980_v24 = vsel %vm1877_vm8, %v3974_v55, %v5515_v5  ;;  %5319 = vmatprep.mubr.msk.bf16.mxu1 %vm5839_vm0, %v5838_v1  ;;  %v5541_v52 = vld [vmem:[%s7269_s13 + $0x18] sm:$0xff]  }
0x1edc   :  { %v3986_v43 = vsel %vm577_vm6, %v3980_v24, %v5520_v30  ;;  %v3987_v62 = vsel %vm577_vm6, %v3981_v57, %v5521_v0 }
0x1edd   :  { %v3990_v35 = vpack.c.bf16 %v3987_v62, %v3986_v43  ;;  %5326 = vmatpush3.bf16.msra.mxu0 %v5541_v52  ;;  %v5543_v52 = vld [vmem:[%s7271_s15 + $0x28] sm:$0xff]  }
0x1ede   :  { %5359 = vmatprep.subr.bf16.mxu0 %v5838_v1 }
0x1ee2   :  { %5320 = vmatmul.mubr.msk.bf16.gmra.mrb[108].mxu1 %vm225_vm2, %v3990_v35 }
0x1ee3   :  { %5347 = vmatprep.mubr.msk.bf16.mxu1 %vm5839_vm0, %v5838_v1 }
0x1f8c   :  { %v4052_v8 = vpop.f32.mrb[100].mxu1 }
0x1f8d   :  { %v4053_v36 = vadd.f32 %v4721_v48, %v4052_v8  ;;  %v5313_v14 = vpop.f32.mrb[101].mxu1 }
0x1f8e   :  { %v4055_v42 = vpop.f32.mrb[102].mxu1 }
0x1f8f   :  { %v4075_v32 = vadd.f32 %v4053_v36, %v6654_v6  ;;  %v4056_v7 = vadd.f32 %v4721_v48, %v4055_v42  ;;  %v5314_v51 = vpop.f32.mrb[103].mxu1 }
0x1f91   :  { %v4076_v31 = vadd.f32 %v4056_v7, %v6657_v58  ;;  %v4085_v15 = vsel %vm225_vm2, %v4075_v32, 0.0 }
0x1f92   :  { %4086 = vadd.xlane.f32.xlu0 %v4085_v15 }
0x1f93   :  { %v4088_v29 = vsel %vm225_vm2, %v4076_v31, 0.0 }
0x1f94   :  { %4089 = vadd.xlane.f32.xlu1 %v4088_v29 }
0x1fad   :  { %v4060_v21 = vpop.f32.mrb[104].mxu1 }
0x1fae   :  { %v4061_v13 = vadd.f32 %v4721_v48, %v4060_v21  ;;  %v5317_v49 = vpop.f32.mrb[105].mxu1 }
0x1faf   :  { %v4063_v60 = vpop.f32.mrb[106].mxu1  ;;  %v4730_v49 = vld [vmem:[%s7268_s12 + $0x1] ss:$0 sm:$0xff] }
0x1fb0   :  { %v7134_v56 = vadd.f32 %v4061_v13, %v6664_v45  ;;  %v4064_v17 = vadd.f32 %v4721_v48, %v4063_v60  ;;  %v5318_v25 = vpop.f32.mrb[107].mxu1 }
0x1fb2   :  { %v4078_v6 = vadd.f32 %v4064_v17, %v6667_v38  ;;  %v4091_v58 = vsel %vm225_vm2, %v7134_v56, 0.0 }
0x1fb3   :  { %4092 = vadd.xlane.f32.xlu0 %v4091_v58 }
0x1fb4   :  { %v4094_v3 = vsel %vm225_vm2, %v4078_v6, 0.0 }
0x1fb5   :  { %v4068_v4 = vpop.f32.mrb[108].mxu1 }
0x1fb6   :  { %v4069_v59 = vadd.f32 %v4721_v48, %v4068_v4  ;;  %v5321_v34 = vpop.f32.mrb[109].mxu1 }
0x1fb7   :  { %4095 = vadd.xlane.f32.xlu0 %v4094_v3  ;;  %v4071_v37 = vpop.f32.mrb[110].mxu1 }
0x1fb8   :  { %v4079_v61 = vadd.f32 %v4069_v59, %v6674_v23  ;;  %v4072_v22 = vadd.f32 %v4721_v48, %v4071_v37  ;;  %v5322_v45 = vpop.f32.mrb[111].mxu1 }
0x1fba   :  { %v7142_v20 = vadd.f32 %v4072_v22, %v6677_v27  ;;  %v4097_v38 = vsel %vm225_vm2, %v4079_v61, 0.0 }
0x1fbb   :  { %4098 = vadd.xlane.f32.xlu0 %v4097_v38 }
0x1fbc   :  { %v4100_v40 = vsel %vm225_vm2, %v7142_v20, 0.0 }
0x1fbd   :  { %4101 = vadd.xlane.f32.xlu1 %v4100_v40 }
0x201f   :  { %v4087_v9 = vpop.xlane.xlu0 %4086 }
0x2020   :  { %v4103_v33 = vmul.f32 0.03125, %v4087_v9 }
0x2021   :  { %v4090_v16 = vpop.xlane.xlu1 %4089 }
0x2022   :  { %v4109_v39 = vsub.f32 %v4075_v32, %v4103_v33  ;;  %v4104_v19 = vmul.f32 0.03125, %v4090_v16 }
0x2024   :  { %v4110_v47 = vsub.f32 %v4076_v31, %v4104_v19  ;;  %v4115_v63 = vmul.f32 %v4109_v39, %v4109_v39  ;;  %v4729_v31 = vld [vmem:[%s7267_s11 + $0x1] ss:$0 sm:$0xff] }
0x2026   :  { %v4121_v23 = vsel %vm225_vm2, %v4115_v63, 0.0  ;;  %v4116_v50 = vmul.f32 %v4110_v47, %v4110_v47 }
0x2027   :  { %4122 = vadd.xlane.f32.xlu0 %v4121_v23 }
0x2028   :  { %v4124_v27 = vsel %vm225_vm2, %v4116_v50, 0.0 }
0x2029   :  { %4125 = vadd.xlane.f32.xlu1 %v4124_v27 }
0x2040   :  { %v4093_v18 = vpop.xlane.xlu0 %4092 }
0x2041   :  { %v4105_v11 = vmul.f32 0.03125, %v4093_v18 }
0x2043   :  { %v7150_v54 = vsub.f32 %v7134_v56, %v4105_v11 }
0x2044   :  { %v4096_v2 = vpop.xlane.xlu0 %4095 }
0x2045   :  { %v4106_v53 = vmul.f32 0.03125, %v4096_v2  ;;  %v4117_v10 = vmul.f32 %v7150_v54, %v7150_v54 }
0x2047   :  { %v7157_v41 = vsub.f32 %v4078_v6, %v4106_v53  ;;  %v4127_v44 = vsel %vm225_vm2, %v4117_v10, 0.0 }
0x2048   :  { %4128 = vadd.xlane.f32.xlu0 %v4127_v44  ;;  %v4099_v46 = vpop.xlane.xlu0 %4098 }
0x2049   :  { %v4107_v5 = vmul.f32 0.03125, %v4099_v46  ;;  %v4118_v12 = vmul.f32 %v7157_v41, %v7157_v41 }
0x204a   :  { %v4102_v55 = vpop.xlane.xlu1 %4101 }
0x204b   :  { %v4113_v0 = vsub.f32 %v4079_v61, %v4107_v5  ;;  %v4108_v30 = vmul.f32 0.03125, %v4102_v55  ;;  %v4130_v57 = vsel %vm225_vm2, %v4118_v12, 0.0  ;;  %v5544_v5 = vld [vmem:[%s7271_s15 + $0x30] sm:$0xff]   ;;  %v5545_v12 = vld [vmem:[%s7271_s15 + $0x38] sm:$0xff]   ;;  %v4736_v55 = vld [vmem:[%s7270_s14 + $0x1] ss:$0 sm:$0xff] }
0x204c   :  { %4131 = vadd.xlane.f32.xlu1 %v4130_v57 }
0x204d   :  { %v4114_v24 = vsub.f32 %v7142_v20, %v4108_v30  ;;  %v4119_v43 = vmul.f32 %v4113_v0, %v4113_v0 }
0x204f   :  { %v4133_v62 = vsel %vm225_vm2, %v4119_v43, 0.0  ;;  %v4120_v35 = vmul.f32 %v4114_v24, %v4114_v24 }
0x2050   :  { %4134 = vadd.xlane.f32.xlu0 %v4133_v62 }
0x2051   :  { %v4136_v48 = vsel %vm225_vm2, %v4120_v35, 0.0 }
0x2052   :  { %4137 = vadd.xlane.f32.xlu1 %v4136_v48 }
0x20b4   :  { %v4123_v8 = vpop.xlane.xlu0 %4122 }
0x20b5   :  { %v4139_v36 = vmul.f32 0.03125, %v4123_v8 }
0x20b6   :  { %v4126_v14 = vpop.xlane.xlu1 %4125 }
0x20b7   :  { %v4145_v42 = vadd.f32 1e-05, %v4139_v36  ;;  %v4140_v32 = vmul.f32 0.03125, %v4126_v14 }
0x20b9   :  { %5788 = vrsqrt.f32 %v4145_v42  ;;  %v4146_v7 = vadd.f32 1e-05, %v4140_v32 }
0x20bb   :  { %5790 = vrsqrt.f32 %v4146_v7 }
0x20c3   :  { %v5789_v51 = vpop.eup %5788 }
0x20c4   :  { %v4157_v15 = vmul.f32 %v5789_v51, %v4109_v39 }
0x20c5   :  { %v5791_v29 = vpop.eup %5790 }
0x20c6   :  { %v4169_v21 = vmul.f32 %v4729_v31, %v4157_v15  ;;  %v4158_v13 = vmul.f32 %v5791_v29, %v4110_v47 }
0x20c8   :  { %v4170_v60 = vmul.f32 %v4729_v31, %v4158_v13  ;;  %v4181_v17 = vadd.f32 %v4730_v49, %v4169_v21 }
0x20ca   :  { %v4182_v25 = vadd.f32 %v4730_v49, %v4170_v60 }
0x20cc   :  { %v4187_v6 = vpack.c.bf16 %v4182_v25, %v4181_v17 }
0x20ce   :  { %5328 = vmatmul.mubr.msk.bf16.vlgmr.msra.gmra.mrb[100].mxu0 %vm225_vm2, %v4187_v6 }
0x20cf   :  { %5331 = vmatprep.mubr.msk.bf16.mxu0 %vm5839_vm0, %v5838_v1 }
0x20d5   :  { %v4129_v58 = vpop.xlane.xlu0 %4128 }
0x20d6   :  { %v4141_v4 = vmul.f32 0.03125, %v4129_v58 }
0x20d8   :  { %v4147_v59 = vadd.f32 1e-05, %v4141_v4 }
0x20d9   :  { %v4132_v34 = vpop.xlane.xlu1 %4131 }
0x20da   :  { %5792 = vrsqrt.f32 %v4147_v59  ;;  %v4142_v3 = vmul.f32 0.03125, %v4132_v34 }
0x20dc   :  { %v4148_v37 = vadd.f32 1e-05, %v4142_v3 }
0x20dd   :  { %v4135_v61 = vpop.xlane.xlu0 %4134 }
0x20de   :  { %5794 = vrsqrt.f32 %v4148_v37  ;;  %v4143_v22 = vmul.f32 0.03125, %v4135_v61 }
0x20df   :  { %v4138_v45 = vpop.xlane.xlu1 %4137 }
0x20e0   :  { %v4149_v38 = vadd.f32 1e-05, %v4143_v22  ;;  %v4144_v40 = vmul.f32 0.03125, %v4138_v45 }
0x20e2   :  { %5796 = vrsqrt.f32 %v4149_v38  ;;  %v4150_v9 = vadd.f32 1e-05, %v4144_v40 }
0x20e4   :  { %v5793_v33 = vpop.eup %5792  ;;  %5798 = vrsqrt.f32 %v4150_v9 }
0x20e5   :  { %v4159_v16 = vmul.f32 %v5793_v33, %v7150_v54 }
0x20e7   :  { %v4171_v47 = vmul.f32 %v4729_v31, %v4159_v16 }
0x20e8   :  { %v5795_v39 = vpop.eup %5794 }
0x20e9   :  { %v4160_v19 = vmul.f32 %v5795_v39, %v7157_v41  ;;  %v4183_v27 = vadd.f32 %v4730_v49, %v4171_v47  ;;  %v5542_v41 = vld [vmem:[%s7271_s15 + $0x20] sm:$0xff]  }
0x20ea   :  { %5340 = vmatpush3.bf16.msra.mxu1 %v5542_v41  ;;  %v4751_v41 = vld [vmem:[%s7272_s16 + $0x1] ss:$0 sm:$0xff] }
0x20eb   :  { %v4172_v63 = vmul.f32 %v4729_v31, %v4160_v19  ;;  %5341 = vmatprep.subr.bf16.mxu1 %v5838_v1 }
0x20ec   :  { %v5797_v23 = vpop.eup %5796 }
0x20ed   :  { %v4161_v50 = vmul.f32 %v5797_v23, %v4113_v0  ;;  %v4184_v18 = vadd.f32 %v4730_v49, %v4172_v63 }
0x20ee   :  { %v5799_v11 = vpop.eup %5798  ;;  %5342 = vmatpush3.bf16.msra.mxu1 %v5543_v52 }
0x20ef   :  { %v4162_v2 = vmul.f32 %v5799_v11, %v4114_v24  ;;  %v4188_v53 = vpack.c.bf16 %v4184_v18, %v4183_v27  ;;  %v4173_v10 = vmul.f32 %v4729_v31, %v4161_v50  ;;  %5343 = vmatprep.subr.bf16.mxu1 %v5838_v1 }
0x20f1   :  { %5332 = vmatmul.mubr.msk.bf16.gmra.mrb[104].mxu0 %vm225_vm2, %v4188_v53  ;;  %v4174_v28 = vmul.f32 %v4729_v31, %v4162_v2  ;;  %v4185_v44 = vadd.f32 %v4730_v49, %v4173_v10 }
0x20f2   :  { %5335 = vmatprep.mubr.msk.bf16.mxu0 %vm5839_vm0, %v5838_v1  ;;  %5344 = vmatpush3.bf16.msra.mxu1 %v5544_v5 }
0x20f3   :  { %v4186_v54 = vadd.f32 %v4730_v49, %v4174_v28  ;;  %5345 = vmatprep.subr.bf16.mxu1 %v5838_v1 }
0x20f5   :  { %v4189_v46 = vpack.c.bf16 %v4186_v54, %v4185_v44 }
0x20f6   :  { %5346 = vmatpush3.bf16.msra.mxu1 %v5545_v12 }
0x20f9   :  { %5336 = vmatmul.mubr.msk.bf16.gmra.mrb[108].mxu0 %vm225_vm2, %v4189_v46 }
0x20fa   :  { %5363 = vmatprep.mubr.msk.bf16.mxu0 %vm5839_vm0, %v5838_v1 }
0x21a1   :  { %v4258_v0 = vpop.f32.mrb[100].mxu0 }
0x21a2   :  { %v4259_v30 = vadd.f32 %v4736_v55, %v4258_v0  ;;  %v5329_v57 = vpop.f32.mrb[101].mxu0 }
0x21a3   :  { %v4261_v24 = vpop.f32.mrb[102].mxu0 }
0x21a4   :  { %v4287_v43 = vmul.f32 0.70710677, %v4259_v30  ;;  %v4262_v62 = vadd.f32 %v4736_v55, %v4261_v24  ;;  %v5330_v35 = vpop.f32.mrb[103].mxu0  ;;  %v4281_v42 = vmul.f32 0.5, %v4259_v30 }
0x21a6   :  { %5800 = verf.f32 %v4287_v43  ;;  %v4288_v48 = vmul.f32 0.70710677, %v4262_v62  ;;  %v4282_v32 = vmul.f32 0.5, %v4262_v62 }
0x21a8   :  { %5802 = verf.f32 %v4288_v48 }
0x21b0   :  { %v5801_v8 = vpop.eup %5800 }
0x21b1   :  { %v4299_v36 = vadd.f32 1.0, %v5801_v8 }
0x21b2   :  { %v5803_v14 = vpop.eup %5802 }
0x21b3   :  { %v4300_v7 = vadd.f32 1.0, %v5803_v14  ;;  %v4305_v51 = vmul.f32 %v4299_v36, %v4281_v42 }
0x21b5   :  { %v4306_v31 = vmul.f32 %v4300_v7, %v4282_v32 }
0x21b7   :  { %v4311_v15 = vpack.c.bf16 %v4306_v31, %v4305_v51 }
0x21b9   :  { %5348 = vmatmul.mubr.msk.bf16.vlgmr.msra.gmra.mrb[112].mxu1 %vm118_vm1, %v4311_v15 }
0x21ba   :  { %5351 = vmatprep.mubr.msk.bf16.mxu1 %vm5839_vm0, %v5838_v1 }
0x21c4   :  { %v4266_v29 = vpop.f32.mrb[104].mxu0 }
0x21c5   :  { %v4267_v21 = vadd.f32 %v4736_v55, %v4266_v29  ;;  %v5333_v13 = vpop.f32.mrb[105].mxu0 }
0x21c6   :  { %v4269_v49 = vpop.f32.mrb[106].mxu0 }
0x21c7   :  { %v4289_v60 = vmul.f32 0.70710677, %v4267_v21  ;;  %v4270_v17 = vadd.f32 %v4736_v55, %v4269_v49  ;;  %v5334_v25 = vpop.f32.mrb[107].mxu0  ;;  %v4283_v9 = vmul.f32 0.5, %v4267_v21 }
0x21c9   :  { %5804 = verf.f32 %v4289_v60  ;;  %v4290_v6 = vmul.f32 0.70710677, %v4270_v17  ;;  %v4284_v33 = vmul.f32 0.5, %v4270_v17 }
0x21cb   :  { %5806 = verf.f32 %v4290_v6 }
0x21cc   :  { %v4274_v58 = vpop.f32.mrb[108].mxu0 }
0x21cd   :  { %v4275_v4 = vadd.f32 %v4736_v55, %v4274_v58  ;;  %v5337_v59 = vpop.f32.mrb[109].mxu0 }
0x21ce   :  { %v4277_v34 = vpop.f32.mrb[110].mxu0 }
0x21cf   :  { %v4291_v3 = vmul.f32 0.70710677, %v4275_v4  ;;  %v4278_v37 = vadd.f32 %v4736_v55, %v4277_v34  ;;  %v5338_v61 = vpop.f32.mrb[111].mxu0  ;;  %v4285_v27 = vmul.f32 0.5, %v4275_v4 }
0x21d1   :  { %5808 = verf.f32 %v4291_v3  ;;  %v4292_v22 = vmul.f32 0.70710677, %v4278_v37  ;;  %v4286_v18 = vmul.f32 0.5, %v4278_v37 }
0x21d3   :  { %v5805_v45 = vpop.eup %5804  ;;  %5810 = verf.f32 %v4292_v22 }
0x21d4   :  { %v4301_v38 = vadd.f32 1.0, %v5805_v45  ;;  %v5546_v45 = vld [vmem:[%s7275_s19] sm:$0xff]  }
0x21d5   :  { %v5807_v40 = vpop.eup %5806  ;;  %5360 = vmatpush3.bf16.msra.mxu0 %v5546_v45 }
0x21d6   :  { %v4302_v16 = vadd.f32 1.0, %v5807_v40  ;;  %v4307_v39 = vmul.f32 %v4301_v38, %v4283_v9  ;;  %5361 = vmatprep.subr.bf16.mxu0 %v5838_v1  ;;  %v5547_v38 = vld [vmem:[%s7275_s19 + $0x8] sm:$0xff]  }
0x21d8   :  { %v4308_v19 = vmul.f32 %v4302_v16, %v4284_v33 }
0x21d9   :  { %5362 = vmatpush3.bf16.msra.mxu0 %v5547_v38 }
0x21da   :  { %v4312_v47 = vpack.c.bf16 %v4308_v19, %v4307_v39  ;;  %v4759_v39 = vld [vmem:[%s7273_s17] ss:$0 sm:$0xff] }
0x21db   :  { %v5809_v63 = vpop.eup %5808 }
0x21dc   :  { %v4303_v23 = vadd.f32 1.0, %v5809_v63  ;;  %5352 = vmatmul.mubr.msk.bf16.gmra.mrb[116].mxu1 %vm118_vm1, %v4312_v47 }
0x21dd   :  { %v5811_v50 = vpop.eup %5810  ;;  %5355 = vmatprep.mubr.msk.bf16.mxu1 %vm5839_vm0, %v5838_v1  ;;  %v4760_v1 = vld [vmem:[%s7274_s18] ss:$0 sm:$0xff]  ;;  %s5854_s18 = smov [#allocation2]  }
0x21de   :  { %v4304_v11 = vadd.f32 1.0, %v5811_v50  ;;  %v4309_v2 = vmul.f32 %v4303_v23, %v4285_v27  ;;  %s4590_s7 = sshll.u32 %s5854_s18, 4  ;;  %s4591_s7 = int_to_ptr.vmem [resolvable:$true] %s4590_s7 }
0x21df   :  { %s5814_s0 = scalar_lea.vmem %s4591_s7, 32  ;;  %p5819_p1 = scmp.lt.s32.totalorder %s4591_s7, %s4591_s7 }
0x21e0   :  { %v4310_v53 = vmul.f32 %v4304_v11, %v4286_v18  ;;  %p5815_p0 = scmp.ne.s32.totalorder %s4591_s7, %s5814_s0  ;;  %p5820_p2 = scmp.lt.s32.totalorder %s5814_s0, %s5814_s0 }
0x21e2   :  { %v4313_v10 = vpack.c.bf16 %v4310_v53, %v4309_v2  ;;  %p5821_p3 = por %p5820_p2, %p5819_p1 }
0x21e4   :  { %5356 = vmatmul.mubr.msk.bf16.gmra.mrb[120].mxu1 %vm118_vm1, %v4313_v10  ;;  %p5822_p4 = pnand %p5821_p3, %p5815_p0 }
0x228c   :  { %v4398_v28 = vpop.f32.mrb[112].mxu1 }
0x228d   :  { %v5349_v54 = vpop.f32.mrb[113].mxu1 }
0x228e   :  { %v4401_v44 = vpop.f32.mrb[114].mxu1 }
0x228f   :  { %v5350_v46 = vpop.f32.mrb[115].mxu1 }
0x2290   :  { %v4761_v46 = vld [vmem:[%s7276_s20] ss:$0 sm:$0xff] }
0x22af   :  { %v4406_v52 = vpop.f32.mrb[116].mxu1 }
0x22b0   :  { %v4407_v5 = vadd.f32 %v4751_v41, %v4406_v52  ;;  %v5353_v12 = vpop.f32.mrb[117].mxu1 }
0x22b1   :  { %v4409_v55 = vpop.f32.mrb[118].mxu1 }
0x22b2   :  { %v4423_v0 = vadd.f32 %v4407_v5, %v7134_v56  ;;  %v5354_v30 = vpop.f32.mrb[119].mxu1 }
0x22b4   :  { %v4429_v57 = vsel %vm191_vm3, %v4423_v0, 0.0 }
0x22b5   :  { %v4436_v24 = vsel %vm225_vm2, %v4429_v57, 0.0 }
0x22b6   :  { %v4438_v43 = vrot.slane %v4436_v24, 4 }
0x22b7   :  { %v4414_v62 = vpop.f32.mrb[120].mxu1 }
0x22b8   :  { %v5357_v35 = vpop.f32.mrb[121].mxu1  ;;  %v4439_v8 = vadd.f32 %v4438_v43, %v4436_v24 }
0x22b9   :  { %v4417_v48 = vpop.f32.mrb[122].mxu1 }
0x22ba   :  { %v4418_v36 = vadd.f32 %v4751_v41, %v4417_v48  ;;  %v5358_v14 = vpop.f32.mrb[123].mxu1  ;;  %v4440_v32 = vrot.slane %v4439_v8, 2 }
0x22bc   :  { %v4426_v42 = vadd.f32 %v4418_v36, %v7142_v20  ;;  %v4441_v31 = vadd.f32 %v4440_v32, %v4439_v8 }
0x22be   :  { %v4432_v7 = vsel %vm191_vm3, %v4426_v42, 0.0  ;;  %v4442_v13 = vrot.slane %v4441_v31, 1 }
0x22bf   :  { %v4447_v56 = vsel %vm225_vm2, %v4432_v7, 0.0 }
0x22c0   :  { %v4449_v51 = vrot.slane %v4447_v56, 4  ;;  %v4443_v60 = vadd.f32 %v4442_v13, %v4441_v31 }
0x22c2   :  { %v4450_v15 = vadd.f32 %v4449_v51, %v4447_v56 }
0x22c4   :  { %v4451_v29 = vrot.slane %v4450_v15, 2 }
0x22c6   :  { %v4452_v21 = vadd.f32 %v4451_v29, %v4450_v15 }
0x22c8   :  { %v4453_v49 = vrot.slane %v4452_v21, 1 }
0x22ca   :  { %v4454_v17 = vadd.f32 %v4453_v49, %v4452_v21 }
0x22cc   :  { %v4460_v25 = vsel %vm4459_vm9, %v4454_v17, %v4443_v60 }
0x22cd   :  { %v4463_v20 = vsel %vm4462_vm10, %v4460_v25, 0.0 }
0x22ce   :  { %4464 = vadd.xlane.f32.xlu0 %v4463_v20 }
0x235b   :  { %v4465_v6 = vpop.xlane.xlu0 %4464 }
0x235c   :  { %v4466_v26 = vmul.f32 0.03125, %v4465_v6 }
0x235e   :  { %v4468_v58 = vrot.slane %v4466_v26, 1  ;;  %v4471_v4 = vsub.f32 %v4443_v60, %v4466_v26 }
0x2360   :  { %v4472_v59 = vsub.f32 %v4454_v17, %v4468_v58  ;;  %v4473_v3 = vmul.f32 %v4471_v4, %v4471_v4 }
0x2362   :  { %v4474_v34 = vmul.f32 %v4472_v59, %v4472_v59 }
0x2364   :  { %v4477_v37 = vrot.slane %v4474_v34, 7 }
0x2366   :  { %v4478_v61 = vsel %vm4459_vm9, %v4477_v37, %v4473_v3 }
0x2367   :  { %v4480_v22 = vsel %vm4462_vm10, %v4478_v61, 0.0 }
0x2368   :  { %4481 = vadd.xlane.f32.xlu1 %v4480_v22 }
0x23f5   :  { %v4482_v40 = vpop.xlane.xlu1 %4481 }
0x23f6   :  { %v4483_v9 = vmul.f32 0.03125, %v4482_v40 }
0x23f8   :  { %v4484_v33 = vadd.f32 1e-05, %v4483_v9 }
0x23fa   :  { %5812 = vrsqrt.f32 %v4484_v33 }
0x2404   :  { %v5813_v16 = vpop.eup %5812 }
0x2405   :  { %v4487_v19 = vrot.slane %v5813_v16, 1  ;;  %v4490_v47 = vmul.f32 %v5813_v16, %v4471_v4 }
0x2407   :  { %v4491_v63 = vmul.f32 %v4487_v19, %v4472_v59  ;;  %v4498_v23 = vmul.f32 %v4759_v39, %v4490_v47 }
0x2409   :  { %v4499_v50 = vmul.f32 %v4759_v39, %v4491_v63  ;;  %v4506_v27 = vadd.f32 %v4760_v1, %v4498_v23 }
0x240b   :  { %v4507_v18 = vadd.f32 %v4760_v1, %v4499_v50  ;;  %v4508_v11 = vpack.c.bf16 %v4506_v27, %v4506_v27 }
0x240d   :  { %v4509_v2 = vpack.c.bf16 %v4507_v18, %v4507_v18  ;;  %v4523_v10 = vunpack.c.l.b16 %v4508_v11 }
0x240f   :  { %v4524_v53 = vunpack.c.l.b16 %v4509_v2 }
0x2411   :  { %v4525_v28 = vrot.slane %v4524_v53, 7 }
0x2413   :  { %v4526_v54 = vsel %vm4459_vm9, %v4525_v28, %v4523_v10 }
0x2414   :  { %v4527_v44 = vpack.c.b16 %v4526_v54, %v4526_v54 }
0x2416   :  { %5364 = vmatmul.mubr.msk.bf16.vlgmr.msra.gmra.mrb[112].mxu0 %vm225_vm2, %v4527_v44 }
0x24e9   :  { %v4577_v41 = vpop.f32.mrb[112].mxu0 }
0x24ea   :  { %v4578_v52 = vadd.f32 %v4761_v46, %v4577_v41  ;;  %v5365_v5 = vpop.f32.mrb[113].mxu0 }
0x24eb   :  { %v4580_v12 = vpop.f32.mrb[114].mxu0 }
0x24ec   :  { %4583 = vst [vmem:[#allocation2] sm:$0x3] %v4578_v52  ;;  %v5366_v55 = vpop.f32.mrb[115].mxu0 }
0x24ed   :  { %5825 = shalt.err (!%p5822_p4)
}
0x24ee   :  { %s5826_s20 = scalar_lea.hbm %s7277_s21, 32 }
0x24ef   :  { %p5827_p5 = scmp.ne.s32.totalorder %s7277_s21, %s5826_s20  ;;  %p5830_p6 = scmp.lt.u32.totalorder %s5826_s20, %s7277_s21 }
0x24f1   :  { %p5832_p7 = pnand %p5830_p6, %p5827_p5 }
0x24f3   :  { %5835 = shalt.err (!%p5832_p7)
}
0x24f4   :  { %4593 = dma.vmem_to_hbm [thread:$0]  %s4591_s7, 32, %s7277_s21, [#allocation3]  }
0x24f5   :  { %5836 = dma.done.wait [#allocation3], 32  }
0x24f6   :  { %5837 = vsyncadd [#allocation3], 4294967264 }
0x24f7   :  { %4597 = vsyncpa [#allocation3], 1 }

</bundles_post_ra>
